<compile_context>
chip_gen: v6e
topology: v6e:2x2x1
jax: 0.10.0
libtpu: 0.0.40
codegen_flags: <defaults>
</compile_context>

<pallas_src>
import jax
import jax.numpy as jnp
from jax import lax
from jax.experimental import pallas as pl
from jax.experimental.pallas import tpu as pltpu


# ---------------------------------------------------------------- fused kernel
def _layer_kernel(x_ref, len_ref, h0_ref, gamma_ref, beta_ref,
                  w1t_ref, b1_ref, wi_ref, wh_ref, bc_ref, w2t_ref, b2_ref,
                  o_ref, hn_ref, pre_sc, of_sc, ob_sc):
    T, B, d_model = x_ref.shape
    d_rnn = w1t_ref.shape[1]

    gamma = gamma_ref[...]                    # (1, d_model)
    beta = beta_ref[...]                      # (1, d_model)
    w1t = w1t_ref[...]                        # (d_model, d_rnn)
    b1 = b1_ref[...]                          # (1, d_rnn)

    # ---- LayerNorm + fc1 + ReLU (all VMEM-resident, per timestep) ----
    for t in range(T):
        xt = x_ref[t]                         # (B, d_model)
        mean = jnp.mean(xt, axis=-1, keepdims=True)
        var = jnp.mean((xt - mean) ** 2, axis=-1, keepdims=True)
        zt = (xt - mean) * lax.rsqrt(var + 1e-5) * gamma + beta
        pre_sc[t] = jnp.maximum(
            jnp.dot(zt, w1t, preferred_element_type=jnp.float32) + b1, 0.0)

    # ---- bidirectional masked RNN (relu), fwd+bwd fused via block-diag W ----
    wi = wi_ref[...]                          # (2*d_rnn, 2*d_rnn)
    wh = wh_ref[...]                          # (2*d_rnn, 2*d_rnn)
    bc = bc_ref[...]                          # (1, 2*d_rnn)
    lens = len_ref[...]                       # (B, 1) int32
    lane = lax.broadcasted_iota(jnp.int32, (B, 2 * d_rnn), 1)
    is_fwd = lane < d_rnn                     # first half lanes = forward dir

    h = h0_ref[...]                           # (B, 2*d_rnn) = [h_fwd | h_bwd]
    for t in range(T):
        tb = T - 1 - t
        # forward direction consumes step t, backward consumes step T-1-t
        xcat = jnp.concatenate([pre_sc[t], pre_sc[tb]], axis=-1)   # (B, 2*d_rnn)
        nh = jnp.maximum(
            jnp.dot(xcat, wi, preferred_element_type=jnp.float32)
            + jnp.dot(h, wh, preferred_element_type=jnp.float32) + bc, 0.0)
        mf = (lens > t).astype(jnp.float32)   # (B, 1) validity of step t
        mb = (lens > tb).astype(jnp.float32)  # (B, 1) validity of step T-1-t
        mcat = jnp.where(is_fwd, mf, mb)      # (B, 2*d_rnn)
        h = mcat * nh + (1.0 - mcat) * h      # packed: skip padded steps
        of_sc[t] = mf * h[:, :d_rnn]          # pad_packed pads with zeros
        ob_sc[tb] = mb * h[:, d_rnn:]

    # final hidden states, written once
    hn_ref[0] = h[:, :d_rnn]
    hn_ref[1] = h[:, d_rnn:]

    # ---- fc2 + residual (dropout is eval-mode identity) ----
    # TODO(synk): nn.Dropout is stochastic in train mode; identity here.
    w2t = w2t_ref[...]                        # (d_rnn, d_model)
    b2 = b2_ref[...]                          # (1, d_model)
    for t in range(T):
        st = of_sc[t] + ob_sc[t]              # x[:,:, :d_rnn] + x[:,:, -d_rnn:]
        yt = jnp.dot(st, w2t, preferred_element_type=jnp.float32) + b2
        o_ref[t] = x_ref[t] + yt


# ---------------------------------------------------------------- param prep
def prepare_params(params):
    """Hoisted one-time weight fusion: transposes, block-diagonal RNN weights,
    combined biases. Call once; layer_forward takes the prepared dict."""
    d_rnn = params["w_ih_f"].shape[0]
    d_model = params["w1"].shape[1]
    z = jnp.zeros((d_rnn, d_rnn), jnp.float32)
    return {
        "d_rnn": d_rnn,
        "d_model": d_model,
        "gamma": params["ln_gamma"].reshape(1, d_model),
        "beta": params["ln_beta"].reshape(1, d_model),
        "w1t": params["w1"].T,
        "b1": params["b1"].reshape(1, d_rnn),
        "wi_blk": jnp.block([[params["w_ih_f"].T, z], [z, params["w_ih_b"].T]]),
        "wh_blk": jnp.block([[params["w_hh_f"].T, z], [z, params["w_hh_b"].T]]),
        "b_cat": jnp.concatenate(
            [params["b_ih_f"] + params["b_hh_f"],
             params["b_ih_b"] + params["b_hh_b"]]).reshape(1, 2 * d_rnn),
        "w2t": params["w2"].T,
        "b2": params["b2"].reshape(1, d_model),
    }


# ---------------------------------------------------------------- wrapper
def layer_forward(x, lengths, prep, h0=None):
    T, B, d_model = x.shape
    d_rnn = prep["d_rnn"]
    if h0 is None:
        h0 = jnp.zeros((2, B, d_rnn), jnp.float32)
    h0_cat = jnp.concatenate([h0[0], h0[1]], axis=-1)      # (B, 2*d_rnn)
    lens = lengths.astype(jnp.int32).reshape(B, 1)

    out, hn = pl.pallas_call(
        _layer_kernel,
        out_shape=(jax.ShapeDtypeStruct((T, B, d_model), jnp.float32),
                   jax.ShapeDtypeStruct((2, B, d_rnn), jnp.float32)),
        scratch_shapes=[pltpu.VMEM((T, B, d_rnn), jnp.float32),   # pre (fc1 out)
                        pltpu.VMEM((T, B, d_rnn), jnp.float32),   # fwd outputs
                        pltpu.VMEM((T, B, d_rnn), jnp.float32)],  # bwd outputs
    )(x, lens, h0_cat,
      prep["gamma"], prep["beta"], prep["w1t"], prep["b1"],
      prep["wi_blk"], prep["wh_blk"], prep["b_cat"],
      prep["w2t"], prep["b2"])
    return out, hn


# ---------------------------------------------------------------- pure-JAX reference
def ref_forward(x, lengths, params, h0):
    T, B, d_model = x.shape
    mean = x.mean(-1, keepdims=True)
    var = ((x - mean) ** 2).mean(-1, keepdims=True)
    z = (x - mean) / jnp.sqrt(var + 1e-5) * params["ln_gamma"] + params["ln_beta"]
    z = jnp.maximum(z @ params["w1"].T + params["b1"], 0.0)
    mask = (jnp.arange(T)[:, None] < lengths[None, :]).astype(jnp.float32)[:, :, None]
    hf, hb = h0[0], h0[1]
    of, ob = [], [None] * T
    for t in range(T):
        new = jnp.maximum(z[t] @ params["w_ih_f"].T + params["b_ih_f"]
                          + hf @ params["w_hh_f"].T + params["b_hh_f"], 0.0)
        hf = mask[t] * new + (1 - mask[t]) * hf
        of.append(mask[t] * hf)
    for t in range(T - 1, -1, -1):
        new = jnp.maximum(z[t] @ params["w_ih_b"].T + params["b_ih_b"]
                          + hb @ params["w_hh_b"].T + params["b_hh_b"], 0.0)
        hb = mask[t] * new + (1 - mask[t]) * hb
        ob[t] = mask[t] * hb
    rnn = jnp.stack(of) + jnp.stack(ob)
    y = rnn @ params["w2"].T + params["b2"]
    return x + y, jnp.stack([hf, hb])


# ---------------------------------------------------------------- main
if __name__ == "__main__":
    d_model, d_rnn = 32, 16
    T, B = 8, 4                      # seq_len, batch

    key = jax.random.PRNGKey(0)
    ks = jax.random.split(key, 12)
    params = {
        "ln_gamma": jnp.ones((d_model,), jnp.float32),
        "ln_beta":  jnp.zeros((d_model,), jnp.float32),
        "w1": 0.1 * jax.random.normal(ks[0], (d_rnn, d_model), jnp.float32),
        "b1": 0.1 * jax.random.normal(ks[1], (d_rnn,), jnp.float32),
        "w2": 0.1 * jax.random.normal(ks[2], (d_model, d_rnn), jnp.float32),
        "b2": 0.1 * jax.random.normal(ks[3], (d_model,), jnp.float32),
        "w_ih_f": 0.1 * jax.random.normal(ks[4], (d_rnn, d_rnn), jnp.float32),
        "w_hh_f": 0.1 * jax.random.normal(ks[5], (d_rnn, d_rnn), jnp.float32),
        "b_ih_f": 0.1 * jax.random.normal(ks[6], (d_rnn,), jnp.float32),
        "b_hh_f": 0.1 * jax.random.normal(ks[7], (d_rnn,), jnp.float32),
        "w_ih_b": 0.1 * jax.random.normal(ks[8], (d_rnn, d_rnn), jnp.float32),
        "w_hh_b": 0.1 * jax.random.normal(ks[9], (d_rnn, d_rnn), jnp.float32),
        "b_ih_b": 0.1 * jax.random.normal(ks[10], (d_rnn,), jnp.float32),
        "b_hh_b": 0.1 * jax.random.normal(ks[11], (d_rnn,), jnp.float32),
    }

    xkey, _ = jax.random.split(key)
    x = jax.random.normal(xkey, (T, B, d_model), jnp.float32)
    lengths = jnp.array([8, 7, 5, 3], jnp.int32)     # sorted desc (enforce_sorted=True)
    h0 = jnp.zeros((2, B, d_rnn), jnp.float32)

    prep = prepare_params(params)                    # one-time weight fusion
    out, hn = layer_forward(x, lengths, prep, h0)
    jax.block_until_ready(out)
    jax.block_until_ready(hn)

    out_ref, hn_ref = ref_forward(x, lengths, params, h0)
    assert jnp.allclose(out, out_ref, rtol=1e-4, atol=1e-4), "output mismatch"
    assert jnp.allclose(hn, hn_ref, rtol=1e-4, atol=1e-4), "hidden mismatch"

    print("KERNEL_OK")
</pallas_src>

<mosaic_0001>
module attributes {stable_mosaic.version = 11 : i64} {
  func.func @_layer_kernel(%arg0: memref<8x4x32xf32, #tpu.memory_space<vmem>>, %arg1: memref<4x1xi32, #tpu.memory_space<vmem>>, %arg2: memref<4x32xf32, #tpu.memory_space<vmem>>, %arg3: memref<1x32xf32, #tpu.memory_space<vmem>>, %arg4: memref<1x32xf32, #tpu.memory_space<vmem>>, %arg5: memref<32x16xf32, #tpu.memory_space<vmem>>, %arg6: memref<1x16xf32, #tpu.memory_space<vmem>>, %arg7: memref<32x32xf32, #tpu.memory_space<vmem>>, %arg8: memref<32x32xf32, #tpu.memory_space<vmem>>, %arg9: memref<1x32xf32, #tpu.memory_space<vmem>>, %arg10: memref<16x32xf32, #tpu.memory_space<vmem>>, %arg11: memref<1x32xf32, #tpu.memory_space<vmem>>, %arg12: memref<8x4x32xf32, #tpu.memory_space<vmem>>, %arg13: memref<2x4x16xf32, #tpu.memory_space<vmem>>, %arg14: memref<8x4x16xf32, #tpu.memory_space<vmem>>, %arg15: memref<8x4x16xf32, #tpu.memory_space<vmem>>, %arg16: memref<8x4x16xf32, #tpu.memory_space<vmem>>) attributes {dimension_semantics = [], scalar_prefetch = 0 : i64, scratch_operands = 3 : i64, tpu.core_type = #tpu.core_type<tc>} {
    %c0 = arith.constant 0 : index
    %c0_0 = arith.constant 0 : index
    %0 = vector.load %arg3[%c0, %c0_0] : memref<1x32xf32, #tpu.memory_space<vmem>>, vector<1x32xf32>
    %c0_1 = arith.constant 0 : index
    %c0_2 = arith.constant 0 : index
    %1 = vector.load %arg4[%c0_1, %c0_2] : memref<1x32xf32, #tpu.memory_space<vmem>>, vector<1x32xf32>
    %c0_3 = arith.constant 0 : index
    %c0_4 = arith.constant 0 : index
    %2 = vector.load %arg5[%c0_3, %c0_4] : memref<32x16xf32, #tpu.memory_space<vmem>>, vector<32x16xf32>
    %c0_5 = arith.constant 0 : index
    %c0_6 = arith.constant 0 : index
    %3 = vector.load %arg6[%c0_5, %c0_6] : memref<1x16xf32, #tpu.memory_space<vmem>>, vector<1x16xf32>
    %c0_7 = arith.constant 0 : index
    %c0_8 = arith.constant 0 : index
    %c0_9 = arith.constant 0 : index
    %4 = vector.load %arg0[%c0_7, %c0_8, %c0_9] : memref<8x4x32xf32, #tpu.memory_space<vmem>>, vector<1x4x32xf32>
    %5 = vector.shape_cast %4 : vector<1x4x32xf32> to vector<4x32xf32>
    %cst = arith.constant dense<0.000000e+00> : vector<4xf32>
    %6 = vector.multi_reduction <add>, %5, %cst [1] : vector<4x32xf32> to vector<4xf32>
    %7 = vector.shape_cast %6 : vector<4xf32> to vector<4x1xf32>
    %cst_10 = arith.constant 3.200000e+01 : f32
    %8 = vector.broadcast %cst_10 : f32 to vector<4x1xf32>
    %9 = arith.divf %7, %8 : vector<4x1xf32>
    %10 = vector.broadcast %9 : vector<4x1xf32> to vector<4x32xf32>
    %11 = arith.subf %5, %10 : vector<4x32xf32>
    %12 = arith.mulf %11, %11 : vector<4x32xf32>
    %cst_11 = arith.constant dense<0.000000e+00> : vector<4xf32>
    %13 = vector.multi_reduction <add>, %12, %cst_11 [1] : vector<4x32xf32> to vector<4xf32>
    %14 = vector.shape_cast %13 : vector<4xf32> to vector<4x1xf32>
    %cst_12 = arith.constant 3.200000e+01 : f32
    %15 = vector.broadcast %cst_12 : f32 to vector<4x1xf32>
    %16 = arith.divf %14, %15 : vector<4x1xf32>
    %17 = vector.broadcast %9 : vector<4x1xf32> to vector<4x32xf32>
    %18 = arith.subf %5, %17 : vector<4x32xf32>
    %cst_13 = arith.constant 9.99999974E-6 : f32
    %19 = vector.broadcast %cst_13 : f32 to vector<4x1xf32>
    %20 = arith.addf %16, %19 : vector<4x1xf32>
    %21 = math.rsqrt %20 : vector<4x1xf32>
    %22 = vector.broadcast %21 : vector<4x1xf32> to vector<4x32xf32>
    %23 = arith.mulf %18, %22 : vector<4x32xf32>
    %24 = vector.broadcast %0 : vector<1x32xf32> to vector<4x32xf32>
    %25 = arith.mulf %23, %24 : vector<4x32xf32>
    %26 = vector.broadcast %1 : vector<1x32xf32> to vector<4x32xf32>
    %27 = arith.addf %25, %26 : vector<4x32xf32>
    %cst_14 = arith.constant dense<0.000000e+00> : vector<4x16xf32>
    %28 = tpu.matmul %27, %2, %cst_14 {dimension_numbers = #tpu.dot_dimension_numbers<[1], [0], [0], [1], [0, 0, 1, 1], [], []>} : vector<4x32xf32>, vector<32x16xf32>, vector<4x16xf32> -> vector<4x16xf32>
    %29 = vector.broadcast %3 : vector<1x16xf32> to vector<4x16xf32>
    %30 = arith.addf %28, %29 : vector<4x16xf32>
    %cst_15 = arith.constant 0.000000e+00 : f32
    %31 = vector.broadcast %cst_15 : f32 to vector<4x16xf32>
    %32 = arith.maximumf %30, %31 : vector<4x16xf32>
    %c0_16 = arith.constant 0 : index
    %c0_17 = arith.constant 0 : index
    %c0_18 = arith.constant 0 : index
    %33 = vector.load %arg14[%c0_16, %c0_17, %c0_18] : memref<8x4x16xf32, #tpu.memory_space<vmem>>, vector<1x4x16xf32>
    %34 = vector.shape_cast %33 : vector<1x4x16xf32> to vector<4x16xf32>
    %35 = vector.shape_cast %32 : vector<4x16xf32> to vector<1x4x16xf32>
    tpu.vector_store %arg14[%c0_16, %c0_17, %c0_18], %35 {strides = array<i32>} : memref<8x4x16xf32, #tpu.memory_space<vmem>>, vector<1x4x16xf32>,
    %c1 = arith.constant 1 : index
    %c0_19 = arith.constant 0 : index
    %c0_20 = arith.constant 0 : index
    %36 = vector.load %arg0[%c1, %c0_19, %c0_20] : memref<8x4x32xf32, #tpu.memory_space<vmem>>, vector<1x4x32xf32>
    %37 = vector.shape_cast %36 : vector<1x4x32xf32> to vector<4x32xf32>
    %cst_21 = arith.constant dense<0.000000e+00> : vector<4xf32>
    %38 = vector.multi_reduction <add>, %37, %cst_21 [1] : vector<4x32xf32> to vector<4xf32>
    %39 = vector.shape_cast %38 : vector<4xf32> to vector<4x1xf32>
    %cst_22 = arith.constant 3.200000e+01 : f32
    %40 = vector.broadcast %cst_22 : f32 to vector<4x1xf32>
    %41 = arith.divf %39, %40 : vector<4x1xf32>
    %42 = vector.broadcast %41 : vector<4x1xf32> to vector<4x32xf32>
    %43 = arith.subf %37, %42 : vector<4x32xf32>
    %44 = arith.mulf %43, %43 : vector<4x32xf32>
    %cst_23 = arith.constant dense<0.000000e+00> : vector<4xf32>
    %45 = vector.multi_reduction <add>, %44, %cst_23 [1] : vector<4x32xf32> to vector<4xf32>
    %46 = vector.shape_cast %45 : vector<4xf32> to vector<4x1xf32>
    %cst_24 = arith.constant 3.200000e+01 : f32
    %47 = vector.broadcast %cst_24 : f32 to vector<4x1xf32>
    %48 = arith.divf %46, %47 : vector<4x1xf32>
    %49 = vector.broadcast %41 : vector<4x1xf32> to vector<4x32xf32>
    %50 = arith.subf %37, %49 : vector<4x32xf32>
    %cst_25 = arith.constant 9.99999974E-6 : f32
    %51 = vector.broadcast %cst_25 : f32 to vector<4x1xf32>
    %52 = arith.addf %48, %51 : vector<4x1xf32>
    %53 = math.rsqrt %52 : vector<4x1xf32>
    %54 = vector.broadcast %53 : vector<4x1xf32> to vector<4x32xf32>
    %55 = arith.mulf %50, %54 : vector<4x32xf32>
    %56 = vector.broadcast %0 : vector<1x32xf32> to vector<4x32xf32>
    %57 = arith.mulf %55, %56 : vector<4x32xf32>
    %58 = vector.broadcast %1 : vector<1x32xf32> to vector<4x32xf32>
    %59 = arith.addf %57, %58 : vector<4x32xf32>
    %cst_26 = arith.constant dense<0.000000e+00> : vector<4x16xf32>
    %60 = tpu.matmul %59, %2, %cst_26 {dimension_numbers = #tpu.dot_dimension_numbers<[1], [0], [0], [1], [0, 0, 1, 1], [], []>} : vector<4x32xf32>, vector<32x16xf32>, vector<4x16xf32> -> vector<4x16xf32>
    %61 = vector.broadcast %3 : vector<1x16xf32> to vector<4x16xf32>
    %62 = arith.addf %60, %61 : vector<4x16xf32>
    %cst_27 = arith.constant 0.000000e+00 : f32
    %63 = vector.broadcast %cst_27 : f32 to vector<4x16xf32>
    %64 = arith.maximumf %62, %63 : vector<4x16xf32>
    %c1_28 = arith.constant 1 : index
    %c0_29 = arith.constant 0 : index
    %c0_30 = arith.constant 0 : index
    %65 = vector.load %arg14[%c1_28, %c0_29, %c0_30] : memref<8x4x16xf32, #tpu.memory_space<vmem>>, vector<1x4x16xf32>
    %66 = vector.shape_cast %65 : vector<1x4x16xf32> to vector<4x16xf32>
    %67 = vector.shape_cast %64 : vector<4x16xf32> to vector<1x4x16xf32>
    tpu.vector_store %arg14[%c1_28, %c0_29, %c0_30], %67 {strides = array<i32>} : memref<8x4x16xf32, #tpu.memory_space<vmem>>, vector<1x4x16xf32>,
    %c2 = arith.constant 2 : index
    %c0_31 = arith.constant 0 : index
    %c0_32 = arith.constant 0 : index
    %68 = vector.load %arg0[%c2, %c0_31, %c0_32] : memref<8x4x32xf32, #tpu.memory_space<vmem>>, vector<1x4x32xf32>
    %69 = vector.shape_cast %68 : vector<1x4x32xf32> to vector<4x32xf32>
    %cst_33 = arith.constant dense<0.000000e+00> : vector<4xf32>
    %70 = vector.multi_reduction <add>, %69, %cst_33 [1] : vector<4x32xf32> to vector<4xf32>
    %71 = vector.shape_cast %70 : vector<4xf32> to vector<4x1xf32>
    %cst_34 = arith.constant 3.200000e+01 : f32
    %72 = vector.broadcast %cst_34 : f32 to vector<4x1xf32>
    %73 = arith.divf %71, %72 : vector<4x1xf32>
    %74 = vector.broadcast %73 : vector<4x1xf32> to vector<4x32xf32>
    %75 = arith.subf %69, %74 : vector<4x32xf32>
    %76 = arith.mulf %75, %75 : vector<4x32xf32>
    %cst_35 = arith.constant dense<0.000000e+00> : vector<4xf32>
    %77 = vector.multi_reduction <add>, %76, %cst_35 [1] : vector<4x32xf32> to vector<4xf32>
    %78 = vector.shape_cast %77 : vector<4xf32> to vector<4x1xf32>
    %cst_36 = arith.constant 3.200000e+01 : f32
    %79 = vector.broadcast %cst_36 : f32 to vector<4x1xf32>
    %80 = arith.divf %78, %79 : vector<4x1xf32>
    %81 = vector.broadcast %73 : vector<4x1xf32> to vector<4x32xf32>
    %82 = arith.subf %69, %81 : vector<4x32xf32>
    %cst_37 = arith.constant 9.99999974E-6 : f32
    %83 = vector.broadcast %cst_37 : f32 to vector<4x1xf32>
    %84 = arith.addf %80, %83 : vector<4x1xf32>
    %85 = math.rsqrt %84 : vector<4x1xf32>
    %86 = vector.broadcast %85 : vector<4x1xf32> to vector<4x32xf32>
    %87 = arith.mulf %82, %86 : vector<4x32xf32>
    %88 = vector.broadcast %0 : vector<1x32xf32> to vector<4x32xf32>
    %89 = arith.mulf %87, %88 : vector<4x32xf32>
    %90 = vector.broadcast %1 : vector<1x32xf32> to vector<4x32xf32>
    %91 = arith.addf %89, %90 : vector<4x32xf32>
    %cst_38 = arith.constant dense<0.000000e+00> : vector<4x16xf32>
    %92 = tpu.matmul %91, %2, %cst_38 {dimension_numbers = #tpu.dot_dimension_numbers<[1], [0], [0], [1], [0, 0, 1, 1], [], []>} : vector<4x32xf32>, vector<32x16xf32>, vector<4x16xf32> -> vector<4x16xf32>
    %93 = vector.broadcast %3 : vector<1x16xf32> to vector<4x16xf32>
    %94 = arith.addf %92, %93 : vector<4x16xf32>
    %cst_39 = arith.constant 0.000000e+00 : f32
    %95 = vector.broadcast %cst_39 : f32 to vector<4x16xf32>
    %96 = arith.maximumf %94, %95 : vector<4x16xf32>
    %c2_40 = arith.constant 2 : index
    %c0_41 = arith.constant 0 : index
    %c0_42 = arith.constant 0 : index
    %97 = vector.load %arg14[%c2_40, %c0_41, %c0_42] : memref<8x4x16xf32, #tpu.memory_space<vmem>>, vector<1x4x16xf32>
    %98 = vector.shape_cast %97 : vector<1x4x16xf32> to vector<4x16xf32>
    %99 = vector.shape_cast %96 : vector<4x16xf32> to vector<1x4x16xf32>
    tpu.vector_store %arg14[%c2_40, %c0_41, %c0_42], %99 {strides = array<i32>} : memref<8x4x16xf32, #tpu.memory_space<vmem>>, vector<1x4x16xf32>,
    %c3 = arith.constant 3 : index
    %c0_43 = arith.constant 0 : index
    %c0_44 = arith.constant 0 : index
    %100 = vector.load %arg0[%c3, %c0_43, %c0_44] : memref<8x4x32xf32, #tpu.memory_space<vmem>>, vector<1x4x32xf32>
    %101 = vector.shape_cast %100 : vector<1x4x32xf32> to vector<4x32xf32>
    %cst_45 = arith.constant dense<0.000000e+00> : vector<4xf32>
    %102 = vector.multi_reduction <add>, %101, %cst_45 [1] : vector<4x32xf32> to vector<4xf32>
    %103 = vector.shape_cast %102 : vector<4xf32> to vector<4x1xf32>
    %cst_46 = arith.constant 3.200000e+01 : f32
    %104 = vector.broadcast %cst_46 : f32 to vector<4x1xf32>
    %105 = arith.divf %103, %104 : vector<4x1xf32>
    %106 = vector.broadcast %105 : vector<4x1xf32> to vector<4x32xf32>
    %107 = arith.subf %101, %106 : vector<4x32xf32>
    %108 = arith.mulf %107, %107 : vector<4x32xf32>
    %cst_47 = arith.constant dense<0.000000e+00> : vector<4xf32>
    %109 = vector.multi_reduction <add>, %108, %cst_47 [1] : vector<4x32xf32> to vector<4xf32>
    %110 = vector.shape_cast %109 : vector<4xf32> to vector<4x1xf32>
    %cst_48 = arith.constant 3.200000e+01 : f32
    %111 = vector.broadcast %cst_48 : f32 to vector<4x1xf32>
    %112 = arith.divf %110, %111 : vector<4x1xf32>
    %113 = vector.broadcast %105 : vector<4x1xf32> to vector<4x32xf32>
    %114 = arith.subf %101, %113 : vector<4x32xf32>
    %cst_49 = arith.constant 9.99999974E-6 : f32
    %115 = vector.broadcast %cst_49 : f32 to vector<4x1xf32>
    %116 = arith.addf %112, %115 : vector<4x1xf32>
    %117 = math.rsqrt %116 : vector<4x1xf32>
    %118 = vector.broadcast %117 : vector<4x1xf32> to vector<4x32xf32>
    %119 = arith.mulf %114, %118 : vector<4x32xf32>
    %120 = vector.broadcast %0 : vector<1x32xf32> to vector<4x32xf32>
    %121 = arith.mulf %119, %120 : vector<4x32xf32>
    %122 = vector.broadcast %1 : vector<1x32xf32> to vector<4x32xf32>
    %123 = arith.addf %121, %122 : vector<4x32xf32>
    %cst_50 = arith.constant dense<0.000000e+00> : vector<4x16xf32>
    %124 = tpu.matmul %123, %2, %cst_50 {dimension_numbers = #tpu.dot_dimension_numbers<[1], [0], [0], [1], [0, 0, 1, 1], [], []>} : vector<4x32xf32>, vector<32x16xf32>, vector<4x16xf32> -> vector<4x16xf32>
    %125 = vector.broadcast %3 : vector<1x16xf32> to vector<4x16xf32>
    %126 = arith.addf %124, %125 : vector<4x16xf32>
    %cst_51 = arith.constant 0.000000e+00 : f32
    %127 = vector.broadcast %cst_51 : f32 to vector<4x16xf32>
    %128 = arith.maximumf %126, %127 : vector<4x16xf32>
    %c3_52 = arith.constant 3 : index
    %c0_53 = arith.constant 0 : index
    %c0_54 = arith.constant 0 : index
    %129 = vector.load %arg14[%c3_52, %c0_53, %c0_54] : memref<8x4x16xf32, #tpu.memory_space<vmem>>, vector<1x4x16xf32>
    %130 = vector.shape_cast %129 : vector<1x4x16xf32> to vector<4x16xf32>
    %131 = vector.shape_cast %128 : vector<4x16xf32> to vector<1x4x16xf32>
    tpu.vector_store %arg14[%c3_52, %c0_53, %c0_54], %131 {strides = array<i32>} : memref<8x4x16xf32, #tpu.memory_space<vmem>>, vector<1x4x16xf32>,
    %c4 = arith.constant 4 : index
    %c0_55 = arith.constant 0 : index
    %c0_56 = arith.constant 0 : index
    %132 = vector.load %arg0[%c4, %c0_55, %c0_56] : memref<8x4x32xf32, #tpu.memory_space<vmem>>, vector<1x4x32xf32>
    %133 = vector.shape_cast %132 : vector<1x4x32xf32> to vector<4x32xf32>
    %cst_57 = arith.constant dense<0.000000e+00> : vector<4xf32>
    %134 = vector.multi_reduction <add>, %133, %cst_57 [1] : vector<4x32xf32> to vector<4xf32>
    %135 = vector.shape_cast %134 : vector<4xf32> to vector<4x1xf32>
    %cst_58 = arith.constant 3.200000e+01 : f32
    %136 = vector.broadcast %cst_58 : f32 to vector<4x1xf32>
    %137 = arith.divf %135, %136 : vector<4x1xf32>
    %138 = vector.broadcast %137 : vector<4x1xf32> to vector<4x32xf32>
    %139 = arith.subf %133, %138 : vector<4x32xf32>
    %140 = arith.mulf %139, %139 : vector<4x32xf32>
    %cst_59 = arith.constant dense<0.000000e+00> : vector<4xf32>
    %141 = vector.multi_reduction <add>, %140, %cst_59 [1] : vector<4x32xf32> to vector<4xf32>
    %142 = vector.shape_cast %141 : vector<4xf32> to vector<4x1xf32>
    %cst_60 = arith.constant 3.200000e+01 : f32
    %143 = vector.broadcast %cst_60 : f32 to vector<4x1xf32>
    %144 = arith.divf %142, %143 : vector<4x1xf32>
    %145 = vector.broadcast %137 : vector<4x1xf32> to vector<4x32xf32>
    %146 = arith.subf %133, %145 : vector<4x32xf32>
    %cst_61 = arith.constant 9.99999974E-6 : f32
    %147 = vector.broadcast %cst_61 : f32 to vector<4x1xf32>
    %148 = arith.addf %144, %147 : vector<4x1xf32>
    %149 = math.rsqrt %148 : vector<4x1xf32>
    %150 = vector.broadcast %149 : vector<4x1xf32> to vector<4x32xf32>
    %151 = arith.mulf %146, %150 : vector<4x32xf32>
    %152 = vector.broadcast %0 : vector<1x32xf32> to vector<4x32xf32>
    %153 = arith.mulf %151, %152 : vector<4x32xf32>
    %154 = vector.broadcast %1 : vector<1x32xf32> to vector<4x32xf32>
    %155 = arith.addf %153, %154 : vector<4x32xf32>
    %cst_62 = arith.constant dense<0.000000e+00> : vector<4x16xf32>
    %156 = tpu.matmul %155, %2, %cst_62 {dimension_numbers = #tpu.dot_dimension_numbers<[1], [0], [0], [1], [0, 0, 1, 1], [], []>} : vector<4x32xf32>, vector<32x16xf32>, vector<4x16xf32> -> vector<4x16xf32>
    %157 = vector.broadcast %3 : vector<1x16xf32> to vector<4x16xf32>
    %158 = arith.addf %156, %157 : vector<4x16xf32>
    %cst_63 = arith.constant 0.000000e+00 : f32
    %159 = vector.broadcast %cst_63 : f32 to vector<4x16xf32>
    %160 = arith.maximumf %158, %159 : vector<4x16xf32>
    %c4_64 = arith.constant 4 : index
    %c0_65 = arith.constant 0 : index
    %c0_66 = arith.constant 0 : index
    %161 = vector.load %arg14[%c4_64, %c0_65, %c0_66] : memref<8x4x16xf32, #tpu.memory_space<vmem>>, vector<1x4x16xf32>
    %162 = vector.shape_cast %161 : vector<1x4x16xf32> to vector<4x16xf32>
    %163 = vector.shape_cast %160 : vector<4x16xf32> to vector<1x4x16xf32>
    tpu.vector_store %arg14[%c4_64, %c0_65, %c0_66], %163 {strides = array<i32>} : memref<8x4x16xf32, #tpu.memory_space<vmem>>, vector<1x4x16xf32>,
    %c5 = arith.constant 5 : index
    %c0_67 = arith.constant 0 : index
    %c0_68 = arith.constant 0 : index
    %164 = vector.load %arg0[%c5, %c0_67, %c0_68] : memref<8x4x32xf32, #tpu.memory_space<vmem>>, vector<1x4x32xf32>
    %165 = vector.shape_cast %164 : vector<1x4x32xf32> to vector<4x32xf32>
    %cst_69 = arith.constant dense<0.000000e+00> : vector<4xf32>
    %166 = vector.multi_reduction <add>, %165, %cst_69 [1] : vector<4x32xf32> to vector<4xf32>
    %167 = vector.shape_cast %166 : vector<4xf32> to vector<4x1xf32>
    %cst_70 = arith.constant 3.200000e+01 : f32
    %168 = vector.broadcast %cst_70 : f32 to vector<4x1xf32>
    %169 = arith.divf %167, %168 : vector<4x1xf32>
    %170 = vector.broadcast %169 : vector<4x1xf32> to vector<4x32xf32>
    %171 = arith.subf %165, %170 : vector<4x32xf32>
    %172 = arith.mulf %171, %171 : vector<4x32xf32>
    %cst_71 = arith.constant dense<0.000000e+00> : vector<4xf32>
    %173 = vector.multi_reduction <add>, %172, %cst_71 [1] : vector<4x32xf32> to vector<4xf32>
    %174 = vector.shape_cast %173 : vector<4xf32> to vector<4x1xf32>
    %cst_72 = arith.constant 3.200000e+01 : f32
    %175 = vector.broadcast %cst_72 : f32 to vector<4x1xf32>
    %176 = arith.divf %174, %175 : vector<4x1xf32>
    %177 = vector.broadcast %169 : vector<4x1xf32> to vector<4x32xf32>
    %178 = arith.subf %165, %177 : vector<4x32xf32>
    %cst_73 = arith.constant 9.99999974E-6 : f32
    %179 = vector.broadcast %cst_73 : f32 to vector<4x1xf32>
    %180 = arith.addf %176, %179 : vector<4x1xf32>
    %181 = math.rsqrt %180 : vector<4x1xf32>
    %182 = vector.broadcast %181 : vector<4x1xf32> to vector<4x32xf32>
    %183 = arith.mulf %178, %182 : vector<4x32xf32>
    %184 = vector.broadcast %0 : vector<1x32xf32> to vector<4x32xf32>
    %185 = arith.mulf %183, %184 : vector<4x32xf32>
    %186 = vector.broadcast %1 : vector<1x32xf32> to vector<4x32xf32>
    %187 = arith.addf %185, %186 : vector<4x32xf32>
    %cst_74 = arith.constant dense<0.000000e+00> : vector<4x16xf32>
    %188 = tpu.matmul %187, %2, %cst_74 {dimension_numbers = #tpu.dot_dimension_numbers<[1], [0], [0], [1], [0, 0, 1, 1], [], []>} : vector<4x32xf32>, vector<32x16xf32>, vector<4x16xf32> -> vector<4x16xf32>
    %189 = vector.broadcast %3 : vector<1x16xf32> to vector<4x16xf32>
    %190 = arith.addf %188, %189 : vector<4x16xf32>
    %cst_75 = arith.constant 0.000000e+00 : f32
    %191 = vector.broadcast %cst_75 : f32 to vector<4x16xf32>
    %192 = arith.maximumf %190, %191 : vector<4x16xf32>
    %c5_76 = arith.constant 5 : index
    %c0_77 = arith.constant 0 : index
    %c0_78 = arith.constant 0 : index
    %193 = vector.load %arg14[%c5_76, %c0_77, %c0_78] : memref<8x4x16xf32, #tpu.memory_space<vmem>>, vector<1x4x16xf32>
    %194 = vector.shape_cast %193 : vector<1x4x16xf32> to vector<4x16xf32>
    %195 = vector.shape_cast %192 : vector<4x16xf32> to vector<1x4x16xf32>
    tpu.vector_store %arg14[%c5_76, %c0_77, %c0_78], %195 {strides = array<i32>} : memref<8x4x16xf32, #tpu.memory_space<vmem>>, vector<1x4x16xf32>,
    %c6 = arith.constant 6 : index
    %c0_79 = arith.constant 0 : index
    %c0_80 = arith.constant 0 : index
    %196 = vector.load %arg0[%c6, %c0_79, %c0_80] : memref<8x4x32xf32, #tpu.memory_space<vmem>>, vector<1x4x32xf32>
    %197 = vector.shape_cast %196 : vector<1x4x32xf32> to vector<4x32xf32>
    %cst_81 = arith.constant dense<0.000000e+00> : vector<4xf32>
    %198 = vector.multi_reduction <add>, %197, %cst_81 [1] : vector<4x32xf32> to vector<4xf32>
    %199 = vector.shape_cast %198 : vector<4xf32> to vector<4x1xf32>
    %cst_82 = arith.constant 3.200000e+01 : f32
    %200 = vector.broadcast %cst_82 : f32 to vector<4x1xf32>
    %201 = arith.divf %199, %200 : vector<4x1xf32>
    %202 = vector.broadcast %201 : vector<4x1xf32> to vector<4x32xf32>
    %203 = arith.subf %197, %202 : vector<4x32xf32>
    %204 = arith.mulf %203, %203 : vector<4x32xf32>
    %cst_83 = arith.constant dense<0.000000e+00> : vector<4xf32>
    %205 = vector.multi_reduction <add>, %204, %cst_83 [1] : vector<4x32xf32> to vector<4xf32>
    %206 = vector.shape_cast %205 : vector<4xf32> to vector<4x1xf32>
    %cst_84 = arith.constant 3.200000e+01 : f32
    %207 = vector.broadcast %cst_84 : f32 to vector<4x1xf32>
    %208 = arith.divf %206, %207 : vector<4x1xf32>
    %209 = vector.broadcast %201 : vector<4x1xf32> to vector<4x32xf32>
    %210 = arith.subf %197, %209 : vector<4x32xf32>
    %cst_85 = arith.constant 9.99999974E-6 : f32
    %211 = vector.broadcast %cst_85 : f32 to vector<4x1xf32>
    %212 = arith.addf %208, %211 : vector<4x1xf32>
    %213 = math.rsqrt %212 : vector<4x1xf32>
    %214 = vector.broadcast %213 : vector<4x1xf32> to vector<4x32xf32>
    %215 = arith.mulf %210, %214 : vector<4x32xf32>
    %216 = vector.broadcast %0 : vector<1x32xf32> to vector<4x32xf32>
    %217 = arith.mulf %215, %216 : vector<4x32xf32>
    %218 = vector.broadcast %1 : vector<1x32xf32> to vector<4x32xf32>
    %219 = arith.addf %217, %218 : vector<4x32xf32>
    %cst_86 = arith.constant dense<0.000000e+00> : vector<4x16xf32>
    %220 = tpu.matmul %219, %2, %cst_86 {dimension_numbers = #tpu.dot_dimension_numbers<[1], [0], [0], [1], [0, 0, 1, 1], [], []>} : vector<4x32xf32>, vector<32x16xf32>, vector<4x16xf32> -> vector<4x16xf32>
    %221 = vector.broadcast %3 : vector<1x16xf32> to vector<4x16xf32>
    %222 = arith.addf %220, %221 : vector<4x16xf32>
    %cst_87 = arith.constant 0.000000e+00 : f32
    %223 = vector.broadcast %cst_87 : f32 to vector<4x16xf32>
    %224 = arith.maximumf %222, %223 : vector<4x16xf32>
    %c6_88 = arith.constant 6 : index
    %c0_89 = arith.constant 0 : index
    %c0_90 = arith.constant 0 : index
    %225 = vector.load %arg14[%c6_88, %c0_89, %c0_90] : memref<8x4x16xf32, #tpu.memory_space<vmem>>, vector<1x4x16xf32>
    %226 = vector.shape_cast %225 : vector<1x4x16xf32> to vector<4x16xf32>
    %227 = vector.shape_cast %224 : vector<4x16xf32> to vector<1x4x16xf32>
    tpu.vector_store %arg14[%c6_88, %c0_89, %c0_90], %227 {strides = array<i32>} : memref<8x4x16xf32, #tpu.memory_space<vmem>>, vector<1x4x16xf32>,
    %c7 = arith.constant 7 : index
    %c0_91 = arith.constant 0 : index
    %c0_92 = arith.constant 0 : index
    %228 = vector.load %arg0[%c7, %c0_91, %c0_92] : memref<8x4x32xf32, #tpu.memory_space<vmem>>, vector<1x4x32xf32>
    %229 = vector.shape_cast %228 : vector<1x4x32xf32> to vector<4x32xf32>
    %cst_93 = arith.constant dense<0.000000e+00> : vector<4xf32>
    %230 = vector.multi_reduction <add>, %229, %cst_93 [1] : vector<4x32xf32> to vector<4xf32>
    %231 = vector.shape_cast %230 : vector<4xf32> to vector<4x1xf32>
    %cst_94 = arith.constant 3.200000e+01 : f32
    %232 = vector.broadcast %cst_94 : f32 to vector<4x1xf32>
    %233 = arith.divf %231, %232 : vector<4x1xf32>
    %234 = vector.broadcast %233 : vector<4x1xf32> to vector<4x32xf32>
    %235 = arith.subf %229, %234 : vector<4x32xf32>
    %236 = arith.mulf %235, %235 : vector<4x32xf32>
    %cst_95 = arith.constant dense<0.000000e+00> : vector<4xf32>
    %237 = vector.multi_reduction <add>, %236, %cst_95 [1] : vector<4x32xf32> to vector<4xf32>
    %238 = vector.shape_cast %237 : vector<4xf32> to vector<4x1xf32>
    %cst_96 = arith.constant 3.200000e+01 : f32
    %239 = vector.broadcast %cst_96 : f32 to vector<4x1xf32>
    %240 = arith.divf %238, %239 : vector<4x1xf32>
    %241 = vector.broadcast %233 : vector<4x1xf32> to vector<4x32xf32>
    %242 = arith.subf %229, %241 : vector<4x32xf32>
    %cst_97 = arith.constant 9.99999974E-6 : f32
    %243 = vector.broadcast %cst_97 : f32 to vector<4x1xf32>
    %244 = arith.addf %240, %243 : vector<4x1xf32>
    %245 = math.rsqrt %244 : vector<4x1xf32>
    %246 = vector.broadcast %245 : vector<4x1xf32> to vector<4x32xf32>
    %247 = arith.mulf %242, %246 : vector<4x32xf32>
    %248 = vector.broadcast %0 : vector<1x32xf32> to vector<4x32xf32>
    %249 = arith.mulf %247, %248 : vector<4x32xf32>
    %250 = vector.broadcast %1 : vector<1x32xf32> to vector<4x32xf32>
    %251 = arith.addf %249, %250 : vector<4x32xf32>
    %cst_98 = arith.constant dense<0.000000e+00> : vector<4x16xf32>
    %252 = tpu.matmul %251, %2, %cst_98 {dimension_numbers = #tpu.dot_dimension_numbers<[1], [0], [0], [1], [0, 0, 1, 1], [], []>} : vector<4x32xf32>, vector<32x16xf32>, vector<4x16xf32> -> vector<4x16xf32>
    %253 = vector.broadcast %3 : vector<1x16xf32> to vector<4x16xf32>
    %254 = arith.addf %252, %253 : vector<4x16xf32>
    %cst_99 = arith.constant 0.000000e+00 : f32
    %255 = vector.broadcast %cst_99 : f32 to vector<4x16xf32>
    %256 = arith.maximumf %254, %255 : vector<4x16xf32>
    %c7_100 = arith.constant 7 : index
    %c0_101 = arith.constant 0 : index
    %c0_102 = arith.constant 0 : index
    %257 = vector.load %arg14[%c7_100, %c0_101, %c0_102] : memref<8x4x16xf32, #tpu.memory_space<vmem>>, vector<1x4x16xf32>
    %258 = vector.shape_cast %257 : vector<1x4x16xf32> to vector<4x16xf32>
    %259 = vector.shape_cast %256 : vector<4x16xf32> to vector<1x4x16xf32>
    tpu.vector_store %arg14[%c7_100, %c0_101, %c0_102], %259 {strides = array<i32>} : memref<8x4x16xf32, #tpu.memory_space<vmem>>, vector<1x4x16xf32>,
    %c0_103 = arith.constant 0 : index
    %c0_104 = arith.constant 0 : index
    %260 = vector.load %arg7[%c0_103, %c0_104] : memref<32x32xf32, #tpu.memory_space<vmem>>, vector<32x32xf32>
    %c0_105 = arith.constant 0 : index
    %c0_106 = arith.constant 0 : index
    %261 = vector.load %arg8[%c0_105, %c0_106] : memref<32x32xf32, #tpu.memory_space<vmem>>, vector<32x32xf32>
    %c0_107 = arith.constant 0 : index
    %c0_108 = arith.constant 0 : index
    %262 = vector.load %arg9[%c0_107, %c0_108] : memref<1x32xf32, #tpu.memory_space<vmem>>, vector<1x32xf32>
    %c0_109 = arith.constant 0 : index
    %c0_110 = arith.constant 0 : index
    %263 = vector.load %arg1[%c0_109, %c0_110] : memref<4x1xi32, #tpu.memory_space<vmem>>, vector<4x1xi32>
    %264 = tpu.iota {dimensions = array<i32: 1>} : vector<4x32xi32>
    %c16_i32 = arith.constant 16 : i32
    %265 = vector.broadcast %c16_i32 : i32 to vector<4x32xi32>
    %266 = arith.cmpi slt, %264, %265 : vector<4x32xi32>
    %c0_111 = arith.constant 0 : index
    %c0_112 = arith.constant 0 : index
    %267 = vector.load %arg2[%c0_111, %c0_112] : memref<4x32xf32, #tpu.memory_space<vmem>>, vector<4x32xf32>
    %c0_113 = arith.constant 0 : index
    %c0_114 = arith.constant 0 : index
    %c0_115 = arith.constant 0 : index
    %268 = vector.load %arg14[%c0_113, %c0_114, %c0_115] : memref<8x4x16xf32, #tpu.memory_space<vmem>>, vector<1x4x16xf32>
    %269 = vector.shape_cast %268 : vector<1x4x16xf32> to vector<4x16xf32>
    %c7_116 = arith.constant 7 : index
    %c0_117 = arith.constant 0 : index
    %c0_118 = arith.constant 0 : index
    %270 = vector.load %arg14[%c7_116, %c0_117, %c0_118] : memref<8x4x16xf32, #tpu.memory_space<vmem>>, vector<1x4x16xf32>
    %271 = vector.shape_cast %270 : vector<1x4x16xf32> to vector<4x16xf32>
    %272 = tpu.concatenate %269, %271 in 1 : vector<4x16xf32>, vector<4x16xf32> -> vector<4x32xf32>
    %cst_119 = arith.constant dense<0.000000e+00> : vector<4x32xf32>
    %273 = tpu.matmul %272, %260, %cst_119 {dimension_numbers = #tpu.dot_dimension_numbers<[1], [0], [0], [1], [0, 0, 1, 1], [], []>} : vector<4x32xf32>, vector<32x32xf32>, vector<4x32xf32> -> vector<4x32xf32>
    %cst_120 = arith.constant dense<0.000000e+00> : vector<4x32xf32>
    %274 = tpu.matmul %267, %261, %cst_120 {dimension_numbers = #tpu.dot_dimension_numbers<[1], [0], [0], [1], [0, 0, 1, 1], [], []>} : vector<4x32xf32>, vector<32x32xf32>, vector<4x32xf32> -> vector<4x32xf32>
    %275 = arith.addf %273, %274 : vector<4x32xf32>
    %276 = vector.broadcast %262 : vector<1x32xf32> to vector<4x32xf32>
    %277 = arith.addf %275, %276 : vector<4x32xf32>
    %cst_121 = arith.constant 0.000000e+00 : f32
    %278 = vector.broadcast %cst_121 : f32 to vector<4x32xf32>
    %279 = arith.maximumf %277, %278 : vector<4x32xf32>
    %c0_i32 = arith.constant 0 : i32
    %280 = vector.broadcast %c0_i32 : i32 to vector<4x1xi32>
    %281 = arith.cmpi sgt, %263, %280 : vector<4x1xi32>
    %282 = arith.extui %281 : vector<4x1xi1> to vector<4x1xi32>
    %283 = arith.sitofp %282 : vector<4x1xi32> to vector<4x1xf32>
    %c7_i32 = arith.constant 7 : i32
    %284 = vector.broadcast %c7_i32 : i32 to vector<4x1xi32>
    %285 = arith.cmpi sgt, %263, %284 : vector<4x1xi32>
    %286 = arith.extui %285 : vector<4x1xi1> to vector<4x1xi32>
    %287 = arith.sitofp %286 : vector<4x1xi32> to vector<4x1xf32>
    %288 = vector.shape_cast %283 : vector<4x1xf32> to vector<4x1xf32>
    %289 = vector.broadcast %288 : vector<4x1xf32> to vector<4x32xf32>
    %290 = vector.shape_cast %287 : vector<4x1xf32> to vector<4x1xf32>
    %291 = vector.broadcast %290 : vector<4x1xf32> to vector<4x32xf32>
    %292 = arith.select %266, %289, %291 : vector<4x32xi1>, vector<4x32xf32>
    %293 = arith.mulf %292, %279 : vector<4x32xf32>
    %cst_122 = arith.constant 1.000000e+00 : f32
    %294 = vector.broadcast %cst_122 : f32 to vector<4x32xf32>
    %295 = arith.subf %294, %292 : vector<4x32xf32>
    %296 = arith.mulf %295, %267 : vector<4x32xf32>
    %297 = arith.addf %293, %296 : vector<4x32xf32>
    %298 = vector.extract_strided_slice %297 {offsets = [0, 0], sizes = [4, 16], strides = [1, 1]} : vector<4x32xf32> to vector<4x16xf32>
    %299 = vector.broadcast %283 : vector<4x1xf32> to vector<4x16xf32>
    %300 = arith.mulf %299, %298 : vector<4x16xf32>
    %c0_123 = arith.constant 0 : index
    %c0_124 = arith.constant 0 : index
    %c0_125 = arith.constant 0 : index
    %301 = vector.load %arg15[%c0_123, %c0_124, %c0_125] : memref<8x4x16xf32, #tpu.memory_space<vmem>>, vector<1x4x16xf32>
    %302 = vector.shape_cast %301 : vector<1x4x16xf32> to vector<4x16xf32>
    %303 = vector.shape_cast %300 : vector<4x16xf32> to vector<1x4x16xf32>
    tpu.vector_store %arg15[%c0_123, %c0_124, %c0_125], %303 {strides = array<i32>} : memref<8x4x16xf32, #tpu.memory_space<vmem>>, vector<1x4x16xf32>,
    %304 = vector.extract_strided_slice %297 {offsets = [0, 16], sizes = [4, 16], strides = [1, 1]} : vector<4x32xf32> to vector<4x16xf32>
    %305 = vector.broadcast %287 : vector<4x1xf32> to vector<4x16xf32>
    %306 = arith.mulf %305, %304 : vector<4x16xf32>
    %c7_126 = arith.constant 7 : index
    %c0_127 = arith.constant 0 : index
    %c0_128 = arith.constant 0 : index
    %307 = vector.load %arg16[%c7_126, %c0_127, %c0_128] : memref<8x4x16xf32, #tpu.memory_space<vmem>>, vector<1x4x16xf32>
    %308 = vector.shape_cast %307 : vector<1x4x16xf32> to vector<4x16xf32>
    %309 = vector.shape_cast %306 : vector<4x16xf32> to vector<1x4x16xf32>
    tpu.vector_store %arg16[%c7_126, %c0_127, %c0_128], %309 {strides = array<i32>} : memref<8x4x16xf32, #tpu.memory_space<vmem>>, vector<1x4x16xf32>,
    %c1_129 = arith.constant 1 : index
    %c0_130 = arith.constant 0 : index
    %c0_131 = arith.constant 0 : index
    %310 = vector.load %arg14[%c1_129, %c0_130, %c0_131] : memref<8x4x16xf32, #tpu.memory_space<vmem>>, vector<1x4x16xf32>
    %311 = vector.shape_cast %310 : vector<1x4x16xf32> to vector<4x16xf32>
    %c6_132 = arith.constant 6 : index
    %c0_133 = arith.constant 0 : index
    %c0_134 = arith.constant 0 : index
    %312 = vector.load %arg14[%c6_132, %c0_133, %c0_134] : memref<8x4x16xf32, #tpu.memory_space<vmem>>, vector<1x4x16xf32>
    %313 = vector.shape_cast %312 : vector<1x4x16xf32> to vector<4x16xf32>
    %314 = tpu.concatenate %311, %313 in 1 : vector<4x16xf32>, vector<4x16xf32> -> vector<4x32xf32>
    %cst_135 = arith.constant dense<0.000000e+00> : vector<4x32xf32>
    %315 = tpu.matmul %314, %260, %cst_135 {dimension_numbers = #tpu.dot_dimension_numbers<[1], [0], [0], [1], [0, 0, 1, 1], [], []>} : vector<4x32xf32>, vector<32x32xf32>, vector<4x32xf32> -> vector<4x32xf32>
    %cst_136 = arith.constant dense<0.000000e+00> : vector<4x32xf32>
    %316 = tpu.matmul %297, %261, %cst_136 {dimension_numbers = #tpu.dot_dimension_numbers<[1], [0], [0], [1], [0, 0, 1, 1], [], []>} : vector<4x32xf32>, vector<32x32xf32>, vector<4x32xf32> -> vector<4x32xf32>
    %317 = arith.addf %315, %316 : vector<4x32xf32>
    %318 = vector.broadcast %262 : vector<1x32xf32> to vector<4x32xf32>
    %319 = arith.addf %317, %318 : vector<4x32xf32>
    %cst_137 = arith.constant 0.000000e+00 : f32
    %320 = vector.broadcast %cst_137 : f32 to vector<4x32xf32>
    %321 = arith.maximumf %319, %320 : vector<4x32xf32>
    %c1_i32 = arith.constant 1 : i32
    %322 = vector.broadcast %c1_i32 : i32 to vector<4x1xi32>
    %323 = arith.cmpi sgt, %263, %322 : vector<4x1xi32>
    %324 = arith.extui %323 : vector<4x1xi1> to vector<4x1xi32>
    %325 = arith.sitofp %324 : vector<4x1xi32> to vector<4x1xf32>
    %c6_i32 = arith.constant 6 : i32
    %326 = vector.broadcast %c6_i32 : i32 to vector<4x1xi32>
    %327 = arith.cmpi sgt, %263, %326 : vector<4x1xi32>
    %328 = arith.extui %327 : vector<4x1xi1> to vector<4x1xi32>
    %329 = arith.sitofp %328 : vector<4x1xi32> to vector<4x1xf32>
    %330 = vector.shape_cast %325 : vector<4x1xf32> to vector<4x1xf32>
    %331 = vector.broadcast %330 : vector<4x1xf32> to vector<4x32xf32>
    %332 = vector.shape_cast %329 : vector<4x1xf32> to vector<4x1xf32>
    %333 = vector.broadcast %332 : vector<4x1xf32> to vector<4x32xf32>
    %334 = arith.select %266, %331, %333 : vector<4x32xi1>, vector<4x32xf32>
    %335 = arith.mulf %334, %321 : vector<4x32xf32>
    %cst_138 = arith.constant 1.000000e+00 : f32
    %336 = vector.broadcast %cst_138 : f32 to vector<4x32xf32>
    %337 = arith.subf %336, %334 : vector<4x32xf32>
    %338 = arith.mulf %337, %297 : vector<4x32xf32>
    %339 = arith.addf %335, %338 : vector<4x32xf32>
    %340 = vector.extract_strided_slice %339 {offsets = [0, 0], sizes = [4, 16], strides = [1, 1]} : vector<4x32xf32> to vector<4x16xf32>
    %341 = vector.broadcast %325 : vector<4x1xf32> to vector<4x16xf32>
    %342 = arith.mulf %341, %340 : vector<4x16xf32>
    %c1_139 = arith.constant 1 : index
    %c0_140 = arith.constant 0 : index
    %c0_141 = arith.constant 0 : index
    %343 = vector.load %arg15[%c1_139, %c0_140, %c0_141] : memref<8x4x16xf32, #tpu.memory_space<vmem>>, vector<1x4x16xf32>
    %344 = vector.shape_cast %343 : vector<1x4x16xf32> to vector<4x16xf32>
    %345 = vector.shape_cast %342 : vector<4x16xf32> to vector<1x4x16xf32>
    tpu.vector_store %arg15[%c1_139, %c0_140, %c0_141], %345 {strides = array<i32>} : memref<8x4x16xf32, #tpu.memory_space<vmem>>, vector<1x4x16xf32>,
    %346 = vector.extract_strided_slice %339 {offsets = [0, 16], sizes = [4, 16], strides = [1, 1]} : vector<4x32xf32> to vector<4x16xf32>
    %347 = vector.broadcast %329 : vector<4x1xf32> to vector<4x16xf32>
    %348 = arith.mulf %347, %346 : vector<4x16xf32>
    %c6_142 = arith.constant 6 : index
    %c0_143 = arith.constant 0 : index
    %c0_144 = arith.constant 0 : index
    %349 = vector.load %arg16[%c6_142, %c0_143, %c0_144] : memref<8x4x16xf32, #tpu.memory_space<vmem>>, vector<1x4x16xf32>
    %350 = vector.shape_cast %349 : vector<1x4x16xf32> to vector<4x16xf32>
    %351 = vector.shape_cast %348 : vector<4x16xf32> to vector<1x4x16xf32>
    tpu.vector_store %arg16[%c6_142, %c0_143, %c0_144], %351 {strides = array<i32>} : memref<8x4x16xf32, #tpu.memory_space<vmem>>, vector<1x4x16xf32>,
    %c2_145 = arith.constant 2 : index
    %c0_146 = arith.constant 0 : index
    %c0_147 = arith.constant 0 : index
    %352 = vector.load %arg14[%c2_145, %c0_146, %c0_147] : memref<8x4x16xf32, #tpu.memory_space<vmem>>, vector<1x4x16xf32>
    %353 = vector.shape_cast %352 : vector<1x4x16xf32> to vector<4x16xf32>
    %c5_148 = arith.constant 5 : index
    %c0_149 = arith.constant 0 : index
    %c0_150 = arith.constant 0 : index
    %354 = vector.load %arg14[%c5_148, %c0_149, %c0_150] : memref<8x4x16xf32, #tpu.memory_space<vmem>>, vector<1x4x16xf32>
    %355 = vector.shape_cast %354 : vector<1x4x16xf32> to vector<4x16xf32>
    %356 = tpu.concatenate %353, %355 in 1 : vector<4x16xf32>, vector<4x16xf32> -> vector<4x32xf32>
    %cst_151 = arith.constant dense<0.000000e+00> : vector<4x32xf32>
    %357 = tpu.matmul %356, %260, %cst_151 {dimension_numbers = #tpu.dot_dimension_numbers<[1], [0], [0], [1], [0, 0, 1, 1], [], []>} : vector<4x32xf32>, vector<32x32xf32>, vector<4x32xf32> -> vector<4x32xf32>
    %cst_152 = arith.constant dense<0.000000e+00> : vector<4x32xf32>
    %358 = tpu.matmul %339, %261, %cst_152 {dimension_numbers = #tpu.dot_dimension_numbers<[1], [0], [0], [1], [0, 0, 1, 1], [], []>} : vector<4x32xf32>, vector<32x32xf32>, vector<4x32xf32> -> vector<4x32xf32>
    %359 = arith.addf %357, %358 : vector<4x32xf32>
    %360 = vector.broadcast %262 : vector<1x32xf32> to vector<4x32xf32>
    %361 = arith.addf %359, %360 : vector<4x32xf32>
    %cst_153 = arith.constant 0.000000e+00 : f32
    %362 = vector.broadcast %cst_153 : f32 to vector<4x32xf32>
    %363 = arith.maximumf %361, %362 : vector<4x32xf32>
    %c2_i32 = arith.constant 2 : i32
    %364 = vector.broadcast %c2_i32 : i32 to vector<4x1xi32>
    %365 = arith.cmpi sgt, %263, %364 : vector<4x1xi32>
    %366 = arith.extui %365 : vector<4x1xi1> to vector<4x1xi32>
    %367 = arith.sitofp %366 : vector<4x1xi32> to vector<4x1xf32>
    %c5_i32 = arith.constant 5 : i32
    %368 = vector.broadcast %c5_i32 : i32 to vector<4x1xi32>
    %369 = arith.cmpi sgt, %263, %368 : vector<4x1xi32>
    %370 = arith.extui %369 : vector<4x1xi1> to vector<4x1xi32>
    %371 = arith.sitofp %370 : vector<4x1xi32> to vector<4x1xf32>
    %372 = vector.shape_cast %367 : vector<4x1xf32> to vector<4x1xf32>
    %373 = vector.broadcast %372 : vector<4x1xf32> to vector<4x32xf32>
    %374 = vector.shape_cast %371 : vector<4x1xf32> to vector<4x1xf32>
    %375 = vector.broadcast %374 : vector<4x1xf32> to vector<4x32xf32>
    %376 = arith.select %266, %373, %375 : vector<4x32xi1>, vector<4x32xf32>
    %377 = arith.mulf %376, %363 : vector<4x32xf32>
    %cst_154 = arith.constant 1.000000e+00 : f32
    %378 = vector.broadcast %cst_154 : f32 to vector<4x32xf32>
    %379 = arith.subf %378, %376 : vector<4x32xf32>
    %380 = arith.mulf %379, %339 : vector<4x32xf32>
    %381 = arith.addf %377, %380 : vector<4x32xf32>
    %382 = vector.extract_strided_slice %381 {offsets = [0, 0], sizes = [4, 16], strides = [1, 1]} : vector<4x32xf32> to vector<4x16xf32>
    %383 = vector.broadcast %367 : vector<4x1xf32> to vector<4x16xf32>
    %384 = arith.mulf %383, %382 : vector<4x16xf32>
    %c2_155 = arith.constant 2 : index
    %c0_156 = arith.constant 0 : index
    %c0_157 = arith.constant 0 : index
    %385 = vector.load %arg15[%c2_155, %c0_156, %c0_157] : memref<8x4x16xf32, #tpu.memory_space<vmem>>, vector<1x4x16xf32>
    %386 = vector.shape_cast %385 : vector<1x4x16xf32> to vector<4x16xf32>
    %387 = vector.shape_cast %384 : vector<4x16xf32> to vector<1x4x16xf32>
    tpu.vector_store %arg15[%c2_155, %c0_156, %c0_157], %387 {strides = array<i32>} : memref<8x4x16xf32, #tpu.memory_space<vmem>>, vector<1x4x16xf32>,
    %388 = vector.extract_strided_slice %381 {offsets = [0, 16], sizes = [4, 16], strides = [1, 1]} : vector<4x32xf32> to vector<4x16xf32>
    %389 = vector.broadcast %371 : vector<4x1xf32> to vector<4x16xf32>
    %390 = arith.mulf %389, %388 : vector<4x16xf32>
    %c5_158 = arith.constant 5 : index
    %c0_159 = arith.constant 0 : index
    %c0_160 = arith.constant 0 : index
    %391 = vector.load %arg16[%c5_158, %c0_159, %c0_160] : memref<8x4x16xf32, #tpu.memory_space<vmem>>, vector<1x4x16xf32>
    %392 = vector.shape_cast %391 : vector<1x4x16xf32> to vector<4x16xf32>
    %393 = vector.shape_cast %390 : vector<4x16xf32> to vector<1x4x16xf32>
    tpu.vector_store %arg16[%c5_158, %c0_159, %c0_160], %393 {strides = array<i32>} : memref<8x4x16xf32, #tpu.memory_space<vmem>>, vector<1x4x16xf32>,
    %c3_161 = arith.constant 3 : index
    %c0_162 = arith.constant 0 : index
    %c0_163 = arith.constant 0 : index
    %394 = vector.load %arg14[%c3_161, %c0_162, %c0_163] : memref<8x4x16xf32, #tpu.memory_space<vmem>>, vector<1x4x16xf32>
    %395 = vector.shape_cast %394 : vector<1x4x16xf32> to vector<4x16xf32>
    %c4_164 = arith.constant 4 : index
    %c0_165 = arith.constant 0 : index
    %c0_166 = arith.constant 0 : index
    %396 = vector.load %arg14[%c4_164, %c0_165, %c0_166] : memref<8x4x16xf32, #tpu.memory_space<vmem>>, vector<1x4x16xf32>
    %397 = vector.shape_cast %396 : vector<1x4x16xf32> to vector<4x16xf32>
    %398 = tpu.concatenate %395, %397 in 1 : vector<4x16xf32>, vector<4x16xf32> -> vector<4x32xf32>
    %cst_167 = arith.constant dense<0.000000e+00> : vector<4x32xf32>
    %399 = tpu.matmul %398, %260, %cst_167 {dimension_numbers = #tpu.dot_dimension_numbers<[1], [0], [0], [1], [0, 0, 1, 1], [], []>} : vector<4x32xf32>, vector<32x32xf32>, vector<4x32xf32> -> vector<4x32xf32>
    %cst_168 = arith.constant dense<0.000000e+00> : vector<4x32xf32>
    %400 = tpu.matmul %381, %261, %cst_168 {dimension_numbers = #tpu.dot_dimension_numbers<[1], [0], [0], [1], [0, 0, 1, 1], [], []>} : vector<4x32xf32>, vector<32x32xf32>, vector<4x32xf32> -> vector<4x32xf32>
    %401 = arith.addf %399, %400 : vector<4x32xf32>
    %402 = vector.broadcast %262 : vector<1x32xf32> to vector<4x32xf32>
    %403 = arith.addf %401, %402 : vector<4x32xf32>
    %cst_169 = arith.constant 0.000000e+00 : f32
    %404 = vector.broadcast %cst_169 : f32 to vector<4x32xf32>
    %405 = arith.maximumf %403, %404 : vector<4x32xf32>
    %c3_i32 = arith.constant 3 : i32
    %406 = vector.broadcast %c3_i32 : i32 to vector<4x1xi32>
    %407 = arith.cmpi sgt, %263, %406 : vector<4x1xi32>
    %408 = arith.extui %407 : vector<4x1xi1> to vector<4x1xi32>
    %409 = arith.sitofp %408 : vector<4x1xi32> to vector<4x1xf32>
    %c4_i32 = arith.constant 4 : i32
    %410 = vector.broadcast %c4_i32 : i32 to vector<4x1xi32>
    %411 = arith.cmpi sgt, %263, %410 : vector<4x1xi32>
    %412 = arith.extui %411 : vector<4x1xi1> to vector<4x1xi32>
    %413 = arith.sitofp %412 : vector<4x1xi32> to vector<4x1xf32>
    %414 = vector.shape_cast %409 : vector<4x1xf32> to vector<4x1xf32>
    %415 = vector.broadcast %414 : vector<4x1xf32> to vector<4x32xf32>
    %416 = vector.shape_cast %413 : vector<4x1xf32> to vector<4x1xf32>
    %417 = vector.broadcast %416 : vector<4x1xf32> to vector<4x32xf32>
    %418 = arith.select %266, %415, %417 : vector<4x32xi1>, vector<4x32xf32>
    %419 = arith.mulf %418, %405 : vector<4x32xf32>
    %cst_170 = arith.constant 1.000000e+00 : f32
    %420 = vector.broadcast %cst_170 : f32 to vector<4x32xf32>
    %421 = arith.subf %420, %418 : vector<4x32xf32>
    %422 = arith.mulf %421, %381 : vector<4x32xf32>
    %423 = arith.addf %419, %422 : vector<4x32xf32>
    %424 = vector.extract_strided_slice %423 {offsets = [0, 0], sizes = [4, 16], strides = [1, 1]} : vector<4x32xf32> to vector<4x16xf32>
    %425 = vector.broadcast %409 : vector<4x1xf32> to vector<4x16xf32>
    %426 = arith.mulf %425, %424 : vector<4x16xf32>
    %c3_171 = arith.constant 3 : index
    %c0_172 = arith.constant 0 : index
    %c0_173 = arith.constant 0 : index
    %427 = vector.load %arg15[%c3_171, %c0_172, %c0_173] : memref<8x4x16xf32, #tpu.memory_space<vmem>>, vector<1x4x16xf32>
    %428 = vector.shape_cast %427 : vector<1x4x16xf32> to vector<4x16xf32>
    %429 = vector.shape_cast %426 : vector<4x16xf32> to vector<1x4x16xf32>
    tpu.vector_store %arg15[%c3_171, %c0_172, %c0_173], %429 {strides = array<i32>} : memref<8x4x16xf32, #tpu.memory_space<vmem>>, vector<1x4x16xf32>,
    %430 = vector.extract_strided_slice %423 {offsets = [0, 16], sizes = [4, 16], strides = [1, 1]} : vector<4x32xf32> to vector<4x16xf32>
    %431 = vector.broadcast %413 : vector<4x1xf32> to vector<4x16xf32>
    %432 = arith.mulf %431, %430 : vector<4x16xf32>
    %c4_174 = arith.constant 4 : index
    %c0_175 = arith.constant 0 : index
    %c0_176 = arith.constant 0 : index
    %433 = vector.load %arg16[%c4_174, %c0_175, %c0_176] : memref<8x4x16xf32, #tpu.memory_space<vmem>>, vector<1x4x16xf32>
    %434 = vector.shape_cast %433 : vector<1x4x16xf32> to vector<4x16xf32>
    %435 = vector.shape_cast %432 : vector<4x16xf32> to vector<1x4x16xf32>
    tpu.vector_store %arg16[%c4_174, %c0_175, %c0_176], %435 {strides = array<i32>} : memref<8x4x16xf32, #tpu.memory_space<vmem>>, vector<1x4x16xf32>,
    %c4_177 = arith.constant 4 : index
    %c0_178 = arith.constant 0 : index
    %c0_179 = arith.constant 0 : index
    %436 = vector.load %arg14[%c4_177, %c0_178, %c0_179] : memref<8x4x16xf32, #tpu.memory_space<vmem>>, vector<1x4x16xf32>
    %437 = vector.shape_cast %436 : vector<1x4x16xf32> to vector<4x16xf32>
    %c3_180 = arith.constant 3 : index
    %c0_181 = arith.constant 0 : index
    %c0_182 = arith.constant 0 : index
    %438 = vector.load %arg14[%c3_180, %c0_181, %c0_182] : memref<8x4x16xf32, #tpu.memory_space<vmem>>, vector<1x4x16xf32>
    %439 = vector.shape_cast %438 : vector<1x4x16xf32> to vector<4x16xf32>
    %440 = tpu.concatenate %437, %439 in 1 : vector<4x16xf32>, vector<4x16xf32> -> vector<4x32xf32>
    %cst_183 = arith.constant dense<0.000000e+00> : vector<4x32xf32>
    %441 = tpu.matmul %440, %260, %cst_183 {dimension_numbers = #tpu.dot_dimension_numbers<[1], [0], [0], [1], [0, 0, 1, 1], [], []>} : vector<4x32xf32>, vector<32x32xf32>, vector<4x32xf32> -> vector<4x32xf32>
    %cst_184 = arith.constant dense<0.000000e+00> : vector<4x32xf32>
    %442 = tpu.matmul %423, %261, %cst_184 {dimension_numbers = #tpu.dot_dimension_numbers<[1], [0], [0], [1], [0, 0, 1, 1], [], []>} : vector<4x32xf32>, vector<32x32xf32>, vector<4x32xf32> -> vector<4x32xf32>
    %443 = arith.addf %441, %442 : vector<4x32xf32>
    %444 = vector.broadcast %262 : vector<1x32xf32> to vector<4x32xf32>
    %445 = arith.addf %443, %444 : vector<4x32xf32>
    %cst_185 = arith.constant 0.000000e+00 : f32
    %446 = vector.broadcast %cst_185 : f32 to vector<4x32xf32>
    %447 = arith.maximumf %445, %446 : vector<4x32xf32>
    %c4_i32_186 = arith.constant 4 : i32
    %448 = vector.broadcast %c4_i32_186 : i32 to vector<4x1xi32>
    %449 = arith.cmpi sgt, %263, %448 : vector<4x1xi32>
    %450 = arith.extui %449 : vector<4x1xi1> to vector<4x1xi32>
    %451 = arith.sitofp %450 : vector<4x1xi32> to vector<4x1xf32>
    %c3_i32_187 = arith.constant 3 : i32
    %452 = vector.broadcast %c3_i32_187 : i32 to vector<4x1xi32>
    %453 = arith.cmpi sgt, %263, %452 : vector<4x1xi32>
    %454 = arith.extui %453 : vector<4x1xi1> to vector<4x1xi32>
    %455 = arith.sitofp %454 : vector<4x1xi32> to vector<4x1xf32>
    %456 = vector.shape_cast %451 : vector<4x1xf32> to vector<4x1xf32>
    %457 = vector.broadcast %456 : vector<4x1xf32> to vector<4x32xf32>
    %458 = vector.shape_cast %455 : vector<4x1xf32> to vector<4x1xf32>
    %459 = vector.broadcast %458 : vector<4x1xf32> to vector<4x32xf32>
    %460 = arith.select %266, %457, %459 : vector<4x32xi1>, vector<4x32xf32>
    %461 = arith.mulf %460, %447 : vector<4x32xf32>
    %cst_188 = arith.constant 1.000000e+00 : f32
    %462 = vector.broadcast %cst_188 : f32 to vector<4x32xf32>
    %463 = arith.subf %462, %460 : vector<4x32xf32>
    %464 = arith.mulf %463, %423 : vector<4x32xf32>
    %465 = arith.addf %461, %464 : vector<4x32xf32>
    %466 = vector.extract_strided_slice %465 {offsets = [0, 0], sizes = [4, 16], strides = [1, 1]} : vector<4x32xf32> to vector<4x16xf32>
    %467 = vector.broadcast %451 : vector<4x1xf32> to vector<4x16xf32>
    %468 = arith.mulf %467, %466 : vector<4x16xf32>
    %c4_189 = arith.constant 4 : index
    %c0_190 = arith.constant 0 : index
    %c0_191 = arith.constant 0 : index
    %469 = vector.load %arg15[%c4_189, %c0_190, %c0_191] : memref<8x4x16xf32, #tpu.memory_space<vmem>>, vector<1x4x16xf32>
    %470 = vector.shape_cast %469 : vector<1x4x16xf32> to vector<4x16xf32>
    %471 = vector.shape_cast %468 : vector<4x16xf32> to vector<1x4x16xf32>
    tpu.vector_store %arg15[%c4_189, %c0_190, %c0_191], %471 {strides = array<i32>} : memref<8x4x16xf32, #tpu.memory_space<vmem>>, vector<1x4x16xf32>,
    %472 = vector.extract_strided_slice %465 {offsets = [0, 16], sizes = [4, 16], strides = [1, 1]} : vector<4x32xf32> to vector<4x16xf32>
    %473 = vector.broadcast %455 : vector<4x1xf32> to vector<4x16xf32>
    %474 = arith.mulf %473, %472 : vector<4x16xf32>
    %c3_192 = arith.constant 3 : index
    %c0_193 = arith.constant 0 : index
    %c0_194 = arith.constant 0 : index
    %475 = vector.load %arg16[%c3_192, %c0_193, %c0_194] : memref<8x4x16xf32, #tpu.memory_space<vmem>>, vector<1x4x16xf32>
    %476 = vector.shape_cast %475 : vector<1x4x16xf32> to vector<4x16xf32>
    %477 = vector.shape_cast %474 : vector<4x16xf32> to vector<1x4x16xf32>
    tpu.vector_store %arg16[%c3_192, %c0_193, %c0_194], %477 {strides = array<i32>} : memref<8x4x16xf32, #tpu.memory_space<vmem>>, vector<1x4x16xf32>,
    %c5_195 = arith.constant 5 : index
    %c0_196 = arith.constant 0 : index
    %c0_197 = arith.constant 0 : index
    %478 = vector.load %arg14[%c5_195, %c0_196, %c0_197] : memref<8x4x16xf32, #tpu.memory_space<vmem>>, vector<1x4x16xf32>
    %479 = vector.shape_cast %478 : vector<1x4x16xf32> to vector<4x16xf32>
    %c2_198 = arith.constant 2 : index
    %c0_199 = arith.constant 0 : index
    %c0_200 = arith.constant 0 : index
    %480 = vector.load %arg14[%c2_198, %c0_199, %c0_200] : memref<8x4x16xf32, #tpu.memory_space<vmem>>, vector<1x4x16xf32>
    %481 = vector.shape_cast %480 : vector<1x4x16xf32> to vector<4x16xf32>
    %482 = tpu.concatenate %479, %481 in 1 : vector<4x16xf32>, vector<4x16xf32> -> vector<4x32xf32>
    %cst_201 = arith.constant dense<0.000000e+00> : vector<4x32xf32>
    %483 = tpu.matmul %482, %260, %cst_201 {dimension_numbers = #tpu.dot_dimension_numbers<[1], [0], [0], [1], [0, 0, 1, 1], [], []>} : vector<4x32xf32>, vector<32x32xf32>, vector<4x32xf32> -> vector<4x32xf32>
    %cst_202 = arith.constant dense<0.000000e+00> : vector<4x32xf32>
    %484 = tpu.matmul %465, %261, %cst_202 {dimension_numbers = #tpu.dot_dimension_numbers<[1], [0], [0], [1], [0, 0, 1, 1], [], []>} : vector<4x32xf32>, vector<32x32xf32>, vector<4x32xf32> -> vector<4x32xf32>
    %485 = arith.addf %483, %484 : vector<4x32xf32>
    %486 = vector.broadcast %262 : vector<1x32xf32> to vector<4x32xf32>
    %487 = arith.addf %485, %486 : vector<4x32xf32>
    %cst_203 = arith.constant 0.000000e+00 : f32
    %488 = vector.broadcast %cst_203 : f32 to vector<4x32xf32>
    %489 = arith.maximumf %487, %488 : vector<4x32xf32>
    %c5_i32_204 = arith.constant 5 : i32
    %490 = vector.broadcast %c5_i32_204 : i32 to vector<4x1xi32>
    %491 = arith.cmpi sgt, %263, %490 : vector<4x1xi32>
    %492 = arith.extui %491 : vector<4x1xi1> to vector<4x1xi32>
    %493 = arith.sitofp %492 : vector<4x1xi32> to vector<4x1xf32>
    %c2_i32_205 = arith.constant 2 : i32
    %494 = vector.broadcast %c2_i32_205 : i32 to vector<4x1xi32>
    %495 = arith.cmpi sgt, %263, %494 : vector<4x1xi32>
    %496 = arith.extui %495 : vector<4x1xi1> to vector<4x1xi32>
    %497 = arith.sitofp %496 : vector<4x1xi32> to vector<4x1xf32>
    %498 = vector.shape_cast %493 : vector<4x1xf32> to vector<4x1xf32>
    %499 = vector.broadcast %498 : vector<4x1xf32> to vector<4x32xf32>
    %500 = vector.shape_cast %497 : vector<4x1xf32> to vector<4x1xf32>
    %501 = vector.broadcast %500 : vector<4x1xf32> to vector<4x32xf32>
    %502 = arith.select %266, %499, %501 : vector<4x32xi1>, vector<4x32xf32>
    %503 = arith.mulf %502, %489 : vector<4x32xf32>
    %cst_206 = arith.constant 1.000000e+00 : f32
    %504 = vector.broadcast %cst_206 : f32 to vector<4x32xf32>
    %505 = arith.subf %504, %502 : vector<4x32xf32>
    %506 = arith.mulf %505, %465 : vector<4x32xf32>
    %507 = arith.addf %503, %506 : vector<4x32xf32>
    %508 = vector.extract_strided_slice %507 {offsets = [0, 0], sizes = [4, 16], strides = [1, 1]} : vector<4x32xf32> to vector<4x16xf32>
    %509 = vector.broadcast %493 : vector<4x1xf32> to vector<4x16xf32>
    %510 = arith.mulf %509, %508 : vector<4x16xf32>
    %c5_207 = arith.constant 5 : index
    %c0_208 = arith.constant 0 : index
    %c0_209 = arith.constant 0 : index
    %511 = vector.load %arg15[%c5_207, %c0_208, %c0_209] : memref<8x4x16xf32, #tpu.memory_space<vmem>>, vector<1x4x16xf32>
    %512 = vector.shape_cast %511 : vector<1x4x16xf32> to vector<4x16xf32>
    %513 = vector.shape_cast %510 : vector<4x16xf32> to vector<1x4x16xf32>
    tpu.vector_store %arg15[%c5_207, %c0_208, %c0_209], %513 {strides = array<i32>} : memref<8x4x16xf32, #tpu.memory_space<vmem>>, vector<1x4x16xf32>,
    %514 = vector.extract_strided_slice %507 {offsets = [0, 16], sizes = [4, 16], strides = [1, 1]} : vector<4x32xf32> to vector<4x16xf32>
    %515 = vector.broadcast %497 : vector<4x1xf32> to vector<4x16xf32>
    %516 = arith.mulf %515, %514 : vector<4x16xf32>
    %c2_210 = arith.constant 2 : index
    %c0_211 = arith.constant 0 : index
    %c0_212 = arith.constant 0 : index
    %517 = vector.load %arg16[%c2_210, %c0_211, %c0_212] : memref<8x4x16xf32, #tpu.memory_space<vmem>>, vector<1x4x16xf32>
    %518 = vector.shape_cast %517 : vector<1x4x16xf32> to vector<4x16xf32>
    %519 = vector.shape_cast %516 : vector<4x16xf32> to vector<1x4x16xf32>
    tpu.vector_store %arg16[%c2_210, %c0_211, %c0_212], %519 {strides = array<i32>} : memref<8x4x16xf32, #tpu.memory_space<vmem>>, vector<1x4x16xf32>,
    %c6_213 = arith.constant 6 : index
    %c0_214 = arith.constant 0 : index
    %c0_215 = arith.constant 0 : index
    %520 = vector.load %arg14[%c6_213, %c0_214, %c0_215] : memref<8x4x16xf32, #tpu.memory_space<vmem>>, vector<1x4x16xf32>
    %521 = vector.shape_cast %520 : vector<1x4x16xf32> to vector<4x16xf32>
    %c1_216 = arith.constant 1 : index
    %c0_217 = arith.constant 0 : index
    %c0_218 = arith.constant 0 : index
    %522 = vector.load %arg14[%c1_216, %c0_217, %c0_218] : memref<8x4x16xf32, #tpu.memory_space<vmem>>, vector<1x4x16xf32>
    %523 = vector.shape_cast %522 : vector<1x4x16xf32> to vector<4x16xf32>
    %524 = tpu.concatenate %521, %523 in 1 : vector<4x16xf32>, vector<4x16xf32> -> vector<4x32xf32>
    %cst_219 = arith.constant dense<0.000000e+00> : vector<4x32xf32>
    %525 = tpu.matmul %524, %260, %cst_219 {dimension_numbers = #tpu.dot_dimension_numbers<[1], [0], [0], [1], [0, 0, 1, 1], [], []>} : vector<4x32xf32>, vector<32x32xf32>, vector<4x32xf32> -> vector<4x32xf32>
    %cst_220 = arith.constant dense<0.000000e+00> : vector<4x32xf32>
    %526 = tpu.matmul %507, %261, %cst_220 {dimension_numbers = #tpu.dot_dimension_numbers<[1], [0], [0], [1], [0, 0, 1, 1], [], []>} : vector<4x32xf32>, vector<32x32xf32>, vector<4x32xf32> -> vector<4x32xf32>
    %527 = arith.addf %525, %526 : vector<4x32xf32>
    %528 = vector.broadcast %262 : vector<1x32xf32> to vector<4x32xf32>
    %529 = arith.addf %527, %528 : vector<4x32xf32>
    %cst_221 = arith.constant 0.000000e+00 : f32
    %530 = vector.broadcast %cst_221 : f32 to vector<4x32xf32>
    %531 = arith.maximumf %529, %530 : vector<4x32xf32>
    %c6_i32_222 = arith.constant 6 : i32
    %532 = vector.broadcast %c6_i32_222 : i32 to vector<4x1xi32>
    %533 = arith.cmpi sgt, %263, %532 : vector<4x1xi32>
    %534 = arith.extui %533 : vector<4x1xi1> to vector<4x1xi32>
    %535 = arith.sitofp %534 : vector<4x1xi32> to vector<4x1xf32>
    %c1_i32_223 = arith.constant 1 : i32
    %536 = vector.broadcast %c1_i32_223 : i32 to vector<4x1xi32>
    %537 = arith.cmpi sgt, %263, %536 : vector<4x1xi32>
    %538 = arith.extui %537 : vector<4x1xi1> to vector<4x1xi32>
    %539 = arith.sitofp %538 : vector<4x1xi32> to vector<4x1xf32>
    %540 = vector.shape_cast %535 : vector<4x1xf32> to vector<4x1xf32>
    %541 = vector.broadcast %540 : vector<4x1xf32> to vector<4x32xf32>
    %542 = vector.shape_cast %539 : vector<4x1xf32> to vector<4x1xf32>
    %543 = vector.broadcast %542 : vector<4x1xf32> to vector<4x32xf32>
    %544 = arith.select %266, %541, %543 : vector<4x32xi1>, vector<4x32xf32>
    %545 = arith.mulf %544, %531 : vector<4x32xf32>
    %cst_224 = arith.constant 1.000000e+00 : f32
    %546 = vector.broadcast %cst_224 : f32 to vector<4x32xf32>
    %547 = arith.subf %546, %544 : vector<4x32xf32>
    %548 = arith.mulf %547, %507 : vector<4x32xf32>
    %549 = arith.addf %545, %548 : vector<4x32xf32>
    %550 = vector.extract_strided_slice %549 {offsets = [0, 0], sizes = [4, 16], strides = [1, 1]} : vector<4x32xf32> to vector<4x16xf32>
    %551 = vector.broadcast %535 : vector<4x1xf32> to vector<4x16xf32>
    %552 = arith.mulf %551, %550 : vector<4x16xf32>
    %c6_225 = arith.constant 6 : index
    %c0_226 = arith.constant 0 : index
    %c0_227 = arith.constant 0 : index
    %553 = vector.load %arg15[%c6_225, %c0_226, %c0_227] : memref<8x4x16xf32, #tpu.memory_space<vmem>>, vector<1x4x16xf32>
    %554 = vector.shape_cast %553 : vector<1x4x16xf32> to vector<4x16xf32>
    %555 = vector.shape_cast %552 : vector<4x16xf32> to vector<1x4x16xf32>
    tpu.vector_store %arg15[%c6_225, %c0_226, %c0_227], %555 {strides = array<i32>} : memref<8x4x16xf32, #tpu.memory_space<vmem>>, vector<1x4x16xf32>,
    %556 = vector.extract_strided_slice %549 {offsets = [0, 16], sizes = [4, 16], strides = [1, 1]} : vector<4x32xf32> to vector<4x16xf32>
    %557 = vector.broadcast %539 : vector<4x1xf32> to vector<4x16xf32>
    %558 = arith.mulf %557, %556 : vector<4x16xf32>
    %c1_228 = arith.constant 1 : index
    %c0_229 = arith.constant 0 : index
    %c0_230 = arith.constant 0 : index
    %559 = vector.load %arg16[%c1_228, %c0_229, %c0_230] : memref<8x4x16xf32, #tpu.memory_space<vmem>>, vector<1x4x16xf32>
    %560 = vector.shape_cast %559 : vector<1x4x16xf32> to vector<4x16xf32>
    %561 = vector.shape_cast %558 : vector<4x16xf32> to vector<1x4x16xf32>
    tpu.vector_store %arg16[%c1_228, %c0_229, %c0_230], %561 {strides = array<i32>} : memref<8x4x16xf32, #tpu.memory_space<vmem>>, vector<1x4x16xf32>,
    %c7_231 = arith.constant 7 : index
    %c0_232 = arith.constant 0 : index
    %c0_233 = arith.constant 0 : index
    %562 = vector.load %arg14[%c7_231, %c0_232, %c0_233] : memref<8x4x16xf32, #tpu.memory_space<vmem>>, vector<1x4x16xf32>
    %563 = vector.shape_cast %562 : vector<1x4x16xf32> to vector<4x16xf32>
    %c0_234 = arith.constant 0 : index
    %c0_235 = arith.constant 0 : index
    %c0_236 = arith.constant 0 : index
    %564 = vector.load %arg14[%c0_234, %c0_235, %c0_236] : memref<8x4x16xf32, #tpu.memory_space<vmem>>, vector<1x4x16xf32>
    %565 = vector.shape_cast %564 : vector<1x4x16xf32> to vector<4x16xf32>
    %566 = tpu.concatenate %563, %565 in 1 : vector<4x16xf32>, vector<4x16xf32> -> vector<4x32xf32>
    %cst_237 = arith.constant dense<0.000000e+00> : vector<4x32xf32>
    %567 = tpu.matmul %566, %260, %cst_237 {dimension_numbers = #tpu.dot_dimension_numbers<[1], [0], [0], [1], [0, 0, 1, 1], [], []>} : vector<4x32xf32>, vector<32x32xf32>, vector<4x32xf32> -> vector<4x32xf32>
    %cst_238 = arith.constant dense<0.000000e+00> : vector<4x32xf32>
    %568 = tpu.matmul %549, %261, %cst_238 {dimension_numbers = #tpu.dot_dimension_numbers<[1], [0], [0], [1], [0, 0, 1, 1], [], []>} : vector<4x32xf32>, vector<32x32xf32>, vector<4x32xf32> -> vector<4x32xf32>
    %569 = arith.addf %567, %568 : vector<4x32xf32>
    %570 = vector.broadcast %262 : vector<1x32xf32> to vector<4x32xf32>
    %571 = arith.addf %569, %570 : vector<4x32xf32>
    %cst_239 = arith.constant 0.000000e+00 : f32
    %572 = vector.broadcast %cst_239 : f32 to vector<4x32xf32>
    %573 = arith.maximumf %571, %572 : vector<4x32xf32>
    %c7_i32_240 = arith.constant 7 : i32
    %574 = vector.broadcast %c7_i32_240 : i32 to vector<4x1xi32>
    %575 = arith.cmpi sgt, %263, %574 : vector<4x1xi32>
    %576 = arith.extui %575 : vector<4x1xi1> to vector<4x1xi32>
    %577 = arith.sitofp %576 : vector<4x1xi32> to vector<4x1xf32>
    %c0_i32_241 = arith.constant 0 : i32
    %578 = vector.broadcast %c0_i32_241 : i32 to vector<4x1xi32>
    %579 = arith.cmpi sgt, %263, %578 : vector<4x1xi32>
    %580 = arith.extui %579 : vector<4x1xi1> to vector<4x1xi32>
    %581 = arith.sitofp %580 : vector<4x1xi32> to vector<4x1xf32>
    %582 = vector.shape_cast %577 : vector<4x1xf32> to vector<4x1xf32>
    %583 = vector.broadcast %582 : vector<4x1xf32> to vector<4x32xf32>
    %584 = vector.shape_cast %581 : vector<4x1xf32> to vector<4x1xf32>
    %585 = vector.broadcast %584 : vector<4x1xf32> to vector<4x32xf32>
    %586 = arith.select %266, %583, %585 : vector<4x32xi1>, vector<4x32xf32>
    %587 = arith.mulf %586, %573 : vector<4x32xf32>
    %cst_242 = arith.constant 1.000000e+00 : f32
    %588 = vector.broadcast %cst_242 : f32 to vector<4x32xf32>
    %589 = arith.subf %588, %586 : vector<4x32xf32>
    %590 = arith.mulf %589, %549 : vector<4x32xf32>
    %591 = arith.addf %587, %590 : vector<4x32xf32>
    %592 = vector.extract_strided_slice %591 {offsets = [0, 0], sizes = [4, 16], strides = [1, 1]} : vector<4x32xf32> to vector<4x16xf32>
    %593 = vector.broadcast %577 : vector<4x1xf32> to vector<4x16xf32>
    %594 = arith.mulf %593, %592 : vector<4x16xf32>
    %c7_243 = arith.constant 7 : index
    %c0_244 = arith.constant 0 : index
    %c0_245 = arith.constant 0 : index
    %595 = vector.load %arg15[%c7_243, %c0_244, %c0_245] : memref<8x4x16xf32, #tpu.memory_space<vmem>>, vector<1x4x16xf32>
    %596 = vector.shape_cast %595 : vector<1x4x16xf32> to vector<4x16xf32>
    %597 = vector.shape_cast %594 : vector<4x16xf32> to vector<1x4x16xf32>
    tpu.vector_store %arg15[%c7_243, %c0_244, %c0_245], %597 {strides = array<i32>} : memref<8x4x16xf32, #tpu.memory_space<vmem>>, vector<1x4x16xf32>,
    %598 = vector.extract_strided_slice %591 {offsets = [0, 16], sizes = [4, 16], strides = [1, 1]} : vector<4x32xf32> to vector<4x16xf32>
    %599 = vector.broadcast %581 : vector<4x1xf32> to vector<4x16xf32>
    %600 = arith.mulf %599, %598 : vector<4x16xf32>
    %c0_246 = arith.constant 0 : index
    %c0_247 = arith.constant 0 : index
    %c0_248 = arith.constant 0 : index
    %601 = vector.load %arg16[%c0_246, %c0_247, %c0_248] : memref<8x4x16xf32, #tpu.memory_space<vmem>>, vector<1x4x16xf32>
    %602 = vector.shape_cast %601 : vector<1x4x16xf32> to vector<4x16xf32>
    %603 = vector.shape_cast %600 : vector<4x16xf32> to vector<1x4x16xf32>
    tpu.vector_store %arg16[%c0_246, %c0_247, %c0_248], %603 {strides = array<i32>} : memref<8x4x16xf32, #tpu.memory_space<vmem>>, vector<1x4x16xf32>,
    %604 = vector.extract_strided_slice %591 {offsets = [0, 0], sizes = [4, 16], strides = [1, 1]} : vector<4x32xf32> to vector<4x16xf32>
    %c0_249 = arith.constant 0 : index
    %c0_250 = arith.constant 0 : index
    %c0_251 = arith.constant 0 : index
    %605 = vector.load %arg13[%c0_249, %c0_250, %c0_251] : memref<2x4x16xf32, #tpu.memory_space<vmem>>, vector<1x4x16xf32>
    %606 = vector.shape_cast %605 : vector<1x4x16xf32> to vector<4x16xf32>
    %607 = vector.shape_cast %604 : vector<4x16xf32> to vector<1x4x16xf32>
    tpu.vector_store %arg13[%c0_249, %c0_250, %c0_251], %607 {strides = array<i32>} : memref<2x4x16xf32, #tpu.memory_space<vmem>>, vector<1x4x16xf32>,
    %608 = vector.extract_strided_slice %591 {offsets = [0, 16], sizes = [4, 16], strides = [1, 1]} : vector<4x32xf32> to vector<4x16xf32>
    %c1_252 = arith.constant 1 : index
    %c0_253 = arith.constant 0 : index
    %c0_254 = arith.constant 0 : index
    %609 = vector.load %arg13[%c1_252, %c0_253, %c0_254] : memref<2x4x16xf32, #tpu.memory_space<vmem>>, vector<1x4x16xf32>
    %610 = vector.shape_cast %609 : vector<1x4x16xf32> to vector<4x16xf32>
    %611 = vector.shape_cast %608 : vector<4x16xf32> to vector<1x4x16xf32>
    tpu.vector_store %arg13[%c1_252, %c0_253, %c0_254], %611 {strides = array<i32>} : memref<2x4x16xf32, #tpu.memory_space<vmem>>, vector<1x4x16xf32>,
    %c0_255 = arith.constant 0 : index
    %c0_256 = arith.constant 0 : index
    %612 = vector.load %arg10[%c0_255, %c0_256] : memref<16x32xf32, #tpu.memory_space<vmem>>, vector<16x32xf32>
    %c0_257 = arith.constant 0 : index
    %c0_258 = arith.constant 0 : index
    %613 = vector.load %arg11[%c0_257, %c0_258] : memref<1x32xf32, #tpu.memory_space<vmem>>, vector<1x32xf32>
    %c0_259 = arith.constant 0 : index
    %c0_260 = arith.constant 0 : index
    %c0_261 = arith.constant 0 : index
    %614 = vector.load %arg15[%c0_259, %c0_260, %c0_261] : memref<8x4x16xf32, #tpu.memory_space<vmem>>, vector<1x4x16xf32>
    %615 = vector.shape_cast %614 : vector<1x4x16xf32> to vector<4x16xf32>
    %c0_262 = arith.constant 0 : index
    %c0_263 = arith.constant 0 : index
    %c0_264 = arith.constant 0 : index
    %616 = vector.load %arg16[%c0_262, %c0_263, %c0_264] : memref<8x4x16xf32, #tpu.memory_space<vmem>>, vector<1x4x16xf32>
    %617 = vector.shape_cast %616 : vector<1x4x16xf32> to vector<4x16xf32>
    %618 = arith.addf %615, %617 : vector<4x16xf32>
    %cst_265 = arith.constant dense<0.000000e+00> : vector<4x32xf32>
    %619 = tpu.matmul %618, %612, %cst_265 {dimension_numbers = #tpu.dot_dimension_numbers<[1], [0], [0], [1], [0, 0, 1, 1], [], []>} : vector<4x16xf32>, vector<16x32xf32>, vector<4x32xf32> -> vector<4x32xf32>
    %620 = vector.broadcast %613 : vector<1x32xf32> to vector<4x32xf32>
    %621 = arith.addf %619, %620 : vector<4x32xf32>
    %c0_266 = arith.constant 0 : index
    %c0_267 = arith.constant 0 : index
    %c0_268 = arith.constant 0 : index
    %622 = vector.load %arg0[%c0_266, %c0_267, %c0_268] : memref<8x4x32xf32, #tpu.memory_space<vmem>>, vector<1x4x32xf32>
    %623 = vector.shape_cast %622 : vector<1x4x32xf32> to vector<4x32xf32>
    %624 = arith.addf %623, %621 : vector<4x32xf32>
    %c0_269 = arith.constant 0 : index
    %c0_270 = arith.constant 0 : index
    %c0_271 = arith.constant 0 : index
    %625 = vector.load %arg12[%c0_269, %c0_270, %c0_271] : memref<8x4x32xf32, #tpu.memory_space<vmem>>, vector<1x4x32xf32>
    %626 = vector.shape_cast %625 : vector<1x4x32xf32> to vector<4x32xf32>
    %627 = vector.shape_cast %624 : vector<4x32xf32> to vector<1x4x32xf32>
    tpu.vector_store %arg12[%c0_269, %c0_270, %c0_271], %627 {strides = array<i32>} : memref<8x4x32xf32, #tpu.memory_space<vmem>>, vector<1x4x32xf32>,
    %c1_272 = arith.constant 1 : index
    %c0_273 = arith.constant 0 : index
    %c0_274 = arith.constant 0 : index
    %628 = vector.load %arg15[%c1_272, %c0_273, %c0_274] : memref<8x4x16xf32, #tpu.memory_space<vmem>>, vector<1x4x16xf32>
    %629 = vector.shape_cast %628 : vector<1x4x16xf32> to vector<4x16xf32>
    %c1_275 = arith.constant 1 : index
    %c0_276 = arith.constant 0 : index
    %c0_277 = arith.constant 0 : index
    %630 = vector.load %arg16[%c1_275, %c0_276, %c0_277] : memref<8x4x16xf32, #tpu.memory_space<vmem>>, vector<1x4x16xf32>
    %631 = vector.shape_cast %630 : vector<1x4x16xf32> to vector<4x16xf32>
    %632 = arith.addf %629, %631 : vector<4x16xf32>
    %cst_278 = arith.constant dense<0.000000e+00> : vector<4x32xf32>
    %633 = tpu.matmul %632, %612, %cst_278 {dimension_numbers = #tpu.dot_dimension_numbers<[1], [0], [0], [1], [0, 0, 1, 1], [], []>} : vector<4x16xf32>, vector<16x32xf32>, vector<4x32xf32> -> vector<4x32xf32>
    %634 = vector.broadcast %613 : vector<1x32xf32> to vector<4x32xf32>
    %635 = arith.addf %633, %634 : vector<4x32xf32>
    %c1_279 = arith.constant 1 : index
    %c0_280 = arith.constant 0 : index
    %c0_281 = arith.constant 0 : index
    %636 = vector.load %arg0[%c1_279, %c0_280, %c0_281] : memref<8x4x32xf32, #tpu.memory_space<vmem>>, vector<1x4x32xf32>
    %637 = vector.shape_cast %636 : vector<1x4x32xf32> to vector<4x32xf32>
    %638 = arith.addf %637, %635 : vector<4x32xf32>
    %c1_282 = arith.constant 1 : index
    %c0_283 = arith.constant 0 : index
    %c0_284 = arith.constant 0 : index
    %639 = vector.load %arg12[%c1_282, %c0_283, %c0_284] : memref<8x4x32xf32, #tpu.memory_space<vmem>>, vector<1x4x32xf32>
    %640 = vector.shape_cast %639 : vector<1x4x32xf32> to vector<4x32xf32>
    %641 = vector.shape_cast %638 : vector<4x32xf32> to vector<1x4x32xf32>
    tpu.vector_store %arg12[%c1_282, %c0_283, %c0_284], %641 {strides = array<i32>} : memref<8x4x32xf32, #tpu.memory_space<vmem>>, vector<1x4x32xf32>,
    %c2_285 = arith.constant 2 : index
    %c0_286 = arith.constant 0 : index
    %c0_287 = arith.constant 0 : index
    %642 = vector.load %arg15[%c2_285, %c0_286, %c0_287] : memref<8x4x16xf32, #tpu.memory_space<vmem>>, vector<1x4x16xf32>
    %643 = vector.shape_cast %642 : vector<1x4x16xf32> to vector<4x16xf32>
    %c2_288 = arith.constant 2 : index
    %c0_289 = arith.constant 0 : index
    %c0_290 = arith.constant 0 : index
    %644 = vector.load %arg16[%c2_288, %c0_289, %c0_290] : memref<8x4x16xf32, #tpu.memory_space<vmem>>, vector<1x4x16xf32>
    %645 = vector.shape_cast %644 : vector<1x4x16xf32> to vector<4x16xf32>
    %646 = arith.addf %643, %645 : vector<4x16xf32>
    %cst_291 = arith.constant dense<0.000000e+00> : vector<4x32xf32>
    %647 = tpu.matmul %646, %612, %cst_291 {dimension_numbers = #tpu.dot_dimension_numbers<[1], [0], [0], [1], [0, 0, 1, 1], [], []>} : vector<4x16xf32>, vector<16x32xf32>, vector<4x32xf32> -> vector<4x32xf32>
    %648 = vector.broadcast %613 : vector<1x32xf32> to vector<4x32xf32>
    %649 = arith.addf %647, %648 : vector<4x32xf32>
    %c2_292 = arith.constant 2 : index
    %c0_293 = arith.constant 0 : index
    %c0_294 = arith.constant 0 : index
    %650 = vector.load %arg0[%c2_292, %c0_293, %c0_294] : memref<8x4x32xf32, #tpu.memory_space<vmem>>, vector<1x4x32xf32>
    %651 = vector.shape_cast %650 : vector<1x4x32xf32> to vector<4x32xf32>
    %652 = arith.addf %651, %649 : vector<4x32xf32>
    %c2_295 = arith.constant 2 : index
    %c0_296 = arith.constant 0 : index
    %c0_297 = arith.constant 0 : index
    %653 = vector.load %arg12[%c2_295, %c0_296, %c0_297] : memref<8x4x32xf32, #tpu.memory_space<vmem>>, vector<1x4x32xf32>
    %654 = vector.shape_cast %653 : vector<1x4x32xf32> to vector<4x32xf32>
    %655 = vector.shape_cast %652 : vector<4x32xf32> to vector<1x4x32xf32>
    tpu.vector_store %arg12[%c2_295, %c0_296, %c0_297], %655 {strides = array<i32>} : memref<8x4x32xf32, #tpu.memory_space<vmem>>, vector<1x4x32xf32>,
    %c3_298 = arith.constant 3 : index
    %c0_299 = arith.constant 0 : index
    %c0_300 = arith.constant 0 : index
    %656 = vector.load %arg15[%c3_298, %c0_299, %c0_300] : memref<8x4x16xf32, #tpu.memory_space<vmem>>, vector<1x4x16xf32>
    %657 = vector.shape_cast %656 : vector<1x4x16xf32> to vector<4x16xf32>
    %c3_301 = arith.constant 3 : index
    %c0_302 = arith.constant 0 : index
    %c0_303 = arith.constant 0 : index
    %658 = vector.load %arg16[%c3_301, %c0_302, %c0_303] : memref<8x4x16xf32, #tpu.memory_space<vmem>>, vector<1x4x16xf32>
    %659 = vector.shape_cast %658 : vector<1x4x16xf32> to vector<4x16xf32>
    %660 = arith.addf %657, %659 : vector<4x16xf32>
    %cst_304 = arith.constant dense<0.000000e+00> : vector<4x32xf32>
    %661 = tpu.matmul %660, %612, %cst_304 {dimension_numbers = #tpu.dot_dimension_numbers<[1], [0], [0], [1], [0, 0, 1, 1], [], []>} : vector<4x16xf32>, vector<16x32xf32>, vector<4x32xf32> -> vector<4x32xf32>
    %662 = vector.broadcast %613 : vector<1x32xf32> to vector<4x32xf32>
    %663 = arith.addf %661, %662 : vector<4x32xf32>
    %c3_305 = arith.constant 3 : index
    %c0_306 = arith.constant 0 : index
    %c0_307 = arith.constant 0 : index
    %664 = vector.load %arg0[%c3_305, %c0_306, %c0_307] : memref<8x4x32xf32, #tpu.memory_space<vmem>>, vector<1x4x32xf32>
    %665 = vector.shape_cast %664 : vector<1x4x32xf32> to vector<4x32xf32>
    %666 = arith.addf %665, %663 : vector<4x32xf32>
    %c3_308 = arith.constant 3 : index
    %c0_309 = arith.constant 0 : index
    %c0_310 = arith.constant 0 : index
    %667 = vector.load %arg12[%c3_308, %c0_309, %c0_310] : memref<8x4x32xf32, #tpu.memory_space<vmem>>, vector<1x4x32xf32>
    %668 = vector.shape_cast %667 : vector<1x4x32xf32> to vector<4x32xf32>
    %669 = vector.shape_cast %666 : vector<4x32xf32> to vector<1x4x32xf32>
    tpu.vector_store %arg12[%c3_308, %c0_309, %c0_310], %669 {strides = array<i32>} : memref<8x4x32xf32, #tpu.memory_space<vmem>>, vector<1x4x32xf32>,
    %c4_311 = arith.constant 4 : index
    %c0_312 = arith.constant 0 : index
    %c0_313 = arith.constant 0 : index
    %670 = vector.load %arg15[%c4_311, %c0_312, %c0_313] : memref<8x4x16xf32, #tpu.memory_space<vmem>>, vector<1x4x16xf32>
    %671 = vector.shape_cast %670 : vector<1x4x16xf32> to vector<4x16xf32>
    %c4_314 = arith.constant 4 : index
    %c0_315 = arith.constant 0 : index
    %c0_316 = arith.constant 0 : index
    %672 = vector.load %arg16[%c4_314, %c0_315, %c0_316] : memref<8x4x16xf32, #tpu.memory_space<vmem>>, vector<1x4x16xf32>
    %673 = vector.shape_cast %672 : vector<1x4x16xf32> to vector<4x16xf32>
    %674 = arith.addf %671, %673 : vector<4x16xf32>
    %cst_317 = arith.constant dense<0.000000e+00> : vector<4x32xf32>
    %675 = tpu.matmul %674, %612, %cst_317 {dimension_numbers = #tpu.dot_dimension_numbers<[1], [0], [0], [1], [0, 0, 1, 1], [], []>} : vector<4x16xf32>, vector<16x32xf32>, vector<4x32xf32> -> vector<4x32xf32>
    %676 = vector.broadcast %613 : vector<1x32xf32> to vector<4x32xf32>
    %677 = arith.addf %675, %676 : vector<4x32xf32>
    %c4_318 = arith.constant 4 : index
    %c0_319 = arith.constant 0 : index
    %c0_320 = arith.constant 0 : index
    %678 = vector.load %arg0[%c4_318, %c0_319, %c0_320] : memref<8x4x32xf32, #tpu.memory_space<vmem>>, vector<1x4x32xf32>
    %679 = vector.shape_cast %678 : vector<1x4x32xf32> to vector<4x32xf32>
    %680 = arith.addf %679, %677 : vector<4x32xf32>
    %c4_321 = arith.constant 4 : index
    %c0_322 = arith.constant 0 : index
    %c0_323 = arith.constant 0 : index
    %681 = vector.load %arg12[%c4_321, %c0_322, %c0_323] : memref<8x4x32xf32, #tpu.memory_space<vmem>>, vector<1x4x32xf32>
    %682 = vector.shape_cast %681 : vector<1x4x32xf32> to vector<4x32xf32>
    %683 = vector.shape_cast %680 : vector<4x32xf32> to vector<1x4x32xf32>
    tpu.vector_store %arg12[%c4_321, %c0_322, %c0_323], %683 {strides = array<i32>} : memref<8x4x32xf32, #tpu.memory_space<vmem>>, vector<1x4x32xf32>,
    %c5_324 = arith.constant 5 : index
    %c0_325 = arith.constant 0 : index
    %c0_326 = arith.constant 0 : index
    %684 = vector.load %arg15[%c5_324, %c0_325, %c0_326] : memref<8x4x16xf32, #tpu.memory_space<vmem>>, vector<1x4x16xf32>
    %685 = vector.shape_cast %684 : vector<1x4x16xf32> to vector<4x16xf32>
    %c5_327 = arith.constant 5 : index
    %c0_328 = arith.constant 0 : index
    %c0_329 = arith.constant 0 : index
    %686 = vector.load %arg16[%c5_327, %c0_328, %c0_329] : memref<8x4x16xf32, #tpu.memory_space<vmem>>, vector<1x4x16xf32>
    %687 = vector.shape_cast %686 : vector<1x4x16xf32> to vector<4x16xf32>
    %688 = arith.addf %685, %687 : vector<4x16xf32>
    %cst_330 = arith.constant dense<0.000000e+00> : vector<4x32xf32>
    %689 = tpu.matmul %688, %612, %cst_330 {dimension_numbers = #tpu.dot_dimension_numbers<[1], [0], [0], [1], [0, 0, 1, 1], [], []>} : vector<4x16xf32>, vector<16x32xf32>, vector<4x32xf32> -> vector<4x32xf32>
    %690 = vector.broadcast %613 : vector<1x32xf32> to vector<4x32xf32>
    %691 = arith.addf %689, %690 : vector<4x32xf32>
    %c5_331 = arith.constant 5 : index
    %c0_332 = arith.constant 0 : index
    %c0_333 = arith.constant 0 : index
    %692 = vector.load %arg0[%c5_331, %c0_332, %c0_333] : memref<8x4x32xf32, #tpu.memory_space<vmem>>, vector<1x4x32xf32>
    %693 = vector.shape_cast %692 : vector<1x4x32xf32> to vector<4x32xf32>
    %694 = arith.addf %693, %691 : vector<4x32xf32>
    %c5_334 = arith.constant 5 : index
    %c0_335 = arith.constant 0 : index
    %c0_336 = arith.constant 0 : index
    %695 = vector.load %arg12[%c5_334, %c0_335, %c0_336] : memref<8x4x32xf32, #tpu.memory_space<vmem>>, vector<1x4x32xf32>
    %696 = vector.shape_cast %695 : vector<1x4x32xf32> to vector<4x32xf32>
    %697 = vector.shape_cast %694 : vector<4x32xf32> to vector<1x4x32xf32>
    tpu.vector_store %arg12[%c5_334, %c0_335, %c0_336], %697 {strides = array<i32>} : memref<8x4x32xf32, #tpu.memory_space<vmem>>, vector<1x4x32xf32>,
    %c6_337 = arith.constant 6 : index
    %c0_338 = arith.constant 0 : index
    %c0_339 = arith.constant 0 : index
    %698 = vector.load %arg15[%c6_337, %c0_338, %c0_339] : memref<8x4x16xf32, #tpu.memory_space<vmem>>, vector<1x4x16xf32>
    %699 = vector.shape_cast %698 : vector<1x4x16xf32> to vector<4x16xf32>
    %c6_340 = arith.constant 6 : index
    %c0_341 = arith.constant 0 : index
    %c0_342 = arith.constant 0 : index
    %700 = vector.load %arg16[%c6_340, %c0_341, %c0_342] : memref<8x4x16xf32, #tpu.memory_space<vmem>>, vector<1x4x16xf32>
    %701 = vector.shape_cast %700 : vector<1x4x16xf32> to vector<4x16xf32>
    %702 = arith.addf %699, %701 : vector<4x16xf32>
    %cst_343 = arith.constant dense<0.000000e+00> : vector<4x32xf32>
    %703 = tpu.matmul %702, %612, %cst_343 {dimension_numbers = #tpu.dot_dimension_numbers<[1], [0], [0], [1], [0, 0, 1, 1], [], []>} : vector<4x16xf32>, vector<16x32xf32>, vector<4x32xf32> -> vector<4x32xf32>
    %704 = vector.broadcast %613 : vector<1x32xf32> to vector<4x32xf32>
    %705 = arith.addf %703, %704 : vector<4x32xf32>
    %c6_344 = arith.constant 6 : index
    %c0_345 = arith.constant 0 : index
    %c0_346 = arith.constant 0 : index
    %706 = vector.load %arg0[%c6_344, %c0_345, %c0_346] : memref<8x4x32xf32, #tpu.memory_space<vmem>>, vector<1x4x32xf32>
    %707 = vector.shape_cast %706 : vector<1x4x32xf32> to vector<4x32xf32>
    %708 = arith.addf %707, %705 : vector<4x32xf32>
    %c6_347 = arith.constant 6 : index
    %c0_348 = arith.constant 0 : index
    %c0_349 = arith.constant 0 : index
    %709 = vector.load %arg12[%c6_347, %c0_348, %c0_349] : memref<8x4x32xf32, #tpu.memory_space<vmem>>, vector<1x4x32xf32>
    %710 = vector.shape_cast %709 : vector<1x4x32xf32> to vector<4x32xf32>
    %711 = vector.shape_cast %708 : vector<4x32xf32> to vector<1x4x32xf32>
    tpu.vector_store %arg12[%c6_347, %c0_348, %c0_349], %711 {strides = array<i32>} : memref<8x4x32xf32, #tpu.memory_space<vmem>>, vector<1x4x32xf32>,
    %c7_350 = arith.constant 7 : index
    %c0_351 = arith.constant 0 : index
    %c0_352 = arith.constant 0 : index
    %712 = vector.load %arg15[%c7_350, %c0_351, %c0_352] : memref<8x4x16xf32, #tpu.memory_space<vmem>>, vector<1x4x16xf32>
    %713 = vector.shape_cast %712 : vector<1x4x16xf32> to vector<4x16xf32>
    %c7_353 = arith.constant 7 : index
    %c0_354 = arith.constant 0 : index
    %c0_355 = arith.constant 0 : index
    %714 = vector.load %arg16[%c7_353, %c0_354, %c0_355] : memref<8x4x16xf32, #tpu.memory_space<vmem>>, vector<1x4x16xf32>
    %715 = vector.shape_cast %714 : vector<1x4x16xf32> to vector<4x16xf32>
    %716 = arith.addf %713, %715 : vector<4x16xf32>
    %cst_356 = arith.constant dense<0.000000e+00> : vector<4x32xf32>
    %717 = tpu.matmul %716, %612, %cst_356 {dimension_numbers = #tpu.dot_dimension_numbers<[1], [0], [0], [1], [0, 0, 1, 1], [], []>} : vector<4x16xf32>, vector<16x32xf32>, vector<4x32xf32> -> vector<4x32xf32>
    %718 = vector.broadcast %613 : vector<1x32xf32> to vector<4x32xf32>
    %719 = arith.addf %717, %718 : vector<4x32xf32>
    %c7_357 = arith.constant 7 : index
    %c0_358 = arith.constant 0 : index
    %c0_359 = arith.constant 0 : index
    %720 = vector.load %arg0[%c7_357, %c0_358, %c0_359] : memref<8x4x32xf32, #tpu.memory_space<vmem>>, vector<1x4x32xf32>
    %721 = vector.shape_cast %720 : vector<1x4x32xf32> to vector<4x32xf32>
    %722 = arith.addf %721, %719 : vector<4x32xf32>
    %c7_360 = arith.constant 7 : index
    %c0_361 = arith.constant 0 : index
    %c0_362 = arith.constant 0 : index
    %723 = vector.load %arg12[%c7_360, %c0_361, %c0_362] : memref<8x4x32xf32, #tpu.memory_space<vmem>>, vector<1x4x32xf32>
    %724 = vector.shape_cast %723 : vector<1x4x32xf32> to vector<4x32xf32>
    %725 = vector.shape_cast %722 : vector<4x32xf32> to vector<1x4x32xf32>
    tpu.vector_store %arg12[%c7_360, %c0_361, %c0_362], %725 {strides = array<i32>} : memref<8x4x32xf32, #tpu.memory_space<vmem>>, vector<1x4x32xf32>,
    return
  }
}

</mosaic_0001>

<bundles_post_ra>
// kernel: tpu_custom_call.1
= control target key start
LH: loop header
LB: loop body
LE: loop exit
PB: predicated region body
PF: predicated region fallthrough
CT: control target
= control target key end

     0   :  { %19 = vsyncpa [#allocation6], 0  ;;  %s4594_s0 = inlined_call_operand.vmem [shape: f32[8,4,32], index: 0, kind: input, shape index: {}]   ;;  %s4595_s1 = inlined_call_operand.vmem [shape: s32[4,1], index: 1, kind: input, shape index: {}]   ;;  %s4596_s2 = inlined_call_operand.hbm [shape: f32[4,32], index: 2, kind: input, shape index: {}]   ;;  %s4597_s3 = inlined_call_operand.vmem [shape: f32[1,32], index: 3, kind: input, shape index: {}]   ;;  %s4598_s4 = inlined_call_operand.hbm [shape: f32[1,32], index: 4, kind: input, shape index: {}]   ;;  %s4599_s5 = inlined_call_operand.vmem [shape: f32[32,16], index: 5, kind: input, shape index: {}]   ;;  %s4600_s6 = inlined_call_operand.hbm [shape: f32[1,16], index: 6, kind: input, shape index: {}]   ;;  %s4601_s7 = inlined_call_operand.vmem [shape: f32[32,32], index: 7, kind: input, shape index: {}]   ;;  %s4602_s8 = inlined_call_operand.hbm [shape: f32[32,32], index: 8, kind: input, shape index: {}]   ;;  %s4603_s9 = inlined_call_operand.vmem [shape: f32[1,32], index: 9, kind: input, shape index: {}]   ;;  %s4604_s10 = inlined_call_operand.hbm [shape: f32[16,32], index: 10, kind: input, shape index: {}]   ;;  %s4605_s11 = inlined_call_operand.vmem [shape: f32[1,32], index: 11, kind: input, shape index: {}]   ;;  %s4606_s12 = inlined_call_operand.hbm [shape: f32[8,4,32], index: 12, kind: output, shape index: {0}]   ;;  %s4607_s13 = inlined_call_operand.hbm [shape: f32[2,4,16], index: 13, kind: output, shape index: {1}]  }
   0x1   :  { %20 = vsyncpa [#allocation9], 0 }
   0x2   :  { %21 = vsyncpa [#allocation12], 0 }
   0x3   :  { %22 = vsyncpa [#allocation7], 0 }
   0x4   :  { %23 = vsyncpa [#allocation16], 0  ;;  %s3738_s25 = smov [#allocation8]   ;;  %s3739_s27 = smov [#allocation11]  }
   0x5   :  { %s46_s26 = sshll.u32 %s3738_s25, 4  ;;  %s69_s28 = sshll.u32 %s3739_s27, 4  ;;  %s47_s26 = int_to_ptr.vmem [resolvable:$true] %s46_s26  ;;  %s70_s28 = int_to_ptr.vmem [resolvable:$true] %s69_s28 }
   0x6   :  { %s3596_s29 = scalar_lea.vmem %s47_s26, 16  ;;  %s3600_s30 = scalar_lea.vmem %s47_s26, 32 }
   0x7   :  { %p3597_p0 = scmp.ne.s32.totalorder %s47_s26, %s3596_s29  ;;  %p3601_p1 = scmp.lt.s32.totalorder %s47_s26, %s47_s26 }
   0x8   :  { %p3602_p2 = scmp.lt.s32.totalorder %s3600_s30, %s3596_s29 }
   0xa   :  { %p3603_p3 = por %p3602_p2, %p3601_p1 }
   0xc   :  { %p3604_p4 = pnand %p3603_p3, %p3597_p0 }
   0xe   :  { %3607 = shalt.err (!%p3604_p4)
}
   0xf   :  { %49 = dma.hbm_to_vmem [thread:$0]  %s4598_s4, 16, %s47_s26, [#allocation9]  }
  0x10   :  { %s3616_s16 = scalar_lea.vmem %s70_s28, 512  ;;  %p3621_p6 = scmp.lt.s32.totalorder %s70_s28, %s70_s28 }
  0x11   :  { %p3617_p5 = scmp.ne.s32.totalorder %s70_s28, %s3616_s16  ;;  %p3622_p7 = scmp.lt.s32.totalorder %s3616_s16, %s3616_s16 }
  0x13   :  { %p3623_p8 = por %p3622_p7, %p3621_p6 }
  0x15   :  { %p3624_p9 = pnand %p3623_p8, %p3617_p5 }
  0x17   :  { %3627 = shalt.err (!%p3624_p9)
}
  0x18   :  { %s3740_s17 = smov 128   ;;  %s3741_s18 = smov 8  }
  0x19   :  { %75 = dma.hbm_to_vmem [thread:$0]  %s4602_s8, 512, %s70_s28, [#allocation12], %s3740_s17, %s3740_s17, %s3741_s18  }
  0x1a   :  { %s3742_s21 = smov [#allocation5]   ;;  %s3743_s23 = smov [#allocation10]  }
  0x1b   :  { %s34_s22 = sshll.u32 %s3742_s21, 4  ;;  %s58_s4 = sshll.u32 %s3743_s23, 4  ;;  %s35_s22 = int_to_ptr.vmem [resolvable:$true] %s34_s22  ;;  %s59_s4 = int_to_ptr.vmem [resolvable:$true] %s58_s4 }
  0x1c   :  { %s3636_s24 = scalar_lea.vmem %s35_s22, 64  ;;  %p3641_p11 = scmp.lt.s32.totalorder %s35_s22, %s35_s22 }
  0x1d   :  { %p3637_p10 = scmp.ne.s32.totalorder %s35_s22, %s3636_s24  ;;  %p3642_p12 = scmp.lt.s32.totalorder %s3636_s24, %s3636_s24 }
  0x1f   :  { %p3643_p13 = por %p3642_p12, %p3641_p11 }
  0x21   :  { %p3644_p0 = pnand %p3643_p13, %p3637_p10 }
  0x23   :  { %3647 = shalt.err (!%p3644_p0)
}
  0x24   :  { %37 = dma.hbm_to_vmem [thread:$0]  %s4596_s2, 64, %s35_s22, [#allocation6]  }
  0x25   :  { %s3656_s27 = scalar_lea.vmem %s59_s4, 16  ;;  %s3660_s8 = scalar_lea.vmem %s59_s4, 32 }
  0x26   :  { %p3657_p1 = scmp.ne.s32.totalorder %s59_s4, %s3656_s27  ;;  %p3661_p2 = scmp.lt.s32.totalorder %s59_s4, %s59_s4 }
  0x27   :  { %p3662_p3 = scmp.lt.s32.totalorder %s3660_s8, %s3656_s27 }
  0x29   :  { %p3663_p4 = por %p3662_p3, %p3661_p2 }
  0x2b   :  { %p3664_p5 = pnand %p3663_p4, %p3657_p1 }
  0x2d   :  { %3667 = shalt.err (!%p3664_p5)
}
  0x2e   :  { %61 = dma.hbm_to_vmem [thread:$0]  %s4600_s6, 16, %s59_s4, [#allocation9]  }
  0x2f   :  { %s3744_s30 = smov [#allocation13]  }
  0x30   :  { %s83_s14 = sshll.u32 %s3744_s30, 4  ;;  %s84_s14 = int_to_ptr.vmem [resolvable:$true] %s83_s14 }
  0x31   :  { %s3676_s15 = scalar_lea.vmem %s84_s14, 256  ;;  %p3681_p7 = scmp.lt.s32.totalorder %s84_s14, %s84_s14 }
  0x32   :  { %p3677_p6 = scmp.ne.s32.totalorder %s84_s14, %s3676_s15  ;;  %p3682_p8 = scmp.lt.s32.totalorder %s3676_s15, %s3676_s15 }
  0x34   :  { %p3683_p9 = por %p3682_p8, %p3681_p7 }
  0x36   :  { %p3684_p10 = pnand %p3683_p9, %p3677_p6 }
  0x38   :  { %3687 = shalt.err (!%p3684_p10)
}
  0x39   :  { %89 = dma.hbm_to_vmem [thread:$0]  %s4604_s10, 256, %s84_s14, [#allocation12], %s3740_s17, %s3740_s17, %s3741_s18  }
  0x3a   :  { %3728 = dma.done.wait [#allocation6], 64  }
  0x3b   :  { %3729 = vsyncadd [#allocation6], 4294967232 }
  0x3c   :  { %3730 = dma.done.wait [#allocation9], 32  }
  0x3d   :  { %3731 = vsyncadd [#allocation9], 4294967264 }
  0x3e   :  { %3732 = dma.done.wait [#allocation12], 768  }
  0x3f   :  { %3733 = vsyncadd [#allocation12], 4294966528  ;;  %vm115_vm0 = vcmask 257024   ;;  %v3023_v0 = vld [vmem:[%s4594_s0 + $0x14] sm:$0xf]  ;;  %v3745_v41 = vmov 0.0  }
  0x40   :  { %v3015_v1 = vld [vmem:[%s4594_s0 + $0x4] sm:$0xf]  ;;  %v3027_v2 = vld [vmem:[%s4594_s0 + $0x1c] sm:$0xf]  ;;  %v601_v3 = vsel %vm115_vm0, %v3023_v0, 0.0  ;;  %3225 = vmatprep.subr.mxu1 %v3745_v41  ;;  %3214 = vmatprep.subr.mxu0 %v3745_v41  ;;  %v3915_v43 = vld [vmem:[%s4599_s5 + $0x10] sm:$0xff] }
  0x41   :  { %v229_v4 = vsel %vm115_vm0, %v3015_v1, 0.0  ;;  %v3019_v5 = vld [vmem:[%s4594_s0 + $0xc] sm:$0xf]  ;;  %602 = vadd.xlane.f32.xlu1 %v601_v3  ;;  %v787_v6 = vsel %vm115_vm0, %v3027_v2, 0.0  ;;  %v114_v8 = vld [vmem:[%s4594_s0] sm:$0xf] }
  0x42   :  { %230 = vadd.xlane.f32.xlu0 %v229_v4  ;;  %v415_v7 = vsel %vm115_vm0, %v3019_v5, 0.0  ;;  %v116_v9 = vsel %vm115_vm0, %v114_v8, 0.0  ;;  %v3017_v34 = vld [vmem:[%s4594_s0 + $0x8] sm:$0xf]  ;;  %v3021_v35 = vld [vmem:[%s4594_s0 + $0x10] sm:$0xf] }
  0x43   :  { %v322_v37 = vsel %vm115_vm0, %v3017_v34, 0.0  ;;  %v508_v38 = vsel %vm115_vm0, %v3021_v35, 0.0  ;;  %v3025_v39 = vld [vmem:[%s4594_s0 + $0x18] sm:$0xf]  ;;  %v3924_v44 = vld [vmem:[%s4599_s5 + $0x8] sm:$0xff]  ;;  %v3933_v45 = vld [vmem:[%s4599_s5] sm:$0xff] }
  0x44   :  { %v694_v40 = vsel %vm115_vm0, %v3025_v39, 0.0  ;;  %v3906_v42 = vld [vmem:[%s4599_s5 + $0x18] sm:$0xff]  ;;  %vm3746_vm1 = vmmov 0   ;;  %vm150_vm2 = vcmask 261120   ;;  %vm225_vm3 = vcmask 125952   ;;  %s3750_s6 = smov [#allocation15]  }
  0x45   :  { %788 = vadd.xlane.f32.xlu1 %v787_v6  ;;  %3226 = vmatpush3.msra.mxu1 %v3906_v42  ;;  %vm898_vm6 = vcmask 130048   ;;  %s2993_s19 = sshll.u32 %s3750_s6, 4  ;;  %s2994_s19 = int_to_ptr.vmem [resolvable:$true] %s2993_s19 }
  0x46   :  { %416 = vadd.xlane.f32.xlu0 %v415_v7  ;;  %3215 = vmatpush3.msra.mxu0 %v3906_v42  ;;  %s3688_s5 = scalar_lea.vmem %s2994_s19, 128  ;;  %p3693_p12 = scmp.lt.s32.totalorder %s2994_s19, %s2994_s19 }
  0x47   :  { %3227 = vmatprep.subr.mxu1 %v3745_v41  ;;  %3216 = vmatprep.subr.mxu0 %v3745_v41  ;;  %p3689_p11 = scmp.ne.s32.totalorder %s2994_s19, %s3688_s5  ;;  %p3694_p13 = scmp.lt.s32.totalorder %s3688_s5, %s3688_s5 }
  0x48   :  { %3228 = vmatpush3.msra.mxu1 %v3915_v43  ;;  %3217 = vmatpush3.msra.mxu0 %v3915_v43 }
  0x49   :  { %117 = vadd.xlane.f32.xlu1 %v116_v9  ;;  %3229 = vmatprep.subr.mxu1 %v3745_v41  ;;  %p3695_p0 = por %p3694_p13, %p3693_p12 }
  0x4a   :  { %3218 = vmatprep.subr.mxu0 %v3745_v41  ;;  %3230 = vmatpush3.msra.mxu1 %v3924_v44 }
  0x4b   :  { %3219 = vmatpush3.msra.mxu0 %v3924_v44  ;;  %3231 = vmatprep.subr.mxu1 %v3745_v41  ;;  %p3696_p1 = pnand %p3695_p0, %p3689_p11 }
  0x4c   :  { %3220 = vmatprep.subr.mxu0 %v3745_v41  ;;  %3232 = vmatpush3.msra.mxu1 %v3933_v45 }
  0x4d   :  { %3221 = vmatpush3.msra.mxu0 %v3933_v45  ;;  %3233 = vmatprep.mubr.msk.f32.mxu1 %vm3746_vm1, %v3745_v41 }
  0x4e   :  { %3247 = vmatprep.subr.mxu1 %v3745_v41  ;;  %3222 = vmatprep.mubr.msk.f32.mxu0 %vm3746_vm1, %v3745_v41 }
  0x4f   :  { %3236 = vmatprep.subr.mxu0 %v3745_v41 }
  0xca   :  { %v603_v10 = vpop.xlane.xlu1 %602 }
  0xcb   :  { %v231_v11 = vpop.xlane.xlu0 %230  ;;  %v604_v12 = vmul.f32 0.03125, %v603_v10 }
  0xcc   :  { %v232_v13 = vmul.f32 0.03125, %v231_v11 }
  0xcd   :  { %v3865_v14 = vsub.f32 %v3023_v0, %v604_v12 }
  0xce   :  { %v3867_v15 = vsub.f32 %v3015_v1, %v232_v13  ;;  %v789_v16 = vpop.xlane.xlu1 %788  ;;  %v3962_v13 = vld [vmem:[#allocation8] ss:$0 sm:$0xff] }
  0xcf   :  { %v417_v17 = vpop.xlane.xlu0 %416  ;;  %v790_v18 = vmul.f32 0.03125, %v789_v16  ;;  %v606_v21 = vmul.f32 %v3865_v14, %v3865_v14 }
  0xd0   :  { %v418_v19 = vmul.f32 0.03125, %v417_v17  ;;  %v234_v20 = vmul.f32 %v3867_v15, %v3867_v15 }
  0xd1   :  { %v3873_v22 = vsub.f32 %v3027_v2, %v790_v18  ;;  %v607_v25 = vsel %vm115_vm0, %v606_v21, 0.0 }
  0xd2   :  { %v3875_v23 = vsub.f32 %v3019_v5, %v418_v19  ;;  %v235_v24 = vsel %vm115_vm0, %v234_v20, 0.0  ;;  %608 = vadd.xlane.f32.xlu1 %v607_v25  ;;  %v118_v26 = vpop.xlane.xlu1 %117 }
  0xd3   :  { %236 = vadd.xlane.f32.xlu0 %v235_v24  ;;  %v120_v27 = vmul.f32 0.03125, %v118_v26  ;;  %v792_v29 = vmul.f32 %v3873_v22, %v3873_v22 }
  0xd4   :  { %v420_v28 = vmul.f32 %v3875_v23, %v3875_v23 }
  0xd5   :  { %v3883_v30 = vsub.f32 %v114_v8, %v120_v27  ;;  %v793_v32 = vsel %vm115_vm0, %v792_v29, 0.0  ;;  %v3955_v8 = vld [vmem:[%s4597_s3] ss:$0 sm:$0xff] }
  0xd6   :  { %v421_v31 = vsel %vm115_vm0, %v420_v28, 0.0 }
  0xd7   :  { %422 = vadd.xlane.f32.xlu0 %v421_v31  ;;  %v122_v33 = vmul.f32 %v3883_v30, %v3883_v30 }
  0xd9   :  { %v123_v36 = vsel %vm115_vm0, %v122_v33, 0.0 }
  0xda   :  { %124 = vadd.xlane.f32.xlu1 %v123_v36  ;;  %v4043_v36 = vld [vmem:[%s4601_s7 + $0x8] sm:$0xff] }
  0xdb   :  { %794 = vadd.xlane.f32.xlu0 %v793_v32 }
  0xde   :  { %509 = vadd.xlane.f32.xlu1 %v508_v38 }
  0xdf   :  { %323 = vadd.xlane.f32.xlu0 %v322_v37 }
  0xe3   :  { %695 = vadd.xlane.f32.xlu0 %v694_v40 }
 0x15b   :  { %v609_v49 = vpop.xlane.xlu1 %608 }
 0x15c   :  { %v237_v46 = vpop.xlane.xlu0 %236  ;;  %v610_v52 = vmul.f32 0.03125, %v609_v49 }
 0x15d   :  { %v238_v47 = vmul.f32 0.03125, %v237_v46 }
 0x15e   :  { %v611_v57 = vadd.f32 1e-05, %v610_v52 }
 0x15f   :  { %v239_v48 = vadd.f32 1e-05, %v238_v47 }
 0x160   :  { %v423_v50 = vpop.xlane.xlu0 %422 }
 0x161   :  { %3572 = vrsqrt.f32 %v239_v48  ;;  %v424_v51 = vmul.f32 0.03125, %v423_v50 }
 0x163   :  { %v425_v53 = vadd.f32 1e-05, %v424_v51  ;;  %v125_v55 = vpop.xlane.xlu1 %124 }
 0x164   :  { %v795_v54 = vpop.xlane.xlu0 %794  ;;  %v126_v56 = vmul.f32 0.03125, %v125_v55 }
 0x165   :  { %3574 = vrsqrt.f32 %v425_v53  ;;  %v796_v63 = vmul.f32 0.03125, %v795_v54 }
 0x166   :  { %v127_v58 = vadd.f32 1e-05, %v126_v56 }
 0x167   :  { %v510_v60 = vpop.xlane.xlu1 %509  ;;  %v797_v7 = vadd.f32 1e-05, %v796_v63  ;;  %v4078_v63 = vld [vmem:[#allocation11 + $0x18] sm:$0xff] }
 0x168   :  { %v324_v59 = vpop.xlane.xlu0 %323  ;;  %v511_v62 = vmul.f32 0.03125, %v510_v60  ;;  %3576 = vrsqrt.f32 %v127_v58 }
 0x169   :  { %v325_v61 = vmul.f32 0.03125, %v324_v59  ;;  %3578 = vrsqrt.f32 %v611_v57 }
 0x16a   :  { %v3946_v1 = vsub.f32 %v3021_v35, %v511_v62  ;;  %3580 = vrsqrt.f32 %v797_v7  ;;  %v4037_v35 = vld [vmem:[%s4601_s7 + $0x10] sm:$0xff] }
 0x16b   :  { %v3944_v0 = vsub.f32 %v3017_v34, %v325_v61  ;;  %v4031_v34 = vld [vmem:[%s4601_s7 + $0x18] sm:$0xff] }
 0x16c   :  { %v696_v2 = vpop.xlane.xlu0 %695  ;;  %v513_v5 = vmul.f32 %v3946_v1, %v3946_v1 }
 0x16d   :  { %v697_v3 = vmul.f32 0.03125, %v696_v2  ;;  %v327_v4 = vmul.f32 %v3944_v0, %v3944_v0 }
 0x16e   :  { %v3573_v6 = vpop.eup %3572  ;;  %v514_v11 = vsel %vm115_vm0, %v513_v5, 0.0 }
 0x16f   :  { %v3957_v9 = vsub.f32 %v3025_v39, %v697_v3  ;;  %v328_v10 = vsel %vm115_vm0, %v327_v4, 0.0  ;;  %v241_v12 = vmul.f32 %v3573_v6, %v3867_v15  ;;  %515 = vadd.xlane.f32.xlu0 %v514_v11 }
 0x170   :  { %329 = vadd.xlane.f32.xlu1 %v328_v10 }
 0x171   :  { %v699_v16 = vmul.f32 %v3957_v9, %v3957_v9  ;;  %v242_v17 = vmul.f32 %v3955_v8, %v241_v12 }
 0x172   :  { %v3575_v18 = vpop.eup %3574 }
 0x173   :  { %v427_v19 = vmul.f32 %v3575_v18, %v3875_v23  ;;  %v700_v20 = vsel %vm115_vm0, %v699_v16, 0.0  ;;  %v243_v21 = vadd.f32 %v3962_v13, %v242_v17  ;;  %v4109_v18 = vld [vmem:[#allocation5] sm:$0xf] }
 0x174   :  { %701 = vadd.xlane.f32.xlu1 %v700_v20  ;;  %v4116_v20 = vld [vmem:[%s4601_s7] sm:$0xff]  ;;  %s3747_s7 = smov 16  }
 0x175   :  { %3234 = vmatmul.mubr.msk.f32.vlgmr.msra.gmra.mxu1 %vm150_vm2, %v243_v21  ;;  %v3577_v15 = vpop.eup %3576  ;;  %v428_v24 = vmul.f32 %v3955_v8, %v427_v19 }
 0x176   :  { %3248 = vmatpush3.msra.mxu1 %v3906_v42  ;;  %3255 = vmatprep.mubr.msk.f32.mxu1 %vm3746_vm1, %v3745_v41  ;;  %v3579_v25 = vpop.eup %3578  ;;  %v129_v23 = vmul.f32 %v3577_v15, %v3883_v30 }
 0x177   :  { %3249 = vmatprep.subr.mxu1 %v3745_v41  ;;  %v613_v27 = vmul.f32 %v3579_v25, %v3865_v14  ;;  %v429_v28 = vadd.f32 %v3962_v13, %v428_v24  ;;  %v3581_v30 = vpop.eup %3580 }
 0x178   :  { %3250 = vmatpush3.msra.mxu1 %v3915_v43  ;;  %v136_v26 = vmul.f32 %v3955_v8, %v129_v23  ;;  %v799_v31 = vmul.f32 %v3581_v30, %v3873_v22 }
 0x179   :  { %3251 = vmatprep.subr.mxu1 %v3745_v41  ;;  %v614_v14 = vmul.f32 %v3955_v8, %v613_v27 }
 0x17a   :  { %3252 = vmatpush3.msra.mxu1 %v3924_v44  ;;  %v143_v29 = vadd.f32 %v3962_v13, %v136_v26  ;;  %v800_v22 = vmul.f32 %v3955_v8, %v799_v31  ;;  %v887_v26 = vld [vmem:[%s4595_s1] sm:$0xf] }
 0x17b   :  { %3253 = vmatprep.subr.mxu1 %v3745_v41  ;;  %v615_v32 = vadd.f32 %v3962_v13, %v614_v14  ;;  %vm1054_vm4 = vcmp.gt.s32.totalorder %v887_v26, 0  ;;  %vm1057_vm5 = vcmp.gt.s32.totalorder %v887_v26, 7  ;;  %vm1239_vm7 = vcmp.gt.s32.totalorder %v887_v26, 1 }
 0x17c   :  { %3254 = vmatpush3.msra.mxu1 %v3933_v45  ;;  %3223 = vmatmul.mubr.msk.f32.vlgmr.msra.gmra.mxu0 %vm150_vm2, %v143_v29  ;;  %v801_v33 = vadd.f32 %v3962_v13, %v800_v22  ;;  %v3032_v27 = vsel %vm1054_vm4, 1.0, %v3745_v41  ;;  %v3748_v29 = vmov 0   ;;  %vm1242_vm8 = vcmp.gt.s32.totalorder %v887_v26, 6 }
 0x17d   :  { %3256 = vmatmul.mubr.msk.f32.vlgmr.msra.gmra.mxu1 %vm150_vm2, %v429_v28  ;;  %3269 = vmatprep.subr.mxu1 %v3745_v41  ;;  %v3033_v28 = vsel %vm1057_vm5, 1.0, %v3745_v41  ;;  %vm1425_vm9 = vcmp.gt.s32.totalorder %v887_v26, 2  ;;  %vm1428_vm10 = vcmp.gt.s32.totalorder %v887_v26, 5  ;;  %vm1611_vm11 = vcmp.gt.s32.totalorder %v887_v26, 3 }
 0x17e   :  { %3270 = vmatpush3.msra.mxu1 %v3906_v42  ;;  %3277 = vmatprep.mubr.msk.f32.mxu1 %vm3746_vm1, %v3745_v41  ;;  %v3551_v14 = vpack.i.bf16 %v3033_v28, %v3032_v27  ;;  %vm1614_vm12 = vcmp.gt.s32.totalorder %v887_v26, 4  ;;  %v888_v26 = vlaneseq }
 0x17f   :  { %3271 = vmatprep.subr.mxu1 %v3745_v41  ;;  %3237 = vmatpush3.msra.mxu0 %v3906_v42 }
 0x180   :  { %3272 = vmatpush3.msra.mxu1 %v3915_v43  ;;  %3238 = vmatprep.subr.mxu0 %v3745_v41 }
 0x181   :  { %3273 = vmatprep.subr.mxu1 %v3745_v41  ;;  %3239 = vmatpush3.msra.mxu0 %v3915_v43 }
 0x182   :  { %3274 = vmatpush3.msra.mxu1 %v3924_v44  ;;  %3240 = vmatprep.subr.mxu0 %v3745_v41 }
 0x183   :  { %3275 = vmatprep.subr.mxu1 %v3745_v41  ;;  %3241 = vmatpush3.msra.mxu0 %v3924_v44 }
 0x184   :  { %3276 = vmatpush3.msra.mxu1 %v3933_v45  ;;  %3242 = vmatprep.subr.mxu0 %v3745_v41 }
 0x185   :  { %3278 = vmatmul.mubr.msk.f32.vlgmr.msra.gmra.mxu1 %vm150_vm2, %v615_v32  ;;  %3291 = vmatprep.subr.mxu1 %v3745_v41 }
 0x186   :  { %3292 = vmatpush3.msra.mxu1 %v3906_v42  ;;  %3299 = vmatprep.mubr.msk.f32.mxu1 %vm3746_vm1, %v3745_v41 }
 0x187   :  { %3293 = vmatprep.subr.mxu1 %v3745_v41  ;;  %3243 = vmatpush3.msra.mxu0 %v3933_v45 }
 0x188   :  { %3294 = vmatpush3.msra.mxu1 %v3915_v43  ;;  %3244 = vmatprep.mubr.msk.f32.mxu0 %vm3746_vm1, %v3745_v41 }
 0x189   :  { %3295 = vmatprep.subr.mxu1 %v3745_v41  ;;  %3258 = vmatprep.subr.mxu0 %v3745_v41 }
 0x18a   :  { %3296 = vmatpush3.msra.mxu1 %v3924_v44  ;;  %3550 = vset.pattern.permute.xlu1 %v3748_v29 }
 0x18b   :  { %3297 = vmatprep.subr.mxu1 %v3745_v41  ;;  %3571 = vset.pattern.permute.xlu0 %v3748_v29  ;;  %v4232_v29 = vand.u32 127, %v888_v26 }
 0x18c   :  { %3298 = vmatpush3.msra.mxu1 %v3933_v45  ;;  %3552 = vperm.xlu1 %3550, %v3551_v14  }
 0x18d   :  { %3300 = vmatmul.mubr.msk.f32.vlgmr.msra.gmra.mxu1 %vm150_vm2, %v801_v33  ;;  %3313 = vmatprep.subr.mxu1 %v3745_v41  ;;  %vm890_vm13 = vcmp.lt.s32.totalorder %v4232_v29, 16 }
 0x18e   :  { %3321 = vmatprep.mubr.msk.f32.mxu1 %vm3746_vm1, %v3745_v41  ;;  %3314 = vmatpush3.msra.mxu1 %v4031_v34 }
 0x18f   :  { %3315 = vmatprep.subr.mxu1 %v3745_v41 }
 0x190   :  { %3316 = vmatpush3.msra.mxu1 %v4037_v35 }
 0x191   :  { %3317 = vmatprep.subr.mxu1 %v3745_v41 }
 0x192   :  { %3318 = vmatpush3.msra.mxu1 %v4043_v36 }
 0x193   :  { %3319 = vmatprep.subr.mxu1 %v3745_v41 }
 0x194   :  { %3320 = vmatpush3.msra.mxu1 %v4116_v20 }
 0x195   :  { %3335 = vmatprep.subr.mxu1 %v3745_v41 }
 0x1f8   :  { %v516_v37 = vpop.xlane.xlu0 %515 }
 0x1f9   :  { %v330_v38 = vpop.xlane.xlu1 %329  ;;  %v517_v39 = vmul.f32 0.03125, %v516_v37 }
 0x1fa   :  { %v331_v40 = vmul.f32 0.03125, %v330_v38 }
 0x1fb   :  { %v518_v47 = vadd.f32 1e-05, %v517_v39 }
 0x1fc   :  { %v332_v46 = vadd.f32 1e-05, %v331_v40 }
 0x1fd   :  { %v702_v48 = vpop.xlane.xlu1 %701 }
 0x1fe   :  { %3582 = vrsqrt.f32 %v332_v46  ;;  %v703_v49 = vmul.f32 0.03125, %v702_v48 }
 0x1ff   :  { %3584 = vrsqrt.f32 %v518_v47 }
 0x200   :  { %v704_v50 = vadd.f32 1e-05, %v703_v49 }
 0x202   :  { %3586 = vrsqrt.f32 %v704_v50 }
 0x20b   :  { %v3583_v51 = vpop.eup %3582 }
 0x20c   :  { %v334_v52 = vmul.f32 %v3583_v51, %v3944_v0  ;;  %v3585_v53 = vpop.eup %3584 }
 0x20d   :  { %v520_v55 = vmul.f32 %v3585_v53, %v3946_v1 }
 0x20e   :  { %v335_v54 = vmul.f32 %v3955_v8, %v334_v52 }
 0x20f   :  { %v521_v57 = vmul.f32 %v3955_v8, %v520_v55  ;;  %v3587_v58 = vpop.eup %3586  ;;  %v3037_v55 = vsel %vm1242_vm8, 1.0, %v3745_v41 }
 0x210   :  { %v336_v56 = vadd.f32 %v3962_v13, %v335_v54  ;;  %v706_v59 = vmul.f32 %v3587_v58, %v3957_v9  ;;  %v3036_v54 = vsel %vm1239_vm7, 1.0, %v3745_v41 }
 0x211   :  { %v522_v60 = vadd.f32 %v3962_v13, %v521_v57  ;;  %v3556_v58 = vpack.i.bf16 %v3037_v55, %v3036_v54 }
 0x212   :  { %3245 = vmatmul.mubr.msk.f32.vlgmr.msra.gmra.mxu0 %vm150_vm2, %v336_v56  ;;  %v707_v61 = vmul.f32 %v3955_v8, %v706_v59  ;;  %v3040_v59 = vsel %vm1425_vm9, 1.0, %v3745_v41 }
 0x213   :  { %3259 = vmatpush3.msra.mxu0 %v3906_v42  ;;  %3266 = vmatprep.mubr.msk.f32.mxu0 %vm3746_vm1, %v3745_v41 }
 0x214   :  { %3260 = vmatprep.subr.mxu0 %v3745_v41  ;;  %v708_v62 = vadd.f32 %v3962_v13, %v707_v61 }
 0x215   :  { %3261 = vmatpush3.msra.mxu0 %v3915_v43 }
 0x216   :  { %3262 = vmatprep.subr.mxu0 %v3745_v41 }
 0x217   :  { %3263 = vmatpush3.msra.mxu0 %v3924_v44 }
 0x218   :  { %3264 = vmatprep.subr.mxu0 %v3745_v41 }
 0x219   :  { %3265 = vmatpush3.msra.mxu0 %v3933_v45 }
 0x21a   :  { %3267 = vmatmul.mubr.msk.f32.vlgmr.msra.gmra.mxu0 %vm150_vm2, %v522_v60  ;;  %3280 = vmatprep.subr.mxu0 %v3745_v41  ;;  %v3041_v60 = vsel %vm1428_vm10, 1.0, %v3745_v41 }
 0x21b   :  { %3281 = vmatpush3.msra.mxu0 %v3906_v42  ;;  %3288 = vmatprep.mubr.msk.f32.mxu0 %vm3746_vm1, %v3745_v41  ;;  %v4083_v42 = vld [vmem:[#allocation11 + $0x10] sm:$0xff]  ;;  %v3561_v61 = vpack.i.bf16 %v3041_v60, %v3040_v59 }
 0x21c   :  { %3282 = vmatprep.subr.mxu0 %v3745_v41 }
 0x21d   :  { %3283 = vmatpush3.msra.mxu0 %v3915_v43  ;;  %v4089_v43 = vld [vmem:[#allocation11 + $0x8] sm:$0xff] }
 0x21e   :  { %3284 = vmatprep.subr.mxu0 %v3745_v41 }
 0x21f   :  { %3285 = vmatpush3.msra.mxu0 %v3924_v44  ;;  %v4093_v44 = vld [vmem:[#allocation11] sm:$0xff] }
 0x220   :  { %3286 = vmatprep.subr.mxu0 %v3745_v41 }
 0x221   :  { %3287 = vmatpush3.msra.mxu0 %v3933_v45  ;;  %v4099_v45 = vld [vmem:[#allocation10] ss:$0 sm:$0xff] }
 0x222   :  { %3289 = vmatmul.mubr.msk.f32.vlgmr.msra.gmra.mxu0 %vm150_vm2, %v708_v62  ;;  %3302 = vmatprep.subr.mxu0 %v3745_v41  ;;  %v3044_v62 = vsel %vm1611_vm11, 1.0, %v3745_v41 }
 0x223   :  { %3303 = vmatpush3.msra.mxu0 %v4078_v63  ;;  %3310 = vmatprep.mubr.msk.f32.mxu0 %vm3746_vm1, %v3745_v41 }
 0x224   :  { %3304 = vmatprep.subr.mxu0 %v3745_v41 }
 0x225   :  { %3305 = vmatpush3.msra.mxu0 %v4083_v42 }
 0x226   :  { %3306 = vmatprep.subr.mxu0 %v3745_v41 }
 0x227   :  { %3307 = vmatpush3.msra.mxu0 %v4089_v43 }
 0x228   :  { %3308 = vmatprep.subr.mxu0 %v3745_v41 }
 0x229   :  { %3309 = vmatpush3.msra.mxu0 %v4093_v44 }
 0x22a   :  { %3324 = vmatprep.subr.mxu0 %v3745_v41  ;;  %3311 = vmatmul.mubr.msk.f32.vlgmr.msra.gmra.mxu0 %vm150_vm2, %v4109_v18 }
 0x22b   :  { %3325 = vmatpush3.msra.mxu0 %v4078_v63  ;;  %3332 = vmatprep.mubr.msk.f32.mxu0 %vm3746_vm1, %v3745_v41 }
 0x22c   :  { %3326 = vmatprep.subr.mxu0 %v3745_v41 }
 0x22d   :  { %3327 = vmatpush3.msra.mxu0 %v4083_v42 }
 0x22e   :  { %3328 = vmatprep.subr.mxu0 %v3745_v41 }
 0x22f   :  { %3329 = vmatpush3.msra.mxu0 %v4089_v43 }
 0x230   :  { %3330 = vmatprep.subr.mxu0 %v3745_v41 }
 0x231   :  { %3331 = vmatpush3.msra.mxu0 %v4093_v44 }
 0x232   :  { %3346 = vmatprep.subr.mxu0 %v3745_v41 }
 0x235   :  { %v313_v0 = vpop.f32.mrf.mxu1 }
 0x236   :  { %v314_v1 = vadd.f32 %v4099_v45, %v313_v0 }
 0x237   :  { %v3235_v2 = vpop.f32.mrf.mxu1 }
 0x238   :  { %v317_v3 = vmax.f32 %v314_v1, 0.0 }
 0x23a   :  { %319 = vst.msk [vmem:[#allocation2 + $0x4] sm:$0xf] %vm225_vm3, %v317_v3 }
 0x23c   :  { %v220_v6 = vpop.f32.mrf.mxu0 }
 0x23d   :  { %v499_v4 = vpop.f32.mrf.mxu1  ;;  %v221_v7 = vadd.f32 %v4099_v45, %v220_v6 }
 0x23e   :  { %v500_v5 = vadd.f32 %v4099_v45, %v499_v4  ;;  %v3224_v10 = vpop.f32.mrf.mxu0 }
 0x23f   :  { %v3257_v8 = vpop.f32.mrf.mxu1  ;;  %v224_v11 = vmax.f32 %v221_v7, 0.0 }
 0x240   :  { %v503_v9 = vmax.f32 %v500_v5, 0.0  ;;  %v4171_v5 = vpop.permute.xlu1 %3552 }
 0x241   :  { %226 = vst.msk [vmem:[#allocation2] sm:$0xf] %vm225_vm3, %v224_v11  ;;  %v1983_v56 = vld [vmem:[#allocation2 + $0x4] sm:$0xf]  ;;  %v4237_v14 = vunpack.i.h.bf16 %v4171_v5 }
 0x242   :  { %505 = vst.msk [vmem:[#allocation2 + $0xc] sm:$0xf] %vm225_vm3, %v503_v9  ;;  %v1084_v6 = vld [vmem:[#allocation2 + $0x4] sm:$0xf] }
 0x245   :  { %v685_v12 = vpop.f32.mrf.mxu1 }
 0x246   :  { %v686_v13 = vadd.f32 %v4099_v45, %v685_v12 }
 0x247   :  { %v3279_v16 = vpop.f32.mrf.mxu1 }
 0x248   :  { %v689_v17 = vmax.f32 %v686_v13, 0.0  ;;  %v892_v31 = vld [vmem:[#allocation2] sm:$0xf] }
 0x249   :  { %v1643_v53 = vld [vmem:[#allocation2 + $0xc] sm:$0xf]  ;;  %v2153_v2 = vld [vmem:[#allocation2] sm:$0xf] }
 0x24a   :  { %691 = vst.msk [vmem:[#allocation2 + $0x14] sm:$0xf] %vm225_vm3, %v689_v17  ;;  %v1456_v16 = vld [vmem:[#allocation2 + $0xc] sm:$0xf] }
 0x24d   :  { %v871_v19 = vpop.f32.mrf.mxu1 }
 0x24e   :  { %v872_v21 = vadd.f32 %v4099_v45, %v871_v19 }
 0x24f   :  { %v3301_v15 = vpop.f32.mrf.mxu1 }
 0x250   :  { %v875_v24 = vmax.f32 %v872_v21, 0.0 }
 0x251   :  { %v1271_v23 = vld [vmem:[#allocation2 + $0x14] sm:$0xf] }
 0x252   :  { %877 = vst.msk [vmem:[#allocation2 + $0x1c] sm:$0xf] %vm225_vm3, %v875_v24  ;;  %v1812_v27 = vld [vmem:[#allocation2 + $0x14] sm:$0xf] }
 0x259   :  { %v893_v25 = vld [vmem:[#allocation2 + $0x1c] sm:$0xf] }
 0x25a   :  { %895 = vrot.lane.b32.xlu0 %v893_v25, %s3747_s7 }
 0x25e   :  { %1273 = vrot.lane.b32.xlu0 %v1271_v23, %s3747_s7 }
 0x2cc   :  { %v896_v30 = vpop.permute.xlu0 %895 }
 0x2cd   :  { %v899_v32 = vsel %vm898_vm6, %v892_v31, %v896_v30  ;;  %v4240_v30 = vunpack.i.l.bf16 %v4171_v5 }
 0x2ce   :  { %3322 = vmatmul.mubr.msk.f32.vlgmr.msra.gmra.mxu1 %vm150_vm2, %v899_v32 }
 0x2cf   :  { %3336 = vmatpush3.msra.mxu1 %v4031_v34  ;;  %3343 = vmatprep.mubr.msk.f32.mxu1 %vm3746_vm1, %v3745_v41 }
 0x2d0   :  { %3337 = vmatprep.subr.mxu1 %v3745_v41  ;;  %v1274_v10 = vpop.permute.xlu0 %1273 }
 0x2d1   :  { %3338 = vmatpush3.msra.mxu1 %v4037_v35 }
 0x2d2   :  { %3339 = vmatprep.subr.mxu1 %v3745_v41  ;;  %v406_v22 = vpop.f32.mrf.mxu0 }
 0x2d3   :  { %3340 = vmatpush3.msra.mxu1 %v4043_v36  ;;  %v407_v33 = vadd.f32 %v4099_v45, %v406_v22 }
 0x2d4   :  { %3341 = vmatprep.subr.mxu1 %v3745_v41  ;;  %v3246_v37 = vpop.f32.mrf.mxu0 }
 0x2d5   :  { %3342 = vmatpush3.msra.mxu1 %v4116_v20  ;;  %v410_v38 = vmax.f32 %v407_v33, 0.0  ;;  %v1070_v33 = vsel %vm890_vm13, %v4240_v30, %v4237_v14  ;;  %v4261_v37 = vld [vmem:[%s4603_s9] ss:$0 sm:$0xff]  ;;  %s3749_s9 = smov 112  }
 0x2d6   :  { %3357 = vmatprep.subr.mxu1 %v3745_v41 }
 0x2d7   :  { %412 = vst.msk [vmem:[#allocation2 + $0x8] sm:$0xf] %vm225_vm3, %v410_v38 }
 0x2da   :  { %v592_v39 = vpop.f32.mrf.mxu0 }
 0x2db   :  { %v593_v40 = vadd.f32 %v4099_v45, %v592_v39 }
 0x2dc   :  { %v3268_v46 = vpop.f32.mrf.mxu0 }
 0x2dd   :  { %v596_v47 = vmax.f32 %v593_v40, 0.0  ;;  %v1072_v40 = vsub.f32 1.0, %v1070_v33 }
 0x2de   :  { %v1813_v1 = vld [vmem:[#allocation2 + $0x8] sm:$0xf] }
 0x2df   :  { %598 = vst.msk [vmem:[#allocation2 + $0x10] sm:$0xf] %vm225_vm3, %v596_v47  ;;  %v1270_v9 = vld [vmem:[#allocation2 + $0x8] sm:$0xf] }
 0x2e0   :  { %v1276_v11 = vsel %vm898_vm6, %v1270_v9, %v1274_v10 }
 0x2e2   :  { %v778_v48 = vpop.f32.mrf.mxu0 }
 0x2e3   :  { %v779_v49 = vadd.f32 %v4099_v45, %v778_v48  ;;  %v3045_v45 = vsel %vm1614_vm12, 1.0, %v3745_v41  ;;  %v2152_v48 = vld [vmem:[#allocation2 + $0x1c] sm:$0xf] }
 0x2e4   :  { %v3290_v50 = vpop.f32.mrf.mxu0  ;;  %v3566_v0 = vpack.i.bf16 %v3045_v45, %v3044_v62 }
 0x2e5   :  { %v782_v51 = vmax.f32 %v779_v49, 0.0 }
 0x2e6   :  { %v1457_v52 = vld [vmem:[#allocation2 + $0x10] sm:$0xf] }
 0x2e7   :  { %784 = vst.msk [vmem:[#allocation2 + $0x18] sm:$0xf] %vm225_vm3, %v782_v51  ;;  %1459 = vrot.lane.b32.xlu0 %v1457_v52, %s3747_s7  ;;  %v1642_v15 = vld [vmem:[#allocation2 + $0x10] sm:$0xf]  ;;  %v1073_v51 = vmul.f32 %v1072_v40, %v4109_v18 }
 0x2ea   :  { %v4169_v3 = vpop.f32.mrf.mxu0 }
 0x2eb   :  { %1645 = vrot.lane.b32.xlu0 %v1643_v53, %s3747_s7 }
 0x2ec   :  { %v3312_v4 = vpop.f32.mrf.mxu0 }
 0x2ee   :  { %v1085_v57 = vld [vmem:[#allocation2 + $0x18] sm:$0xf] }
 0x2ef   :  { %1985 = vrot.lane.b32.xlu0 %v1983_v56, %s3747_s7  ;;  %1087 = vrot.lane.b32.xlu1 %v1085_v57, %s3747_s7  ;;  %v1982_v32 = vld [vmem:[#allocation2 + $0x18] sm:$0xf] }
 0x2f3   :  { %3557 = vperm.xlu1 %3550, %v3556_v58  }
 0x2f7   :  { %3562 = vperm.xlu1 %3550, %v3561_v61  }
 0x2fb   :  { %3567 = vperm.xlu1 %3550, %v3566_v0  }
 0x2ff   :  { %1815 = vrot.lane.b32.xlu1 %v1813_v1, %s3747_s7 }
 0x303   :  { %2155 = vrot.lane.b32.xlu1 %v2153_v2, %s3747_s7 }
 0x359   :  { %v1460_v13 = vpop.permute.xlu0 %1459 }
 0x35a   :  { %v1462_v17 = vsel %vm898_vm6, %v1456_v16, %v1460_v13 }
 0x35d   :  { %v1646_v21 = vpop.permute.xlu0 %1645 }
 0x35e   :  { %v1648_v25 = vsel %vm898_vm6, %v1642_v15, %v1646_v21 }
 0x361   :  { %v1088_v7 = vpop.permute.xlu1 %1087  ;;  %v1986_v31 = vpop.permute.xlu0 %1985 }
 0x362   :  { %v1090_v8 = vsel %vm898_vm6, %v1084_v6, %v1088_v7  ;;  %v1988_v22 = vsel %vm898_vm6, %v1982_v32, %v1986_v31 }
 0x363   :  { %3344 = vmatmul.mubr.msk.f32.vlgmr.msra.gmra.mxu1 %vm150_vm2, %v1090_v8 }
 0x364   :  { %3358 = vmatpush3.msra.mxu1 %v4031_v34  ;;  %3365 = vmatprep.mubr.msk.f32.mxu1 %vm3746_vm1, %v3745_v41 }
 0x365   :  { %3359 = vmatprep.subr.mxu1 %v3745_v41 }
 0x366   :  { %3360 = vmatpush3.msra.mxu1 %v4037_v35 }
 0x367   :  { %3361 = vmatprep.subr.mxu1 %v3745_v41 }
 0x368   :  { %3362 = vmatpush3.msra.mxu1 %v4043_v36 }
 0x369   :  { %3363 = vmatprep.subr.mxu1 %v3745_v41 }
 0x36a   :  { %3364 = vmatpush3.msra.mxu1 %v4116_v20 }
 0x36b   :  { %3366 = vmatmul.mubr.msk.f32.vlgmr.msra.gmra.mxu1 %vm150_vm2, %v1276_v11  ;;  %3379 = vmatprep.subr.mxu1 %v3745_v41 }
 0x36c   :  { %3380 = vmatpush3.msra.mxu1 %v4031_v34  ;;  %3387 = vmatprep.mubr.msk.f32.mxu1 %vm3746_vm1, %v3745_v41 }
 0x36d   :  { %3381 = vmatprep.subr.mxu1 %v3745_v41 }
 0x36e   :  { %3382 = vmatpush3.msra.mxu1 %v4037_v35  ;;  %v4192_v12 = vpop.permute.xlu1 %3557 }
 0x36f   :  { %3383 = vmatprep.subr.mxu1 %v3745_v41  ;;  %v4302_v1 = vunpack.i.h.bf16 %v4192_v12  ;;  %v4305_v2 = vunpack.i.l.bf16 %v4192_v12 }
 0x370   :  { %3384 = vmatpush3.msra.mxu1 %v4043_v36 }
 0x371   :  { %3385 = vmatprep.subr.mxu1 %v3745_v41  ;;  %v1255_v5 = vsel %vm890_vm13, %v4305_v2, %v4302_v1 }
 0x372   :  { %3386 = vmatpush3.msra.mxu1 %v4116_v20  ;;  %v4201_v19 = vpop.permute.xlu1 %3562  ;;  %v1257_v9 = vsub.f32 1.0, %v1255_v5 }
 0x373   :  { %3388 = vmatmul.mubr.msk.f32.vlgmr.msra.gmra.mxu1 %vm150_vm2, %v1462_v17  ;;  %3401 = vmatprep.subr.mxu1 %v3745_v41  ;;  %v4331_v16 = vunpack.i.h.bf16 %v4201_v19  ;;  %v4334_v17 = vunpack.i.l.bf16 %v4201_v19 }
 0x374   :  { %3402 = vmatpush3.msra.mxu1 %v4031_v34  ;;  %3409 = vmatprep.mubr.msk.f32.mxu1 %vm3746_vm1, %v3745_v41 }
 0x375   :  { %3403 = vmatprep.subr.mxu1 %v3745_v41 }
 0x376   :  { %3404 = vmatpush3.msra.mxu1 %v4037_v35  ;;  %v4210_v24 = vpop.permute.xlu1 %3567 }
 0x377   :  { %3405 = vmatprep.subr.mxu1 %v3745_v41 }
 0x378   :  { %3406 = vmatpush3.msra.mxu1 %v4043_v36 }
 0x379   :  { %3407 = vmatprep.subr.mxu1 %v3745_v41 }
 0x37a   :  { %3408 = vmatpush3.msra.mxu1 %v4116_v20  ;;  %v1816_v23 = vpop.permute.xlu1 %1815 }
 0x37b   :  { %3410 = vmatmul.mubr.msk.f32.vlgmr.msra.gmra.mxu1 %vm150_vm2, %v1648_v25  ;;  %3423 = vmatprep.subr.mxu1 %v3745_v41  ;;  %v1818_v28 = vsel %vm898_vm6, %v1812_v27, %v1816_v23  ;;  %v1441_v25 = vsel %vm890_vm13, %v4334_v17, %v4331_v16 }
 0x37c   :  { %3424 = vmatpush3.msra.mxu1 %v4031_v34  ;;  %3431 = vmatprep.mubr.msk.f32.mxu1 %vm3746_vm1, %v3745_v41 }
 0x37d   :  { %3425 = vmatprep.subr.mxu1 %v3745_v41 }
 0x37e   :  { %3426 = vmatpush3.msra.mxu1 %v4037_v35  ;;  %v2156_v46 = vpop.permute.xlu1 %2155 }
 0x37f   :  { %3427 = vmatprep.subr.mxu1 %v3745_v41  ;;  %v2158_v49 = vsel %vm898_vm6, %v2152_v48, %v2156_v46 }
 0x380   :  { %3428 = vmatpush3.msra.mxu1 %v4043_v36 }
 0x381   :  { %3429 = vmatprep.subr.mxu1 %v3745_v41 }
 0x382   :  { %3430 = vmatpush3.msra.mxu1 %v4116_v20 }
 0x383   :  { %3432 = vmatmul.mubr.msk.f32.vlgmr.msra.gmra.mxu1 %vm150_vm2, %v1818_v28  ;;  %3445 = vmatprep.subr.mxu1 %v3745_v41  ;;  %v1443_v28 = vsub.f32 1.0, %v1441_v25 }
 0x384   :  { %3446 = vmatpush3.msra.mxu1 %v4031_v34  ;;  %3453 = vmatprep.mubr.msk.f32.mxu1 %vm3746_vm1, %v3745_v41 }
 0x385   :  { %3447 = vmatprep.subr.mxu1 %v3745_v41 }
 0x386   :  { %3448 = vmatpush3.msra.mxu1 %v4037_v35 }
 0x387   :  { %3449 = vmatprep.subr.mxu1 %v3745_v41 }
 0x388   :  { %3450 = vmatpush3.msra.mxu1 %v4043_v36 }
 0x389   :  { %3451 = vmatprep.subr.mxu1 %v3745_v41 }
 0x38a   :  { %3452 = vmatpush3.msra.mxu1 %v4116_v20 }
 0x38b   :  { %3454 = vmatmul.mubr.msk.f32.vlgmr.msra.gmra.mxu1 %vm150_vm2, %v1988_v22  ;;  %3467 = vmatprep.subr.mxu1 %v3745_v41 }
 0x38c   :  { %3468 = vmatpush3.msra.mxu1 %v4031_v34  ;;  %3475 = vmatprep.mubr.msk.f32.mxu1 %vm3746_vm1, %v3745_v41 }
 0x38d   :  { %3469 = vmatprep.subr.mxu1 %v3745_v41 }
 0x38e   :  { %v1042_v38 = vpop.f32.mrf.mxu1  ;;  %3470 = vmatpush3.msra.mxu1 %v4037_v35 }
 0x38f   :  { %v1043_v39 = vadd.f32 %v1042_v38, %v4169_v3  ;;  %3471 = vmatprep.subr.mxu1 %v3745_v41  ;;  %v4363_v38 = vunpack.i.l.bf16 %v4210_v24 }
 0x390   :  { %v3323_v34 = vpop.f32.mrf.mxu1  ;;  %3472 = vmatpush3.msra.mxu1 %v4043_v36 }
 0x391   :  { %v1052_v47 = vadd.f32 %v4261_v37, %v1043_v39  ;;  %3473 = vmatprep.subr.mxu1 %v3745_v41 }
 0x392   :  { %3474 = vmatpush3.msra.mxu1 %v4116_v20 }
 0x393   :  { %v1053_v50 = vmax.f32 %v1052_v47, 0.0  ;;  %3476 = vmatmul.mubr.msk.f32.vlgmr.msra.gmra.mxu1 %vm150_vm2, %v2158_v49  ;;  %3485 = vmatprep.subr.mxu1 %v3745_v41 }
 0x394   :  { %3489 = vmatprep.mubr.msk.f32.mxu1 %vm3746_vm1, %v3745_v41 }
 0x395   :  { %v1071_v35 = vmul.f32 %v1070_v33, %v1053_v50  ;;  %v4360_v33 = vunpack.i.h.bf16 %v4210_v24 }
 0x397   :  { %v4276_v52 = vadd.f32 %v1073_v51, %v1071_v35  ;;  %v1627_v46 = vsel %vm890_vm13, %v4363_v38, %v4360_v33 }
 0x398   :  { %v1629_v49 = vsub.f32 1.0, %v1627_v46 }
 0x399   :  { %v1075_v36 = vmul.f32 %v4240_v30, %v4276_v52  ;;  %3333 = vmatmul.mubr.msk.f32.vlgmr.msra.gmra.mxu0 %vm150_vm2, %v4276_v52  ;;  %v1258_v11 = vmul.f32 %v1257_v9, %v4276_v52 }
 0x39a   :  { %3347 = vmatpush3.msra.mxu0 %v4078_v63  ;;  %3354 = vmatprep.mubr.msk.f32.mxu0 %vm3746_vm1, %v3745_v41 }
 0x39b   :  { %1076 = vst.msk [vmem:[#allocation3] sm:$0xf] %vm225_vm3, %v1075_v36  ;;  %3348 = vmatprep.subr.mxu0 %v3745_v41 }
 0x39c   :  { %3349 = vmatpush3.msra.mxu0 %v4083_v42 }
 0x39d   :  { %3350 = vmatprep.subr.mxu0 %v3745_v41 }
 0x39e   :  { %3351 = vmatpush3.msra.mxu0 %v4089_v43 }
 0x39f   :  { %3352 = vmatprep.subr.mxu0 %v3745_v41 }
 0x3a0   :  { %3353 = vmatpush3.msra.mxu0 %v4093_v44 }
 0x3a1   :  { %3368 = vmatprep.subr.mxu0 %v3745_v41 }
 0x423   :  { %v1233_v18 = vpop.f32.mrf.mxu1 }
 0x425   :  { %v3345_v20 = vpop.f32.mrf.mxu1 }
 0x426   :  { %v1797_v20 = vsel %vm890_vm13, %v4360_v33, %v4363_v38 }
 0x42b   :  { %v1419_v53 = vpop.f32.mrf.mxu1 }
 0x42d   :  { %v3367_v54 = vpop.f32.mrf.mxu1 }
 0x433   :  { %v1605_v55 = vpop.f32.mrf.mxu1 }
 0x435   :  { %v3389_v56 = vpop.f32.mrf.mxu1 }
 0x436   :  { %v1799_v56 = vsub.f32 1.0, %v1797_v20 }
 0x43b   :  { %v4293_v57 = vpop.f32.mrf.mxu1 }
 0x43d   :  { %v3411_v58 = vpop.f32.mrf.mxu1 }
 0x443   :  { %v4295_v59 = vpop.f32.mrf.mxu1 }
 0x445   :  { %v3433_v60 = vpop.f32.mrf.mxu1 }
 0x44b   :  { %v4297_v61 = vpop.f32.mrf.mxu1 }
 0x44d   :  { %v3455_v62 = vpop.f32.mrf.mxu1 }
 0x453   :  { %v4299_v45 = vpop.f32.mrf.mxu1 }
 0x455   :  { %v3477_v0 = vpop.f32.mrf.mxu1 }
 0x459   :  { %v1160_v3 = vpop.f32.mrf.mxu0 }
 0x45a   :  { %v1234_v4 = vadd.f32 %v1233_v18, %v1160_v3 }
 0x45b   :  { %v3334_v6 = vpop.f32.mrf.mxu0 }
 0x45c   :  { %v1237_v7 = vadd.f32 %v4261_v37, %v1234_v4  ;;  %v1967_v4 = vsel %vm890_vm13, %v4331_v16, %v4334_v17 }
 0x45e   :  { %v1238_v8 = vmax.f32 %v1237_v7, 0.0 }
 0x460   :  { %v1256_v10 = vmul.f32 %v1255_v5, %v1238_v8  ;;  %v1969_v8 = vsub.f32 1.0, %v1967_v4 }
 0x462   :  { %v4313_v13 = vadd.f32 %v1258_v11, %v1256_v10 }
 0x464   :  { %v1260_v12 = vmul.f32 %v4305_v2, %v4313_v13  ;;  %3355 = vmatmul.mubr.msk.f32.vlgmr.msra.gmra.mxu0 %vm150_vm2, %v4313_v13  ;;  %v1444_v32 = vmul.f32 %v1443_v28, %v4313_v13 }
 0x465   :  { %3369 = vmatpush3.msra.mxu0 %v4078_v63  ;;  %3376 = vmatprep.mubr.msk.f32.mxu0 %vm3746_vm1, %v3745_v41 }
 0x466   :  { %1262 = vst.msk [vmem:[#allocation3 + $0x4] sm:$0xf] %vm225_vm3, %v1260_v12  ;;  %3370 = vmatprep.subr.mxu0 %v3745_v41 }
 0x467   :  { %3371 = vmatpush3.msra.mxu0 %v4083_v42 }
 0x468   :  { %3372 = vmatprep.subr.mxu0 %v3745_v41 }
 0x469   :  { %3373 = vmatpush3.msra.mxu0 %v4089_v43 }
 0x46a   :  { %3374 = vmatprep.subr.mxu0 %v3745_v41 }
 0x46b   :  { %3375 = vmatpush3.msra.mxu0 %v4093_v44 }
 0x46c   :  { %3390 = vmatprep.subr.mxu0 %v3745_v41 }
 0x524   :  { %v1346_v21 = vpop.f32.mrf.mxu0 }
 0x525   :  { %v1420_v15 = vadd.f32 %v1419_v53, %v1346_v21  ;;  %v2137_v21 = vsel %vm890_vm13, %v4302_v1, %v4305_v2 }
 0x526   :  { %v3356_v23 = vpop.f32.mrf.mxu0 }
 0x527   :  { %v1423_v26 = vadd.f32 %v4261_v37, %v1420_v15  ;;  %v2139_v23 = vsub.f32 1.0, %v2137_v21 }
 0x529   :  { %v1424_v27 = vmax.f32 %v1423_v26, 0.0 }
 0x52b   :  { %v1442_v31 = vmul.f32 %v1441_v25, %v1424_v27  ;;  %v4437_v25 = vld [vmem:[#allocation13 + $0x8] sm:$0xff] }
 0x52c   :  { %3486 = vmatpush3.msra.mxu1 %v4437_v25 }
 0x52d   :  { %v4342_v22 = vadd.f32 %v1444_v32, %v1442_v31  ;;  %3487 = vmatprep.subr.mxu1 %v3745_v41 }
 0x52f   :  { %v1446_v19 = vmul.f32 %v4334_v17, %v4342_v22  ;;  %3377 = vmatmul.mubr.msk.f32.vlgmr.msra.gmra.mxu0 %vm150_vm2, %v4342_v22  ;;  %v1630_v51 = vmul.f32 %v1629_v49, %v4342_v22 }
 0x530   :  { %3391 = vmatpush3.msra.mxu0 %v4078_v63  ;;  %3398 = vmatprep.mubr.msk.f32.mxu0 %vm3746_vm1, %v3745_v41 }
 0x531   :  { %1448 = vst.msk [vmem:[#allocation3 + $0x8] sm:$0xf] %vm225_vm3, %v1446_v19  ;;  %3392 = vmatprep.subr.mxu0 %v3745_v41  ;;  %v1077_v19 = vmul.f32 %v4237_v14, %v4276_v52 }
 0x532   :  { %3393 = vmatpush3.msra.mxu0 %v4083_v42 }
 0x533   :  { %3394 = vmatprep.subr.mxu0 %v3745_v41 }
 0x534   :  { %3395 = vmatpush3.msra.mxu0 %v4089_v43 }
 0x535   :  { %3396 = vmatprep.subr.mxu0 %v3745_v41 }
 0x536   :  { %3397 = vmatpush3.msra.mxu0 %v4093_v44 }
 0x537   :  { %3412 = vmatprep.subr.mxu0 %v3745_v41 }
 0x5ef   :  { %v1532_v39 = vpop.f32.mrf.mxu0 }
 0x5f0   :  { %v1606_v40 = vadd.f32 %v1605_v55, %v1532_v39 }
 0x5f1   :  { %v3378_v34 = vpop.f32.mrf.mxu0 }
 0x5f2   :  { %v1609_v47 = vadd.f32 %v4261_v37, %v1606_v40 }
 0x5f4   :  { %v1610_v48 = vmax.f32 %v1609_v47, 0.0 }
 0x5f6   :  { %v1628_v50 = vmul.f32 %v1627_v46, %v1610_v48  ;;  %v2416_v46 = vld [vmem:[#allocation3 + $0x4] sm:$0xf] }
 0x5f8   :  { %v4371_v35 = vadd.f32 %v1630_v51, %v1628_v50 }
 0x5fa   :  { %v1632_v24 = vmul.f32 %v4363_v38, %v4371_v35  ;;  %3399 = vmatmul.mubr.msk.f32.vlgmr.msra.gmra.mxu0 %vm150_vm2, %v4371_v35  ;;  %v1800_v60 = vmul.f32 %v1799_v56, %v4371_v35 }
 0x5fb   :  { %3413 = vmatpush3.msra.mxu0 %v4078_v63  ;;  %3420 = vmatprep.mubr.msk.f32.mxu0 %vm3746_vm1, %v3745_v41 }
 0x5fc   :  { %1634 = vst.msk [vmem:[#allocation3 + $0xc] sm:$0xf] %vm225_vm3, %v1632_v24  ;;  %3414 = vmatprep.subr.mxu0 %v3745_v41 }
 0x5fd   :  { %3415 = vmatpush3.msra.mxu0 %v4083_v42 }
 0x5fe   :  { %3416 = vmatprep.subr.mxu0 %v3745_v41 }
 0x5ff   :  { %3417 = vmatpush3.msra.mxu0 %v4089_v43 }
 0x600   :  { %3418 = vmatprep.subr.mxu0 %v3745_v41 }
 0x601   :  { %3419 = vmatpush3.msra.mxu0 %v4093_v44 }
 0x602   :  { %3434 = vmatprep.subr.mxu0 %v3745_v41 }
 0x603   :  { %v2576_v52 = vld [vmem:[#allocation3 + $0xc] sm:$0xf] }
 0x6ba   :  { %v1718_v36 = vpop.f32.mrf.mxu0 }
 0x6bb   :  { %v1792_v18 = vadd.f32 %v4293_v57, %v1718_v36 }
 0x6bc   :  { %v3400_v53 = vpop.f32.mrf.mxu0 }
 0x6bd   :  { %v1795_v54 = vadd.f32 %v4261_v37, %v1792_v18  ;;  %v2307_v18 = vsel %vm890_vm13, %v4237_v14, %v4240_v30 }
 0x6bf   :  { %v1796_v55 = vmax.f32 %v1795_v54, 0.0 }
 0x6c1   :  { %v1798_v58 = vmul.f32 %v1797_v20, %v1796_v55  ;;  %v2309_v55 = vsub.f32 1.0, %v2307_v18 }
 0x6c3   :  { %v1801_v62 = vadd.f32 %v1800_v60, %v1798_v58 }
 0x6c5   :  { %v1802_v0 = vmul.f32 %v4360_v33, %v1801_v62  ;;  %3421 = vmatmul.mubr.msk.f32.vlgmr.msra.gmra.mxu0 %vm150_vm2, %v1801_v62  ;;  %v1970_v10 = vmul.f32 %v1969_v8, %v1801_v62  ;;  %v1805_v32 = vmul.f32 %v4363_v38, %v1801_v62 }
 0x6c6   :  { %3435 = vmatpush3.msra.mxu0 %v4078_v63  ;;  %3442 = vmatprep.mubr.msk.f32.mxu0 %vm3746_vm1, %v3745_v41 }
 0x6c7   :  { %1804 = vst.msk [vmem:[#allocation3 + $0x10] sm:$0xf] %vm225_vm3, %v1802_v0  ;;  %3436 = vmatprep.subr.mxu0 %v3745_v41 }
 0x6c8   :  { %3437 = vmatpush3.msra.mxu0 %v4083_v42 }
 0x6c9   :  { %3438 = vmatprep.subr.mxu0 %v3745_v41 }
 0x6ca   :  { %3439 = vmatpush3.msra.mxu0 %v4089_v43 }
 0x6cb   :  { %3440 = vmatprep.subr.mxu0 %v3745_v41 }
 0x6cc   :  { %3441 = vmatpush3.msra.mxu0 %v4093_v44 }
 0x6cd   :  { %3456 = vmatprep.subr.mxu0 %v3745_v41 }
 0x785   :  { %v1888_v57 = vpop.f32.mrf.mxu0 }
 0x786   :  { %v1962_v3 = vadd.f32 %v4295_v59, %v1888_v57 }
 0x787   :  { %v3422_v5 = vpop.f32.mrf.mxu0 }
 0x788   :  { %v1965_v6 = vadd.f32 %v4261_v37, %v1962_v3 }
 0x78a   :  { %v1966_v7 = vmax.f32 %v1965_v6, 0.0 }
 0x78c   :  { %v1968_v9 = vmul.f32 %v1967_v4, %v1966_v7  ;;  %v3061_v7 = vld [vmem:[%s4594_s0 + $0xc] sm:$0xf] }
 0x78e   :  { %v4414_v11 = vadd.f32 %v1970_v10, %v1968_v9 }
 0x790   :  { %v1972_v12 = vmul.f32 %v4331_v16, %v4414_v11  ;;  %3443 = vmatmul.mubr.msk.f32.vlgmr.msra.gmra.mxu0 %vm150_vm2, %v4414_v11  ;;  %v2140_v26 = vmul.f32 %v2139_v23, %v4414_v11  ;;  %v1975_v29 = vmul.f32 %v4334_v17, %v4414_v11  ;;  %v4514_v17 = vld [vmem:[%s4605_s11] ss:$0 sm:$0xff] }
 0x791   :  { %3457 = vmatpush3.msra.mxu0 %v4078_v63  ;;  %3464 = vmatprep.mubr.msk.f32.mxu0 %vm3746_vm1, %v3745_v41 }
 0x792   :  { %1974 = vst.msk [vmem:[#allocation3 + $0x14] sm:$0xf] %vm225_vm3, %v1972_v12  ;;  %3458 = vmatprep.subr.mxu0 %v3745_v41 }
 0x793   :  { %3459 = vmatpush3.msra.mxu0 %v4083_v42 }
 0x794   :  { %3460 = vmatprep.subr.mxu0 %v3745_v41 }
 0x795   :  { %3461 = vmatpush3.msra.mxu0 %v4089_v43 }
 0x796   :  { %3462 = vmatprep.subr.mxu0 %v3745_v41 }
 0x797   :  { %3463 = vmatpush3.msra.mxu0 %v4093_v44 }
 0x798   :  { %3478 = vmatprep.subr.mxu0 %v3745_v41 }
 0x799   :  { %v2736_v49 = vld [vmem:[#allocation3 + $0x14] sm:$0xf] }
 0x850   :  { %v2058_v63 = vpop.f32.mrf.mxu0 }
 0x851   :  { %v2132_v59 = vadd.f32 %v4297_v61, %v2058_v63  ;;  %v4442_v61 = vld [vmem:[#allocation13] sm:$0xff]  ;;  %v3065_v63 = vld [vmem:[%s4594_s0 + $0x14] sm:$0xf] }
 0x852   :  { %v3444_v15 = vpop.f32.mrf.mxu0  ;;  %3488 = vmatpush3.msra.mxu1 %v4442_v61 }
 0x853   :  { %v2135_v42 = vadd.f32 %v4261_v37, %v2132_v59  ;;  %3499 = vmatprep.subr.mxu1 %v3745_v41 }
 0x855   :  { %v2136_v43 = vmax.f32 %v2135_v42, 0.0 }
 0x857   :  { %v2138_v44 = vmul.f32 %v2137_v21, %v2136_v43  ;;  %v2331_v21 = vld [vmem:[#allocation3] sm:$0xf] }
 0x859   :  { %v2141_v27 = vadd.f32 %v2140_v26, %v2138_v44 }
 0x85b   :  { %v2142_v28 = vmul.f32 %v4302_v1, %v2141_v27  ;;  %3465 = vmatmul.mubr.msk.f32.vlgmr.msra.gmra.mxu0 %vm150_vm2, %v2141_v27  ;;  %v2145_v31 = vmul.f32 %v4305_v2, %v2141_v27  ;;  %v1449_v2 = vmul.f32 %v4331_v16, %v4342_v22  ;;  %v2310_v58 = vmul.f32 %v2309_v55, %v2141_v27  ;;  %v2496_v27 = vld [vmem:[#allocation3 + $0x8] sm:$0xf] }
 0x85c   :  { %3479 = vmatpush3.msra.mxu0 %v4437_v25  ;;  %3482 = vmatprep.mubr.msk.f32.mxu0 %vm3746_vm1, %v3745_v41 }
 0x85d   :  { %2144 = vst.msk [vmem:[#allocation3 + $0x18] sm:$0xf] %vm225_vm3, %v2142_v28  ;;  %2147 = vrot.lane.b32.xlu0 %v2145_v31, %s3749_s9  ;;  %3480 = vmatprep.subr.mxu0 %v3745_v41 }
 0x85e   :  { %3481 = vmatpush3.msra.mxu0 %v4442_v61 }
 0x85f   :  { %3492 = vmatprep.subr.mxu0 %v3745_v41 }
 0x861   :  { %1807 = vrot.lane.b32.xlu0 %v1805_v32, %s3749_s9  ;;  %v2656_v32 = vld [vmem:[#allocation3 + $0x10] sm:$0xf] }
 0x865   :  { %1451 = vrot.lane.b32.xlu0 %v1449_v2, %s3749_s9 }
 0x869   :  { %1079 = vrot.lane.b32.xlu0 %v1077_v19, %s3749_s9 }
 0x8cf   :  { %v2148_v39 = vpop.permute.xlu0 %2147 }
 0x8d0   :  { %2151 = vst.msk [vmem:[#allocation4 + $0x4] sm:$0xf] %vm225_vm3, %v2148_v39  ;;  %v2816_v39 = vld [vmem:[#allocation3 + $0x18] sm:$0xf] }
 0x8d3   :  { %v1808_v40 = vpop.permute.xlu0 %1807 }
 0x8d4   :  { %1811 = vst.msk [vmem:[#allocation4 + $0xc] sm:$0xf] %vm225_vm3, %v1808_v40 }
 0x8d7   :  { %v1452_v38 = vpop.permute.xlu0 %1451  ;;  %v2417_v34 = vld [vmem:[#allocation4 + $0x4] sm:$0xf] }
 0x8d8   :  { %1455 = vst.msk [vmem:[#allocation4 + $0x14] sm:$0xf] %vm225_vm3, %v1452_v38  ;;  %v2418_v47 = vadd.f32 %v2417_v34, %v2416_v46  ;;  %v3069_v34 = vld [vmem:[%s4594_s0 + $0x1c] sm:$0xf] }
 0x8da   :  { %3490 = vmatmul.mubr.msk.f32.vlgmr.msra.gmra.mxu1 %vm898_vm6, %v2418_v47 }
 0x8db   :  { %3500 = vmatpush3.msra.mxu1 %v4437_v25  ;;  %v1080_v16 = vpop.permute.xlu0 %1079  ;;  %3503 = vmatprep.mubr.msk.f32.mxu1 %vm3746_vm1, %v3745_v41  ;;  %v2577_v22 = vld [vmem:[#allocation4 + $0xc] sm:$0xf] }
 0x8dc   :  { %1083 = vst.msk [vmem:[#allocation4 + $0x1c] sm:$0xf] %vm225_vm3, %v1080_v16  ;;  %3501 = vmatprep.subr.mxu1 %v3745_v41  ;;  %v2578_v48 = vadd.f32 %v2577_v22, %v2576_v52 }
 0x8dd   :  { %3502 = vmatpush3.msra.mxu1 %v4442_v61 }
 0x8de   :  { %3504 = vmatmul.mubr.msk.f32.vlgmr.msra.gmra.mxu1 %vm898_vm6, %v2578_v48  ;;  %3513 = vmatprep.subr.mxu1 %v3745_v41 }
 0x8df   :  { %3514 = vmatpush3.msra.mxu1 %v4437_v25  ;;  %3517 = vmatprep.mubr.msk.f32.mxu1 %vm3746_vm1, %v3745_v41  ;;  %v2737_v50 = vld [vmem:[#allocation4 + $0x14] sm:$0xf] }
 0x8e0   :  { %3515 = vmatprep.subr.mxu1 %v3745_v41  ;;  %v2738_v51 = vadd.f32 %v2737_v50, %v2736_v49 }
 0x8e1   :  { %3516 = vmatpush3.msra.mxu1 %v4442_v61 }
 0x8e2   :  { %3518 = vmatmul.mubr.msk.f32.vlgmr.msra.gmra.mxu1 %vm898_vm6, %v2738_v51  ;;  %3527 = vmatprep.subr.mxu1 %v3745_v41 }
 0x8e3   :  { %3528 = vmatpush3.msra.mxu1 %v4437_v25  ;;  %3531 = vmatprep.mubr.msk.f32.mxu1 %vm3746_vm1, %v3745_v41 }
 0x8e4   :  { %3529 = vmatprep.subr.mxu1 %v3745_v41 }
 0x8e5   :  { %3530 = vmatpush3.msra.mxu1 %v4442_v61 }
 0x91b   :  { %v2228_v24 = vpop.f32.mrf.mxu0 }
 0x91c   :  { %v2302_v36 = vadd.f32 %v4299_v45, %v2228_v24 }
 0x91d   :  { %v3466_v20 = vpop.f32.mrf.mxu0 }
 0x91e   :  { %v2305_v53 = vadd.f32 %v4261_v37, %v2302_v36  ;;  %v1635_v37 = vmul.f32 %v4360_v33, %v4371_v35  ;;  %v3057_v35 = vld [vmem:[%s4594_s0 + $0x4] sm:$0xf] }
 0x920   :  { %v2306_v54 = vmax.f32 %v2305_v53, 0.0 }
 0x922   :  { %v2308_v56 = vmul.f32 %v2307_v18, %v2306_v54 }
 0x924   :  { %v2311_v60 = vadd.f32 %v2310_v58, %v2308_v56 }
 0x926   :  { %v2312_v62 = vmul.f32 %v4237_v14, %v2311_v60  ;;  %2321 = vst.msk [vmem:[#allocation15] sm:$0xf] %vm225_vm3, %v2311_v60  ;;  %2323 = vrot.lane.b32.xlu0 %v2311_v60, %s3749_s9  ;;  %v2315_v45 = vmul.f32 %v4240_v30, %v2311_v60  ;;  %v2897_v14 = vld [vmem:[#allocation4 + $0x1c] sm:$0xf]  ;;  %v1263_v30 = vmul.f32 %v4302_v1, %v4313_v13 }
 0x928   :  { %2314 = vst.msk [vmem:[#allocation3 + $0x1c] sm:$0xf] %vm225_vm3, %v2312_v62  ;;  %2317 = vrot.lane.b32.xlu1 %v2315_v45, %s3749_s9 }
 0x92c   :  { %1977 = vrot.lane.b32.xlu1 %v1975_v29, %s3749_s9 }
 0x92f   :  { %v2896_v0 = vld [vmem:[#allocation3 + $0x1c] sm:$0xf] }
 0x930   :  { %1637 = vrot.lane.b32.xlu1 %v1635_v37, %s3749_s9  ;;  %v2898_v57 = vadd.f32 %v2897_v14, %v2896_v0 }
 0x932   :  { %3532 = vmatmul.mubr.msk.f32.vlgmr.msra.gmra.mxu1 %vm898_vm6, %v2898_v57 }
 0x934   :  { %1265 = vrot.lane.b32.xlu1 %v1263_v30, %s3749_s9 }
 0x998   :  { %v2324_v3 = vpop.permute.xlu0 %2323 }
 0x999   :  { %2327 = vst.msk [vmem:[#allocation15 + $0x4] sm:$0xf] %vm225_vm3, %v2324_v3 }
 0x99a   :  { %v2488_v33 = vpop.f32.mrf.mxu1  ;;  %v2318_v4 = vpop.permute.xlu1 %2317 }
 0x99b   :  { %v2489_v5 = vadd.f32 %v4514_v17, %v2488_v33  ;;  %2320 = vst.msk [vmem:[#allocation4] sm:$0xf] %vm225_vm3, %v2318_v4 }
 0x99c   :  { %v3491_v1 = vpop.f32.mrf.mxu1 }
 0x99d   :  { %v2493_v13 = vadd.f32 %v3057_v35, %v2489_v5 }
 0x99e   :  { %v2648_v6 = vpop.f32.mrf.mxu1  ;;  %v1978_v8 = vpop.permute.xlu1 %1977 }
 0x99f   :  { %2495 = vst.msk [vmem:[#allocation14 + $0x4] sm:$0xf] %vm115_vm0, %v2493_v13  ;;  %v2649_v9 = vadd.f32 %v4514_v17, %v2648_v6 }
 0x9a0   :  { %1981 = vst.msk [vmem:[#allocation4 + $0x8] sm:$0xf] %vm225_vm3, %v1978_v8  ;;  %v3505_v10 = vpop.f32.mrf.mxu1 }
 0x9a1   :  { %v2653_v11 = vadd.f32 %v3061_v7, %v2649_v9 }
 0x9a2   :  { %v2808_v12 = vpop.f32.mrf.mxu1  ;;  %v1638_v59 = vpop.permute.xlu1 %1637  ;;  %v2332_v15 = vld [vmem:[#allocation4] sm:$0xf] }
 0x9a3   :  { %2655 = vst.msk [vmem:[#allocation14 + $0xc] sm:$0xf] %vm115_vm0, %v2653_v11  ;;  %v2809_v42 = vadd.f32 %v4514_v17, %v2808_v12  ;;  %v2333_v43 = vadd.f32 %v2332_v15, %v2331_v21 }
 0x9a4   :  { %1641 = vst.msk [vmem:[#allocation4 + $0x10] sm:$0xf] %vm225_vm3, %v1638_v59  ;;  %v3519_v23 = vpop.f32.mrf.mxu1 }
 0x9a5   :  { %v2813_v44 = vadd.f32 %v3065_v63, %v2809_v42  ;;  %3483 = vmatmul.mubr.msk.f32.vlgmr.msra.gmra.mxu0 %vm898_vm6, %v2333_v43 }
 0x9a6   :  { %3493 = vmatpush3.msra.mxu0 %v4437_v25  ;;  %v1266_v26 = vpop.permute.xlu1 %1265  ;;  %3496 = vmatprep.mubr.msk.f32.mxu0 %vm3746_vm1, %v3745_v41 }
 0x9a7   :  { %v2497_v28 = vld [vmem:[#allocation4 + $0x8] sm:$0xf]  ;;  %2815 = vst.msk [vmem:[#allocation14 + $0x14] sm:$0xf] %vm115_vm0, %v2813_v44  ;;  %3494 = vmatprep.subr.mxu0 %v3745_v41 }
 0x9a8   :  { %1269 = vst.msk [vmem:[#allocation4 + $0x18] sm:$0xf] %vm225_vm3, %v1266_v26  ;;  %v2498_v31 = vadd.f32 %v2497_v28, %v2496_v27  ;;  %3495 = vmatpush3.msra.mxu0 %v4442_v61 }
 0x9a9   :  { %3506 = vmatprep.subr.mxu0 %v3745_v41 }
 0x9aa   :  { %3497 = vmatmul.mubr.msk.f32.vlgmr.msra.gmra.mxu0 %vm898_vm6, %v2498_v31 }
 0x9ab   :  { %3507 = vmatpush3.msra.mxu0 %v4437_v25  ;;  %3510 = vmatprep.mubr.msk.f32.mxu0 %vm3746_vm1, %v3745_v41  ;;  %v2657_v2 = vld [vmem:[#allocation4 + $0x10] sm:$0xf] }
 0x9ac   :  { %3508 = vmatprep.subr.mxu0 %v3745_v41  ;;  %v2658_v19 = vadd.f32 %v2657_v2, %v2656_v32 }
 0x9ad   :  { %3509 = vmatpush3.msra.mxu0 %v4442_v61 }
 0x9ae   :  { %3520 = vmatprep.subr.mxu0 %v3745_v41  ;;  %3511 = vmatmul.mubr.msk.f32.vlgmr.msra.gmra.mxu0 %vm898_vm6, %v2658_v19 }
 0x9af   :  { %3521 = vmatpush3.msra.mxu0 %v4437_v25  ;;  %3524 = vmatprep.mubr.msk.f32.mxu0 %vm3746_vm1, %v3745_v41  ;;  %v2817_v40 = vld [vmem:[#allocation4 + $0x18] sm:$0xf] }
 0x9b0   :  { %3522 = vmatprep.subr.mxu0 %v3745_v41  ;;  %v2818_v38 = vadd.f32 %v2817_v40, %v2816_v39 }
 0x9b1   :  { %3523 = vmatpush3.msra.mxu0 %v4442_v61 }
 0x9b2   :  { %3525 = vmatmul.mubr.msk.f32.vlgmr.msra.gmra.mxu0 %vm898_vm6, %v2818_v38 }
 0x9f2   :  { %v2968_v46 = vpop.f32.mrf.mxu1 }
 0x9f3   :  { %v2969_v47 = vadd.f32 %v4514_v17, %v2968_v46 }
 0x9f4   :  { %v3533_v25 = vpop.f32.mrf.mxu1 }
 0x9f5   :  { %v2973_v16 = vadd.f32 %v3069_v34, %v2969_v47 }
 0x9f7   :  { %2975 = vst.msk [vmem:[#allocation14 + $0x1c] sm:$0xf] %vm115_vm0, %v2973_v16 }
 0x9f8   :  { %3699 = shalt.err (!%p3696_p1)
}
 0x9f9   :  { %s3751_s20 = smov 64   ;;  %s3752_s3 = smov 4   ;;  %v2413_v61 = vld [vmem:[%s4594_s0] sm:$0xf]  ;;  %v3059_v50 = vld [vmem:[%s4594_s0 + $0x8] sm:$0xf] }
 0x9fa   :  { %2999 = dma.vmem_to_hbm [thread:$0]  %s2994_s19, 128, %s4607_s13, [#allocation16], %s3751_s20, %s3751_s20, %s3752_s3  }
 0x9fb   :  { %v3063_v20 = vld [vmem:[%s4594_s0 + $0x10] sm:$0xf]  ;;  %v3067_v58 = vld [vmem:[%s4594_s0 + $0x18] sm:$0xf]  ;;  %s3753_s25 = smov [#allocation14]  }
 0x9fc   :  { %s2981_s1 = sshll.u32 %s3753_s25, 4  ;;  %s2982_s1 = int_to_ptr.vmem [resolvable:$true] %s2981_s1 }
 0x9fd   :  { %s3708_s26 = scalar_lea.vmem %s2982_s1, 512  ;;  %p3713_p3 = scmp.lt.s32.totalorder %s2982_s1, %s2982_s1 }
 0x9fe   :  { %p3709_p2 = scmp.ne.s32.totalorder %s2982_s1, %s3708_s26  ;;  %p3714_p4 = scmp.lt.s32.totalorder %s3708_s26, %s3708_s26 }
 0xa00   :  { %p3715_p5 = por %p3714_p4, %p3713_p3 }
 0xa02   :  { %p3716_p6 = pnand %p3715_p5, %p3709_p2 }
 0xa65   :  { %v2409_v41 = vpop.f32.mrf.mxu0 }
 0xa66   :  { %v2410_v52 = vadd.f32 %v4514_v17, %v2409_v41 }
 0xa67   :  { %v3484_v22 = vpop.f32.mrf.mxu0 }
 0xa68   :  { %v2414_v48 = vadd.f32 %v2413_v61, %v2410_v52 }
 0xa6a   :  { %v2568_v49 = vpop.f32.mrf.mxu0  ;;  %2415 = vst.msk [vmem:[#allocation14] sm:$0xf] %vm115_vm0, %v2414_v48 }
 0xa6b   :  { %v2569_v51 = vadd.f32 %v4514_v17, %v2568_v49 }
 0xa6c   :  { %v3498_v24 = vpop.f32.mrf.mxu0 }
 0xa6d   :  { %v2573_v36 = vadd.f32 %v3059_v50, %v2569_v51 }
 0xa6e   :  { %v2728_v18 = vpop.f32.mrf.mxu0 }
 0xa6f   :  { %2575 = vst.msk [vmem:[#allocation14 + $0x8] sm:$0xf] %vm115_vm0, %v2573_v36  ;;  %v2729_v53 = vadd.f32 %v4514_v17, %v2728_v18 }
 0xa70   :  { %v3512_v54 = vpop.f32.mrf.mxu0 }
 0xa71   :  { %v2733_v55 = vadd.f32 %v3063_v20, %v2729_v53 }
 0xa72   :  { %v2888_v56 = vpop.f32.mrf.mxu0 }
 0xa73   :  { %2735 = vst.msk [vmem:[#allocation14 + $0x10] sm:$0xf] %vm115_vm0, %v2733_v55  ;;  %v2889_v60 = vadd.f32 %v4514_v17, %v2888_v56 }
 0xa74   :  { %v3526_v62 = vpop.f32.mrf.mxu0 }
 0xa75   :  { %v2893_v45 = vadd.f32 %v3067_v58, %v2889_v60 }
 0xa77   :  { %2895 = vst.msk [vmem:[#allocation14 + $0x18] sm:$0xf] %vm115_vm0, %v2893_v45 }
 0xa78   :  { %3719 = shalt.err (!%p3716_p6)
}
 0xa79   :  { %2987 = dma.vmem_to_hbm [thread:$0]  %s2982_s1, 512, %s4606_s12, [#allocation7], %s3751_s20, %s3751_s20, %s3752_s3  }
 0xa7a   :  { %3734 = dma.done.wait [#allocation7], 512  }
 0xa7b   :  { %3735 = vsyncadd [#allocation7], 4294966784 }
 0xa7c   :  { %3736 = dma.done.wait [#allocation16], 128  }
 0xa7d   :  { %3737 = vsyncadd [#allocation16], 4294967168 }
 0xa7e   :  { %3006 = vsyncpa [#allocation6], 1 }
 0xa7f   :  { %3007 = vsyncpa [#allocation9], 1 }
 0xa80   :  { %3008 = vsyncpa [#allocation12], 1 }
 0xa81   :  { %3009 = vsyncpa [#allocation7], 1 }
 0xa82   :  { %3010 = vsyncpa [#allocation16], 1 }

</bundles_post_ra>
